<compile_context>
chip_gen: v5e
topology: v5e:2x2
jax: 0.10.0
libtpu: 0.0.40
codegen_flags: <defaults>
</compile_context>

<pallas_src>
import functools

import jax
import jax.numpy as jnp
from jax.experimental import pallas as pl
from jax.experimental.pallas import tpu as pltpu


# ----------------------------------------------------------------------------
# Fused kernel: encoder tiles over points (grid axis 0, "arbitrary"), running
# max-pool lives in a VMEM scratch, heads execute on the last grid iteration.
# ----------------------------------------------------------------------------
def _pointnet_kernel(x_ref,
                     w1, b1, w2, b2, w3, b3,                 # encoder
                     wA, bA, w2r, b2r, w3r, b3r, w5, b5, w7, b7,  # heads
                     xp_ref, xreg_ref, xcls_ref,
                     gmax, *, n_valid, tile_m):
    i = pl.program_id(0)
    bf16, f32 = jnp.bfloat16, jnp.float32

    @pl.when(i == 0)
    def _init():
        gmax[...] = jnp.full(gmax.shape, -jnp.inf, gmax.dtype)

    # --- per-point MLP (bf16 MXU, f32 accumulate / elementwise) ---
    h = jnp.dot(x_ref[...], w1[...], preferred_element_type=f32)
    h = jnp.maximum(h + b1[...], 0.0)
    h = jnp.dot(h.astype(bf16), w2[...], preferred_element_type=f32)
    h = jnp.maximum(h + b2[...], 0.0)
    h = jnp.dot(h.astype(bf16), w3[...], preferred_element_type=f32)
    h = jnp.maximum(h + b3[...], 0.0)                        # (tile_m, 512) f32

    # --- mask padded rows, then accumulate the global max-pool ---
    row = i * tile_m + jax.lax.broadcasted_iota(jnp.int32, (tile_m, 1), 0)
    h = jnp.where(row < n_valid, h, -jnp.inf)
    gmax[...] = jnp.maximum(gmax[...], jnp.max(h, axis=0, keepdims=True))

    # --- heads, fused into the epilogue of the last grid step ---
    @pl.when(i == pl.num_programs(0) - 1)
    def _heads():
        g = gmax[...].astype(bf16)                           # (1, 512)

        # fused fc1 | fc4 | fc6  -> (1, 1024), lane-dense N
        ha = jnp.dot(g, wA[...], preferred_element_type=f32) + bA[...]
        ha = jnp.maximum(ha, 0.0)
        h1 = ha[:, 0:512].astype(bf16)      # regression branch (fc1 out)
        h4 = ha[:, 512:768].astype(bf16)    # classification branch (fc4 out)
        h6 = ha[:, 768:1024].astype(bf16)   # probability branch (fc6 out)

        # regression: relu(fc2) -> fc3  (7 outputs)
        r = jnp.dot(h1, w2r[...], preferred_element_type=f32) + b2r[...]
        r = jnp.maximum(r, 0.0)
        xreg_ref[...] = (jnp.dot(r.astype(bf16), w3r[...],
                                 preferred_element_type=f32) + b3r[...])

        # classification: fc5 (12 outputs)
        xcls_ref[...] = (jnp.dot(h4, w5[...],
                                 preferred_element_type=f32) + b5[...])

        # probability: sigmoid(fc7) (1 output)
        p = jnp.dot(h6, w7[...], preferred_element_type=f32) + b7[...]
        xp_ref[...] = jax.nn.sigmoid(p)


@functools.partial(jax.jit, static_argnames=("tile_m",))
def pointnet_forward(x, params, *, tile_m=256):
    M, Cin = x.shape
    K_PAD = 256                                 # 131 -> 2 x 128 lanes
    grid_m = -(-M // tile_m)
    m_pad = grid_m * tile_m
    bf16 = jnp.bfloat16

    # Lane-aligned, bf16, zero-padded inputs/weights (zeros contribute nothing).
    xp = jnp.pad(x.astype(bf16), ((0, m_pad - M), (0, K_PAD - Cin)))
    w1 = jnp.pad(params["enc1_w"].astype(bf16), ((0, K_PAD - Cin), (0, 0)))
    w2 = params["enc2_w"].astype(bf16)
    w3 = params["enc3_w"].astype(bf16)
    b1, b2, b3 = params["enc1_b"], params["enc2_b"], params["enc3_b"]

    # Fuse fc1|fc4|fc6 into one (512, 1024) matmul.
    wA = jnp.concatenate([params["fc1_w"], params["fc4_w"], params["fc6_w"]],
                         axis=1).astype(bf16)
    bA = jnp.concatenate([params["fc1_b"], params["fc4_b"], params["fc6_b"]],
                         axis=1)
    w2r, b2r = params["fc2_w"].astype(bf16), params["fc2_b"]
    w3r, b3r = params["fc3_w"].astype(bf16), params["fc3_b"]
    w5, b5 = params["fc5_w"].astype(bf16), params["fc5_b"]
    w7, b7 = params["fc7_w"].astype(bf16), params["fc7_b"]

    weights = (w1, b1, w2, b2, w3, b3,
               wA, bA, w2r, b2r, w3r, b3r, w5, b5, w7, b7)

    kernel = functools.partial(_pointnet_kernel, n_valid=M, tile_m=tile_m)

    const = lambda i: (0, 0)   # block index never changes -> fetched once
    in_specs = [pl.BlockSpec((tile_m, K_PAD), lambda i: (i, 0))]
    in_specs += [pl.BlockSpec(w.shape, const) for w in weights]

    return pl.pallas_call(
        kernel,
        out_shape=(jax.ShapeDtypeStruct((1, 1), jnp.float32),    # x_p
                   jax.ShapeDtypeStruct((1, 7), jnp.float32),    # x_reg
                   jax.ShapeDtypeStruct((1, 12), jnp.float32)),  # x_cls
        grid_spec=pltpu.PrefetchScalarGridSpec(
            num_scalar_prefetch=0,
            grid=(grid_m,),
            in_specs=in_specs,
            out_specs=(pl.BlockSpec((1, 1), const),
                       pl.BlockSpec((1, 7), const),
                       pl.BlockSpec((1, 12), const)),
            scratch_shapes=[pltpu.VMEM((1, 512), jnp.float32)],
        ),
        compiler_params=pltpu.CompilerParams(
            dimension_semantics=("arbitrary",)),
    )(xp, *weights)


# ----------------------------------------------------------------------------
# Parameters (deterministic, synthetic).  Weights are stored (in, out) so the
# kernel computes x @ W + b, matching PyTorch's x @ W.T + b for equivalently
# initialized layers.
# ----------------------------------------------------------------------------
def init_params(key):
    dims = {
        "enc1": (131, 128), "enc2": (128, 256), "enc3": (256, 512),
        "fc1": (512, 512), "fc2": (512, 256), "fc3": (256, 7),
        "fc4": (512, 256), "fc5": (256, 12),
        "fc6": (512, 256), "fc7": (256, 1),
    }
    params = {}
    keys = jax.random.split(key, len(dims))
    for k, (name, (fan_in, fan_out)) in zip(keys, dims.items()):
        kw, kb = jax.random.split(k)
        scale = 1.0 / jnp.sqrt(fan_in)
        params[f"{name}_w"] = (
            jax.random.uniform(kw, (fan_in, fan_out), jnp.float32, -1.0, 1.0)
            * scale)
        params[f"{name}_b"] = (
            jax.random.uniform(kb, (1, fan_out), jnp.float32, -1.0, 1.0)
            * scale)
    return params


def pointnet_reference(x, params):
    """Pure-JAX reference mirroring the kernel's bf16-matmul / f32-accum math."""
    bf16, f32 = jnp.bfloat16, jnp.float32

    def mm(a, w):
        return jnp.dot(a.astype(bf16), w.astype(bf16),
                       preferred_element_type=f32)

    h = jnp.maximum(mm(x, params["enc1_w"]) + params["enc1_b"], 0.0)
    h = jnp.maximum(mm(h, params["enc2_w"]) + params["enc2_b"], 0.0)
    h = jnp.maximum(mm(h, params["enc3_w"]) + params["enc3_b"], 0.0)
    g = jnp.max(h, axis=0, keepdims=True)

    r = jnp.maximum(mm(g, params["fc1_w"]) + params["fc1_b"], 0.0)
    r = jnp.maximum(mm(r, params["fc2_w"]) + params["fc2_b"], 0.0)
    x_reg = mm(r, params["fc3_w"]) + params["fc3_b"]

    c = jnp.maximum(mm(g, params["fc4_w"]) + params["fc4_b"], 0.0)
    x_cls = mm(c, params["fc5_w"]) + params["fc5_b"]

    p = jnp.maximum(mm(g, params["fc6_w"]) + params["fc6_b"], 0.0)
    x_p = jax.nn.sigmoid(mm(p, params["fc7_w"]) + params["fc7_b"])
    return x_p, x_reg, x_cls


if __name__ == "__main__":
    key = jax.random.PRNGKey(0)
    k_x, k_p = jax.random.split(key)

    M = 600                   # not a tile multiple -> exercises padding + mask
    x = jax.random.normal(k_x, (M, 131), dtype=jnp.float32)
    params = init_params(k_p)

    x_p, x_reg, x_cls = pointnet_forward(x, params, tile_m=256)
    jax.block_until_ready((x_p, x_reg, x_cls))

    rp, rr, rc = pointnet_reference(x, params)
    assert x_p.shape == (1, 1) and x_reg.shape == (1, 7) and x_cls.shape == (1, 12)
    assert jnp.allclose(x_p, rp, atol=5e-3, rtol=5e-3)
    assert jnp.allclose(x_reg, rr, atol=5e-3, rtol=5e-3)
    assert jnp.allclose(x_cls, rc, atol=5e-3, rtol=5e-3)

    print("KERNEL_OK")
</pallas_src>

<mosaic_0001>
module attributes {stable_mosaic.version = 11 : i64} {
  func.func @_pointnet_kernel(%arg0: i32, %arg1: memref<256x256xbf16, #tpu.memory_space<vmem>>, %arg2: memref<256x128xbf16, #tpu.memory_space<vmem>>, %arg3: memref<1x128xf32, #tpu.memory_space<vmem>>, %arg4: memref<128x256xbf16, #tpu.memory_space<vmem>>, %arg5: memref<1x256xf32, #tpu.memory_space<vmem>>, %arg6: memref<256x512xbf16, #tpu.memory_space<vmem>>, %arg7: memref<1x512xf32, #tpu.memory_space<vmem>>, %arg8: memref<512x1024xbf16, #tpu.memory_space<vmem>>, %arg9: memref<1x1024xf32, #tpu.memory_space<vmem>>, %arg10: memref<512x256xbf16, #tpu.memory_space<vmem>>, %arg11: memref<1x256xf32, #tpu.memory_space<vmem>>, %arg12: memref<256x7xbf16, #tpu.memory_space<vmem>>, %arg13: memref<1x7xf32, #tpu.memory_space<vmem>>, %arg14: memref<256x12xbf16, #tpu.memory_space<vmem>>, %arg15: memref<1x12xf32, #tpu.memory_space<vmem>>, %arg16: memref<256x1xbf16, #tpu.memory_space<vmem>>, %arg17: memref<1x1xf32, #tpu.memory_space<vmem>>, %arg18: memref<1x1xf32, #tpu.memory_space<vmem>>, %arg19: memref<1x7xf32, #tpu.memory_space<vmem>>, %arg20: memref<1x12xf32, #tpu.memory_space<vmem>>, %arg21: memref<1x512xf32, #tpu.memory_space<vmem>>) attributes {dimension_semantics = [#tpu.dimension_semantics<arbitrary>], iteration_bounds = array<i64: 3>, scalar_prefetch = 0 : i64, scratch_operands = 1 : i64, tpu.core_type = #tpu.core_type<tc>, window_params = [{transform_indices = @transform_0, window_bounds = array<i64: 256, 256>}, {pipeline_mode = #tpu.pipeline_mode<synchronous>, transform_indices = @transform_1, window_bounds = array<i64: 256, 128>}, {pipeline_mode = #tpu.pipeline_mode<synchronous>, transform_indices = @transform_2, window_bounds = array<i64: 1, 128>}, {pipeline_mode = #tpu.pipeline_mode<synchronous>, transform_indices = @transform_3, window_bounds = array<i64: 128, 256>}, {pipeline_mode = #tpu.pipeline_mode<synchronous>, transform_indices = @transform_4, window_bounds = array<i64: 1, 256>}, {pipeline_mode = #tpu.pipeline_mode<synchronous>, transform_indices = @transform_5, window_bounds = array<i64: 256, 512>}, {pipeline_mode = #tpu.pipeline_mode<synchronous>, transform_indices = @transform_6, window_bounds = array<i64: 1, 512>}, {pipeline_mode = #tpu.pipeline_mode<synchronous>, transform_indices = @transform_7, window_bounds = array<i64: 512, 1024>}, {pipeline_mode = #tpu.pipeline_mode<synchronous>, transform_indices = @transform_8, window_bounds = array<i64: 1, 1024>}, {pipeline_mode = #tpu.pipeline_mode<synchronous>, transform_indices = @transform_9, window_bounds = array<i64: 512, 256>}, {pipeline_mode = #tpu.pipeline_mode<synchronous>, transform_indices = @transform_10, window_bounds = array<i64: 1, 256>}, {pipeline_mode = #tpu.pipeline_mode<synchronous>, transform_indices = @transform_11, window_bounds = array<i64: 256, 7>}, {pipeline_mode = #tpu.pipeline_mode<synchronous>, transform_indices = @transform_12, window_bounds = array<i64: 1, 7>}, {pipeline_mode = #tpu.pipeline_mode<synchronous>, transform_indices = @transform_13, window_bounds = array<i64: 256, 12>}, {pipeline_mode = #tpu.pipeline_mode<synchronous>, transform_indices = @transform_14, window_bounds = array<i64: 1, 12>}, {pipeline_mode = #tpu.pipeline_mode<synchronous>, transform_indices = @transform_15, window_bounds = array<i64: 256, 1>}, {pipeline_mode = #tpu.pipeline_mode<synchronous>, transform_indices = @transform_16, window_bounds = array<i64: 1, 1>}, {pipeline_mode = #tpu.pipeline_mode<synchronous>, transform_indices = @transform_17, window_bounds = array<i64: 1, 1>}, {pipeline_mode = #tpu.pipeline_mode<synchronous>, transform_indices = @transform_18, window_bounds = array<i64: 1, 7>}, {pipeline_mode = #tpu.pipeline_mode<synchronous>, transform_indices = @transform_19, window_bounds = array<i64: 1, 12>}]} {
    %c0_i32 = arith.constant 0 : i32
    %0 = arith.cmpi eq, %arg0, %c0_i32 : i32
    %1 = arith.extui %0 : i1 to i32
    %c0_i32_0 = arith.constant 0 : i32
    %2 = arith.cmpi ne, %1, %c0_i32_0 : i32
    scf.if %2 {
      %cst_26 = arith.constant 0xFF800000 : f32
      %45 = vector.broadcast %cst_26 : f32 to vector<1x512xf32>
      %c0_27 = arith.constant 0 : index
      %c0_28 = arith.constant 0 : index
      %46 = vector.load %arg21[%c0_27, %c0_28] : memref<1x512xf32, #tpu.memory_space<vmem>>, vector<1x512xf32>
      tpu.vector_store %arg21[%c0_27, %c0_28], %45 {strides = array<i32>} : memref<1x512xf32, #tpu.memory_space<vmem>>, vector<1x512xf32>,
    } else {
    }
    %c0 = arith.constant 0 : index
    %c0_1 = arith.constant 0 : index
    %3 = vector.load %arg1[%c0, %c0_1] : memref<256x256xbf16, #tpu.memory_space<vmem>>, vector<256x256xbf16>
    %c0_2 = arith.constant 0 : index
    %c0_3 = arith.constant 0 : index
    %4 = vector.load %arg2[%c0_2, %c0_3] : memref<256x128xbf16, #tpu.memory_space<vmem>>, vector<256x128xbf16>
    %cst = arith.constant dense<0.000000e+00> : vector<256x128xf32>
    %5 = tpu.matmul %3, %4, %cst {dimension_numbers = #tpu.dot_dimension_numbers<[1], [0], [0], [1], [0, 0, 1, 1], [], []>} : vector<256x256xbf16>, vector<256x128xbf16>, vector<256x128xf32> -> vector<256x128xf32>
    %c0_4 = arith.constant 0 : index
    %c0_5 = arith.constant 0 : index
    %6 = vector.load %arg3[%c0_4, %c0_5] : memref<1x128xf32, #tpu.memory_space<vmem>>, vector<1x128xf32>
    %7 = vector.broadcast %6 : vector<1x128xf32> to vector<256x128xf32>
    %8 = arith.addf %5, %7 : vector<256x128xf32>
    %cst_6 = arith.constant 0.000000e+00 : f32
    %9 = vector.broadcast %cst_6 : f32 to vector<256x128xf32>
    %10 = arith.maximumf %8, %9 : vector<256x128xf32>
    %11 = arith.truncf %10 : vector<256x128xf32> to vector<256x128xbf16>
    %c0_7 = arith.constant 0 : index
    %c0_8 = arith.constant 0 : index
    %12 = vector.load %arg4[%c0_7, %c0_8] : memref<128x256xbf16, #tpu.memory_space<vmem>>, vector<128x256xbf16>
    %cst_9 = arith.constant dense<0.000000e+00> : vector<256x256xf32>
    %13 = tpu.matmul %11, %12, %cst_9 {dimension_numbers = #tpu.dot_dimension_numbers<[1], [0], [0], [1], [0, 0, 1, 1], [], []>} : vector<256x128xbf16>, vector<128x256xbf16>, vector<256x256xf32> -> vector<256x256xf32>
    %c0_10 = arith.constant 0 : index
    %c0_11 = arith.constant 0 : index
    %14 = vector.load %arg5[%c0_10, %c0_11] : memref<1x256xf32, #tpu.memory_space<vmem>>, vector<1x256xf32>
    %15 = vector.broadcast %14 : vector<1x256xf32> to vector<256x256xf32>
    %16 = arith.addf %13, %15 : vector<256x256xf32>
    %cst_12 = arith.constant 0.000000e+00 : f32
    %17 = vector.broadcast %cst_12 : f32 to vector<256x256xf32>
    %18 = arith.maximumf %16, %17 : vector<256x256xf32>
    %19 = arith.truncf %18 : vector<256x256xf32> to vector<256x256xbf16>
    %c0_13 = arith.constant 0 : index
    %c0_14 = arith.constant 0 : index
    %20 = vector.load %arg6[%c0_13, %c0_14] : memref<256x512xbf16, #tpu.memory_space<vmem>>, vector<256x512xbf16>
    %cst_15 = arith.constant dense<0.000000e+00> : vector<256x512xf32>
    %21 = tpu.matmul %19, %20, %cst_15 {dimension_numbers = #tpu.dot_dimension_numbers<[1], [0], [0], [1], [0, 0, 1, 1], [], []>} : vector<256x256xbf16>, vector<256x512xbf16>, vector<256x512xf32> -> vector<256x512xf32>
    %c0_16 = arith.constant 0 : index
    %c0_17 = arith.constant 0 : index
    %22 = vector.load %arg7[%c0_16, %c0_17] : memref<1x512xf32, #tpu.memory_space<vmem>>, vector<1x512xf32>
    %23 = vector.broadcast %22 : vector<1x512xf32> to vector<256x512xf32>
    %24 = arith.addf %21, %23 : vector<256x512xf32>
    %cst_18 = arith.constant 0.000000e+00 : f32
    %25 = vector.broadcast %cst_18 : f32 to vector<256x512xf32>
    %26 = arith.maximumf %24, %25 : vector<256x512xf32>
    %c256_i32 = arith.constant 256 : i32
    %27 = arith.muli %arg0, %c256_i32 : i32
    %28 = tpu.iota {dimensions = array<i32: 0>} : vector<256x1xi32>
    %29 = vector.broadcast %27 : i32 to vector<256x1xi32>
    %30 = arith.addi %29, %28 : vector<256x1xi32>
    %c600_i32 = arith.constant 600 : i32
    %31 = vector.broadcast %c600_i32 : i32 to vector<256x1xi32>
    %32 = arith.cmpi slt, %30, %31 : vector<256x1xi32>
    %cst_19 = arith.constant 0xFF800000 : f32
    %33 = vector.shape_cast %32 : vector<256x1xi1> to vector<256x1xi1>
    %34 = vector.broadcast %33 : vector<256x1xi1> to vector<256x512xi1>
    %35 = vector.broadcast %cst_19 : f32 to vector<256x512xf32>
    %36 = arith.select %34, %26, %35 : vector<256x512xi1>, vector<256x512xf32>
    %c0_20 = arith.constant 0 : index
    %c0_21 = arith.constant 0 : index
    %37 = vector.load %arg21[%c0_20, %c0_21] : memref<1x512xf32, #tpu.memory_space<vmem>>, vector<1x512xf32>
    %cst_22 = arith.constant dense<0xFF800000> : vector<512xf32>
    %38 = vector.multi_reduction <maximumf>, %36, %cst_22 [0] : vector<256x512xf32> to vector<512xf32>
    %39 = vector.shape_cast %38 : vector<512xf32> to vector<1x512xf32>
    %40 = arith.maximumf %37, %39 : vector<1x512xf32>
    %c0_23 = arith.constant 0 : index
    %c0_24 = arith.constant 0 : index
    %41 = vector.load %arg21[%c0_23, %c0_24] : memref<1x512xf32, #tpu.memory_space<vmem>>, vector<1x512xf32>
    tpu.vector_store %arg21[%c0_23, %c0_24], %40 {strides = array<i32>} : memref<1x512xf32, #tpu.memory_space<vmem>>, vector<1x512xf32>,
    %c2_i32 = arith.constant 2 : i32
    %42 = arith.cmpi eq, %arg0, %c2_i32 : i32
    %43 = arith.extui %42 : i1 to i32
    %c0_i32_25 = arith.constant 0 : i32
    %44 = arith.cmpi ne, %43, %c0_i32_25 : i32
    scf.if %44 {
      %c0_26 = arith.constant 0 : index
      %c0_27 = arith.constant 0 : index
      %45 = vector.load %arg21[%c0_26, %c0_27] : memref<1x512xf32, #tpu.memory_space<vmem>>, vector<1x512xf32>
      %46 = arith.truncf %45 : vector<1x512xf32> to vector<1x512xbf16>
      %c0_28 = arith.constant 0 : index
      %c0_29 = arith.constant 0 : index
      %47 = vector.load %arg8[%c0_28, %c0_29] : memref<512x1024xbf16, #tpu.memory_space<vmem>>, vector<512x1024xbf16>
      %cst_30 = arith.constant dense<0.000000e+00> : vector<1x1024xf32>
      %48 = tpu.matmul %46, %47, %cst_30 {dimension_numbers = #tpu.dot_dimension_numbers<[1], [0], [0], [1], [0, 0, 1, 1], [], []>} : vector<1x512xbf16>, vector<512x1024xbf16>, vector<1x1024xf32> -> vector<1x1024xf32>
      %c0_31 = arith.constant 0 : index
      %c0_32 = arith.constant 0 : index
      %49 = vector.load %arg9[%c0_31, %c0_32] : memref<1x1024xf32, #tpu.memory_space<vmem>>, vector<1x1024xf32>
      %50 = arith.addf %48, %49 : vector<1x1024xf32>
      %cst_33 = arith.constant 0.000000e+00 : f32
      %51 = vector.broadcast %cst_33 : f32 to vector<1x1024xf32>
      %52 = arith.maximumf %50, %51 : vector<1x1024xf32>
      %53 = vector.extract_strided_slice %52 {offsets = [0, 0], sizes = [1, 512], strides = [1, 1]} : vector<1x1024xf32> to vector<1x512xf32>
      %54 = arith.truncf %53 : vector<1x512xf32> to vector<1x512xbf16>
      %55 = vector.extract_strided_slice %52 {offsets = [0, 512], sizes = [1, 256], strides = [1, 1]} : vector<1x1024xf32> to vector<1x256xf32>
      %56 = arith.truncf %55 : vector<1x256xf32> to vector<1x256xbf16>
      %57 = vector.extract_strided_slice %52 {offsets = [0, 768], sizes = [1, 256], strides = [1, 1]} : vector<1x1024xf32> to vector<1x256xf32>
      %58 = arith.truncf %57 : vector<1x256xf32> to vector<1x256xbf16>
      %c0_34 = arith.constant 0 : index
      %c0_35 = arith.constant 0 : index
      %59 = vector.load %arg10[%c0_34, %c0_35] : memref<512x256xbf16, #tpu.memory_space<vmem>>, vector<512x256xbf16>
      %cst_36 = arith.constant dense<0.000000e+00> : vector<1x256xf32>
      %60 = tpu.matmul %54, %59, %cst_36 {dimension_numbers = #tpu.dot_dimension_numbers<[1], [0], [0], [1], [0, 0, 1, 1], [], []>} : vector<1x512xbf16>, vector<512x256xbf16>, vector<1x256xf32> -> vector<1x256xf32>
      %c0_37 = arith.constant 0 : index
      %c0_38 = arith.constant 0 : index
      %61 = vector.load %arg11[%c0_37, %c0_38] : memref<1x256xf32, #tpu.memory_space<vmem>>, vector<1x256xf32>
      %62 = arith.addf %60, %61 : vector<1x256xf32>
      %cst_39 = arith.constant 0.000000e+00 : f32
      %63 = vector.broadcast %cst_39 : f32 to vector<1x256xf32>
      %64 = arith.maximumf %62, %63 : vector<1x256xf32>
      %65 = arith.truncf %64 : vector<1x256xf32> to vector<1x256xbf16>
      %c0_40 = arith.constant 0 : index
      %c0_41 = arith.constant 0 : index
      %66 = vector.load %arg12[%c0_40, %c0_41] : memref<256x7xbf16, #tpu.memory_space<vmem>>, vector<256x7xbf16>
      %cst_42 = arith.constant dense<0.000000e+00> : vector<1x7xf32>
      %67 = tpu.matmul %65, %66, %cst_42 {dimension_numbers = #tpu.dot_dimension_numbers<[1], [0], [0], [1], [0, 0, 1, 1], [], []>} : vector<1x256xbf16>, vector<256x7xbf16>, vector<1x7xf32> -> vector<1x7xf32>
      %c0_43 = arith.constant 0 : index
      %c0_44 = arith.constant 0 : index
      %68 = vector.load %arg13[%c0_43, %c0_44] : memref<1x7xf32, #tpu.memory_space<vmem>>, vector<1x7xf32>
      %69 = arith.addf %67, %68 : vector<1x7xf32>
      %c0_45 = arith.constant 0 : index
      %c0_46 = arith.constant 0 : index
      %70 = vector.load %arg19[%c0_45, %c0_46] : memref<1x7xf32, #tpu.memory_space<vmem>>, vector<1x7xf32>
      tpu.vector_store %arg19[%c0_45, %c0_46], %69 {strides = array<i32>} : memref<1x7xf32, #tpu.memory_space<vmem>>, vector<1x7xf32>,
      %c0_47 = arith.constant 0 : index
      %c0_48 = arith.constant 0 : index
      %71 = vector.load %arg14[%c0_47, %c0_48] : memref<256x12xbf16, #tpu.memory_space<vmem>>, vector<256x12xbf16>
      %cst_49 = arith.constant dense<0.000000e+00> : vector<1x12xf32>
      %72 = tpu.matmul %56, %71, %cst_49 {dimension_numbers = #tpu.dot_dimension_numbers<[1], [0], [0], [1], [0, 0, 1, 1], [], []>} : vector<1x256xbf16>, vector<256x12xbf16>, vector<1x12xf32> -> vector<1x12xf32>
      %c0_50 = arith.constant 0 : index
      %c0_51 = arith.constant 0 : index
      %73 = vector.load %arg15[%c0_50, %c0_51] : memref<1x12xf32, #tpu.memory_space<vmem>>, vector<1x12xf32>
      %74 = arith.addf %72, %73 : vector<1x12xf32>
      %c0_52 = arith.constant 0 : index
      %c0_53 = arith.constant 0 : index
      %75 = vector.load %arg20[%c0_52, %c0_53] : memref<1x12xf32, #tpu.memory_space<vmem>>, vector<1x12xf32>
      tpu.vector_store %arg20[%c0_52, %c0_53], %74 {strides = array<i32>} : memref<1x12xf32, #tpu.memory_space<vmem>>, vector<1x12xf32>,
      %c0_54 = arith.constant 0 : index
      %c0_55 = arith.constant 0 : index
      %76 = vector.load %arg16[%c0_54, %c0_55] : memref<256x1xbf16, #tpu.memory_space<vmem>>, vector<256x1xbf16>
      %cst_56 = arith.constant dense<0.000000e+00> : vector<1x1xf32>
      %77 = tpu.matmul %58, %76, %cst_56 {dimension_numbers = #tpu.dot_dimension_numbers<[1], [0], [0], [1], [0, 0, 1, 1], [], []>} : vector<1x256xbf16>, vector<256x1xbf16>, vector<1x1xf32> -> vector<1x1xf32>
      %c0_57 = arith.constant 0 : index
      %c0_58 = arith.constant 0 : index
      %78 = vector.load %arg17[%c0_57, %c0_58] : memref<1x1xf32, #tpu.memory_space<vmem>>, vector<1x1xf32>
      %79 = arith.addf %77, %78 : vector<1x1xf32>
      %80 = arith.negf %79 : vector<1x1xf32>
      %81 = math.exp %80 : vector<1x1xf32>
      %cst_59 = arith.constant 1.000000e+00 : f32
      %82 = vector.broadcast %cst_59 : f32 to vector<1x1xf32>
      %83 = arith.addf %82, %81 : vector<1x1xf32>
      %84 = arith.divf %82, %83 : vector<1x1xf32>
      %c0_60 = arith.constant 0 : index
      %c0_61 = arith.constant 0 : index
      %85 = vector.load %arg18[%c0_60, %c0_61] : memref<1x1xf32, #tpu.memory_space<vmem>>, vector<1x1xf32>
      tpu.vector_store %arg18[%c0_60, %c0_61], %84 {strides = array<i32>} : memref<1x1xf32, #tpu.memory_space<vmem>>, vector<1x1xf32>,
    } else {
    }
    return
  }
  func.func @transform_0(%arg0: i32) -> (i32, i32) {
    %c0_i32 = arith.constant 0 : i32
    %c0_i32_0 = arith.constant 0 : i32
    return %arg0, %c0_i32 : i32, i32
  }
  func.func @transform_1(%arg0: i32) -> (i32, i32) {
    %c0_i32 = arith.constant 0 : i32
    %c0_i32_0 = arith.constant 0 : i32
    %c0_i32_1 = arith.constant 0 : i32
    return %c0_i32, %c0_i32_0 : i32, i32
  }
  func.func @transform_2(%arg0: i32) -> (i32, i32) {
    %c0_i32 = arith.constant 0 : i32
    %c0_i32_0 = arith.constant 0 : i32
    %c0_i32_1 = arith.constant 0 : i32
    return %c0_i32, %c0_i32_0 : i32, i32
  }
  func.func @transform_3(%arg0: i32) -> (i32, i32) {
    %c0_i32 = arith.constant 0 : i32
    %c0_i32_0 = arith.constant 0 : i32
    %c0_i32_1 = arith.constant 0 : i32
    return %c0_i32, %c0_i32_0 : i32, i32
  }
  func.func @transform_4(%arg0: i32) -> (i32, i32) {
    %c0_i32 = arith.constant 0 : i32
    %c0_i32_0 = arith.constant 0 : i32
    %c0_i32_1 = arith.constant 0 : i32
    return %c0_i32, %c0_i32_0 : i32, i32
  }
  func.func @transform_5(%arg0: i32) -> (i32, i32) {
    %c0_i32 = arith.constant 0 : i32
    %c0_i32_0 = arith.constant 0 : i32
    %c0_i32_1 = arith.constant 0 : i32
    return %c0_i32, %c0_i32_0 : i32, i32
  }
  func.func @transform_6(%arg0: i32) -> (i32, i32) {
    %c0_i32 = arith.constant 0 : i32
    %c0_i32_0 = arith.constant 0 : i32
    %c0_i32_1 = arith.constant 0 : i32
    return %c0_i32, %c0_i32_0 : i32, i32
  }
  func.func @transform_7(%arg0: i32) -> (i32, i32) {
    %c0_i32 = arith.constant 0 : i32
    %c0_i32_0 = arith.constant 0 : i32
    %c0_i32_1 = arith.constant 0 : i32
    return %c0_i32, %c0_i32_0 : i32, i32
  }
  func.func @transform_8(%arg0: i32) -> (i32, i32) {
    %c0_i32 = arith.constant 0 : i32
    %c0_i32_0 = arith.constant 0 : i32
    %c0_i32_1 = arith.constant 0 : i32
    return %c0_i32, %c0_i32_0 : i32, i32
  }
  func.func @transform_9(%arg0: i32) -> (i32, i32) {
    %c0_i32 = arith.constant 0 : i32
    %c0_i32_0 = arith.constant 0 : i32
    %c0_i32_1 = arith.constant 0 : i32
    return %c0_i32, %c0_i32_0 : i32, i32
  }
  func.func @transform_10(%arg0: i32) -> (i32, i32) {
    %c0_i32 = arith.constant 0 : i32
    %c0_i32_0 = arith.constant 0 : i32
    %c0_i32_1 = arith.constant 0 : i32
    return %c0_i32, %c0_i32_0 : i32, i32
  }
  func.func @transform_11(%arg0: i32) -> (i32, i32) {
    %c0_i32 = arith.constant 0 : i32
    %c0_i32_0 = arith.constant 0 : i32
    %c0_i32_1 = arith.constant 0 : i32
    return %c0_i32, %c0_i32_0 : i32, i32
  }
  func.func @transform_12(%arg0: i32) -> (i32, i32) {
    %c0_i32 = arith.constant 0 : i32
    %c0_i32_0 = arith.constant 0 : i32
    %c0_i32_1 = arith.constant 0 : i32
    return %c0_i32, %c0_i32_0 : i32, i32
  }
  func.func @transform_13(%arg0: i32) -> (i32, i32) {
    %c0_i32 = arith.constant 0 : i32
    %c0_i32_0 = arith.constant 0 : i32
    %c0_i32_1 = arith.constant 0 : i32
    return %c0_i32, %c0_i32_0 : i32, i32
  }
  func.func @transform_14(%arg0: i32) -> (i32, i32) {
    %c0_i32 = arith.constant 0 : i32
    %c0_i32_0 = arith.constant 0 : i32
    %c0_i32_1 = arith.constant 0 : i32
    return %c0_i32, %c0_i32_0 : i32, i32
  }
  func.func @transform_15(%arg0: i32) -> (i32, i32) {
    %c0_i32 = arith.constant 0 : i32
    %c0_i32_0 = arith.constant 0 : i32
    %c0_i32_1 = arith.constant 0 : i32
    return %c0_i32, %c0_i32_0 : i32, i32
  }
  func.func @transform_16(%arg0: i32) -> (i32, i32) {
    %c0_i32 = arith.constant 0 : i32
    %c0_i32_0 = arith.constant 0 : i32
    %c0_i32_1 = arith.constant 0 : i32
    return %c0_i32, %c0_i32_0 : i32, i32
  }
  func.func @transform_17(%arg0: i32) -> (i32, i32) {
    %c0_i32 = arith.constant 0 : i32
    %c0_i32_0 = arith.constant 0 : i32
    %c0_i32_1 = arith.constant 0 : i32
    return %c0_i32, %c0_i32_0 : i32, i32
  }
  func.func @transform_18(%arg0: i32) -> (i32, i32) {
    %c0_i32 = arith.constant 0 : i32
    %c0_i32_0 = arith.constant 0 : i32
    %c0_i32_1 = arith.constant 0 : i32
    return %c0_i32, %c0_i32_0 : i32, i32
  }
  func.func @transform_19(%arg0: i32) -> (i32, i32) {
    %c0_i32 = arith.constant 0 : i32
    %c0_i32_0 = arith.constant 0 : i32
    %c0_i32_1 = arith.constant 0 : i32
    return %c0_i32, %c0_i32_0 : i32, i32
  }
}

</mosaic_0001>

<bundles_post_ra>
// kernel: pointnet_forward.1
= control target key start
LH: loop header
LB: loop body
LE: loop exit
PB: predicated region body
PF: predicated region fallthrough
CT: control target
= control target key end

     0   :  { %s12785_s0 = inlined_call_operand.vmem [shape: bf16[768,256], index: 0, kind: input, shape index: {}]   ;;  %s12786_s1 = inlined_call_operand.vmem [shape: bf16[256,128], index: 1, kind: input, shape index: {}]   ;;  %s12787_s2 = inlined_call_operand.vmem [shape: f32[1,128], index: 2, kind: input, shape index: {}]   ;;  %s12788_s3 = inlined_call_operand.vmem [shape: bf16[128,256], index: 3, kind: input, shape index: {}]   ;;  %s12789_s4 = inlined_call_operand.vmem [shape: f32[1,256], index: 4, kind: input, shape index: {}]   ;;  %s12790_s5 = inlined_call_operand.vmem [shape: bf16[256,512], index: 5, kind: input, shape index: {}]   ;;  %s12791_s6 = inlined_call_operand.vmem [shape: f32[1,512], index: 6, kind: input, shape index: {}]   ;;  %s12792_s7 = inlined_call_operand.vmem [shape: bf16[512,1024], index: 7, kind: input, shape index: {}]   ;;  %s12793_s8 = inlined_call_operand.vmem [shape: f32[1,1024], index: 8, kind: input, shape index: {}]   ;;  %s12794_s9 = inlined_call_operand.vmem [shape: bf16[512,256], index: 9, kind: input, shape index: {}]   ;;  %s12795_s10 = inlined_call_operand.vmem [shape: f32[1,256], index: 10, kind: input, shape index: {}]   ;;  %s12796_s11 = inlined_call_operand.vmem [shape: bf16[256,7], index: 11, kind: input, shape index: {}]   ;;  %s12797_s12 = inlined_call_operand.vmem [shape: f32[1,7], index: 12, kind: input, shape index: {}]   ;;  %s12798_s13 = inlined_call_operand.vmem [shape: bf16[256,12], index: 13, kind: input, shape index: {}]   ;;  %s12799_s14 = inlined_call_operand.vmem [shape: f32[1,12], index: 14, kind: input, shape index: {}]   ;;  %s12800_s15 = inlined_call_operand.vmem [shape: bf16[256,1], index: 15, kind: input, shape index: {}]   ;;  %s12801_s16 = inlined_call_operand.<no memory space> [shape: f32[1,1], index: 16, kind: input, shape index: {}]   ;;  %s12802_s17 = inlined_call_operand.hbm [shape: f32[1,1], index: 17, kind: output, shape index: {0}]   ;;  %s12803_s18 = inlined_call_operand.hbm [shape: f32[1,7], index: 18, kind: output, shape index: {1}]   ;;  %s12804_s19 = inlined_call_operand.hbm [shape: f32[1,12], index: 19, kind: output, shape index: {2}]  }
   0x1   :  { %12892 = sst [smem:[#allocation40_spill]] %s12785_s0  ;;  %v25_v0 = vstv %s12801_s16 }
   0x2   :  { %12893 = sst [smem:[#allocation41_spill]] %s12786_s1  ;;  %26 = vst [vmem:[#allocation3] sm:$0x1] %v25_v0 }
   0x3   :  { %12894 = sst [smem:[#allocation42_spill]] %s12787_s2 }
   0x4   :  { %12895 = sst [smem:[#allocation43_spill]] %s12788_s3 }
   0x5   :  { %27 = vsyncpa [#allocation5], 0 }
   0x6   :  { %28 = vsyncpa [#allocation7], 0  ;;  %s9052_s20 = smov 0  }
   0x7 LB: > { %s9058_s21 = sadd.s32 4294967295, %s8943_s20   ;;  %p6311_p0 = scmp.ge.s32.totalorder %s8943_s20, 1  ;;  %s8943_s20 = sphi %s9052_s20, %s34_s20  }
   0x8   : > { %p533_p1 = scmp.lt.s32.totalorder %s8943_s20, 4 }
   0xa   : > { %p534_p2 = pnand %p6311_p0, %p533_p1 }
   0xc   : > { %537 = sbr.rel (%p534_p2) target bundleno = 1810 (0x712), region = 88 }
  0x11   : > { %s6312_s16 = sshll.u32 %s9058_s21, 5  ;;  %s12896_s23 = sld [smem:[#allocation40_spill]] }
  0x12   : > { %p586_p3 = scmp.lt.s32.totalorder %s6312_s16, 95  ;;  %p6315_p4 = scmp.ne.s32.totalorder %s9058_s21, 0 }
  0x14   : > { %s13007_s16 = smov (!%p586_p3, %s6312_s16), 95  ;;  %595 = sbr.rel (%p6315_p4) target bundleno = 29 (0x1d), region = 92 }
  0x15   : > { %s8311_s1 = sshll.u32 %s13007_s16, 3 }
  0x17   : > { %s9066_s24 = scalar_lea.vmem %s12896_s23, %s8311_s1 }
  0x19   : > { %v596_v1 = vlaneseq  ;;  %v8945_v2 = vmov -inf  }
  0x1b   : > { %vm598_vm0 = vcmp.lt.s32.totalorder %v596_v1, 512 }
  0x1c   : > { %600 = vst.msk [vmem:[#allocation2] sm:$0xf] %vm598_vm0, %v8945_v2 }
  0x1d PF: > { %s12897_s26 = sld [smem:[#allocation41_spill]]  ;;  %v6318_v19 = vld [vmem:[%s9066_s24] sm:$0xf]  ;;  %v8313_v20 = vld [vmem:[%s9066_s24 + $0x4] sm:$0xf0]  ;;  %s6828_s25 = sshll.u32 %s9058_s21, 8 }
  0x1e   : > { %v8312_v21 = vld [vmem:[%s9066_s24 + $0x4] sm:$0xf]  ;;  %v6320_v22 = vld [vmem:[%s9066_s24 + $0x8] sm:$0xf0]  ;;  %v6319_v23 = vor.u32 %v8313_v20, %v6318_v19  ;;  %v6326_v25 = vld [vmem:[%s9066_s24 + $0x10] sm:$0xf] }
  0x1f   : > { %v6323_v24 = vor.u32 %v8312_v21, %v6320_v22  ;;  %v8315_v26 = vld [vmem:[%s9066_s24 + $0x14] sm:$0xf0]  ;;  %v8314_v27 = vld [vmem:[%s9066_s24 + $0x14] sm:$0xf]  ;;  %v6328_v28 = vld [vmem:[%s9066_s24 + $0x18] sm:$0xf0] }
  0x20   : > { %v6327_v29 = vor.u32 %v8315_v26, %v6326_v25  ;;  %v6331_v30 = vor.u32 %v8314_v27, %v6328_v28  ;;  %v6334_v31 = vld [vmem:[%s9066_s24 + $0x20] sm:$0xf]  ;;  %v8317_v32 = vld [vmem:[%s9066_s24 + $0x24] sm:$0xf0]  ;;  %v8316_v33 = vld [vmem:[%s9066_s24 + $0x24] sm:$0xf] }
  0x21   : > { %v6336_v34 = vld [vmem:[%s9066_s24 + $0x28] sm:$0xf0]  ;;  %v6335_v35 = vor.u32 %v8317_v32, %v6334_v31  ;;  %v6342_v37 = vld [vmem:[%s9066_s24 + $0x30] sm:$0xf]  ;;  %v8319_v38 = vld [vmem:[%s9066_s24 + $0x34] sm:$0xf0] }
  0x22   : > { %v6339_v36 = vor.u32 %v8316_v33, %v6336_v34  ;;  %v8318_v39 = vld [vmem:[%s9066_s24 + $0x34] sm:$0xf]  ;;  %v6344_v40 = vld [vmem:[%s9066_s24 + $0x38] sm:$0xf0]  ;;  %v6343_v41 = vor.u32 %v8319_v38, %v6342_v37  ;;  %v6350_v43 = vld [vmem:[%s9066_s24 + $0x40] sm:$0xf] }
  0x23   : > { %v8351_v3 = vld [vmem:[%s12897_s26 + $0x38] sm:$0xff]  ;;  %v8350_v5 = vld [vmem:[%s12897_s26 + $0x30] sm:$0xff]  ;;  %v8349_v7 = vld [vmem:[%s12897_s26 + $0x28] sm:$0xff]  ;;  %v6347_v42 = vor.u32 %v8318_v39, %v6344_v40  ;;  %s12898_s2 = sld [smem:[#allocation43_spill]]  ;;  %p6829_p5 = scmp.ne.s32.totalorder %s9058_s21, 2 }
  0x24   : > { %v8359_v4 = vld [vmem:[%s12897_s26 + $0x78] sm:$0xff]  ;;  %925 = vmatpush.bf16.msra.mxu0 %v8351_v3  ;;  %v8358_v6 = vld [vmem:[%s12897_s26 + $0x70] sm:$0xff]  ;;  %v8357_v8 = vld [vmem:[%s12897_s26 + $0x68] sm:$0xff]  ;;  %s12899_s27 = sld [smem:[#allocation42_spill]] }
  0x25   : > { %1014 = vmatpush.bf16.msra.mxu1 %v8359_v4  ;;  %v8348_v9 = vld [vmem:[%s12897_s26 + $0x20] sm:$0xff]  ;;  %v8347_v11 = vld [vmem:[%s12897_s26 + $0x18] sm:$0xff]  ;;  %v8346_v13 = vld [vmem:[%s12897_s26 + $0x10] sm:$0xff] }
  0x26   : > { %v8356_v10 = vld [vmem:[%s12897_s26 + $0x60] sm:$0xff]  ;;  %v8355_v12 = vld [vmem:[%s12897_s26 + $0x58] sm:$0xff]  ;;  %v8354_v14 = vld [vmem:[%s12897_s26 + $0x50] sm:$0xff] }
  0x27   : > { %v8345_v15 = vld [vmem:[%s12897_s26 + $0x8] sm:$0xff]  ;;  %v8344_v17 = vld [vmem:[%s12897_s26] sm:$0xff]  ;;  %v6358_v55 = vld [vmem:[%s9066_s24 + $0x50] sm:$0xf] }
  0x28   : > { %926 = vmatpush.bf16.msra.mxu0 %v8350_v5  ;;  %v8353_v16 = vld [vmem:[%s12897_s26 + $0x48] sm:$0xff]  ;;  %v8352_v18 = vld [vmem:[%s12897_s26 + $0x40] sm:$0xff]  ;;  %v8323_v56 = vld [vmem:[%s9066_s24 + $0x54] sm:$0xf0] }
  0x29   : > { %1015 = vmatpush.bf16.msra.mxu1 %v8358_v6  ;;  %v8321_v44 = vld [vmem:[%s9066_s24 + $0x44] sm:$0xf0]  ;;  %v8320_v45 = vld [vmem:[%s9066_s24 + $0x44] sm:$0xf]  ;;  %v6352_v46 = vld [vmem:[%s9066_s24 + $0x48] sm:$0xf0]  ;;  %v6359_v59 = vor.u32 %v8323_v56, %v6358_v55 }
  0x2a   : > { %v6351_v47 = vor.u32 %v8321_v44, %v6350_v43  ;;  %v6355_v48 = vor.u32 %v8320_v45, %v6352_v46  ;;  %v6566_v49 = vld [vmem:[%s12898_s2 + $0x70] sm:$0xf]  ;;  %v8375_v50 = vld [vmem:[%s12898_s2 + $0x74] sm:$0xf0]  ;;  %v8374_v51 = vld [vmem:[%s12898_s2 + $0x74] sm:$0xf] }
  0x2b   : > { %v6567_v52 = vor.u32 %v8375_v50, %v6566_v49  ;;  %v6568_v53 = vld [vmem:[%s12898_s2 + $0x78] sm:$0xf0]  ;;  %v8322_v57 = vld [vmem:[%s9066_s24 + $0x54] sm:$0xf]  ;;  %v6558_v61 = vld [vmem:[%s12898_s2 + $0x60] sm:$0xf] }
  0x2c   : > { %927 = vmatpush.bf16.msra.mxu0 %v8349_v7  ;;  %v6571_v54 = vor.u32 %v8374_v51, %v6568_v53  ;;  %v6360_v58 = vld [vmem:[%s9066_s24 + $0x58] sm:$0xf0]  ;;  %v8373_v62 = vld [vmem:[%s12898_s2 + $0x64] sm:$0xf0]  ;;  %v8372_v63 = vld [vmem:[%s12898_s2 + $0x64] sm:$0xf] }
  0x2d   : > { %1016 = vmatpush.bf16.msra.mxu1 %v8357_v8  ;;  %1253 = vmatpush.bf16.msra.mxu2 %v6567_v52  ;;  %v6363_v60 = vor.u32 %v8322_v57, %v6360_v58  ;;  %v6559_v0 = vor.u32 %v8373_v62, %v6558_v61  ;;  %v6560_v1 = vld [vmem:[%s12898_s2 + $0x68] sm:$0xf0]  ;;  %v6550_v2 = vld [vmem:[%s12898_s2 + $0x50] sm:$0xf]  ;;  %v8371_v3 = vld [vmem:[%s12898_s2 + $0x54] sm:$0xf0] }
  0x2e   : > { %1342 = vmatpush.bf16.msra.mxu3 %v6571_v54  ;;  %v6563_v4 = vor.u32 %v8372_v63, %v6560_v1  ;;  %v8370_v5 = vld [vmem:[%s12898_s2 + $0x54] sm:$0xf]  ;;  %v6552_v6 = vld [vmem:[%s12898_s2 + $0x58] sm:$0xf0]  ;;  %v6551_v7 = vor.u32 %v8371_v3, %v6550_v2  ;;  %v6534_v21 = vld [vmem:[%s12898_s2 + $0x30] sm:$0xf] }
  0x2f   : > { %v6555_v8 = vor.u32 %v8370_v5, %v6552_v6  ;;  %v8367_v22 = vld [vmem:[%s12898_s2 + $0x34] sm:$0xf0]  ;;  %v6536_v25 = vld [vmem:[%s12898_s2 + $0x38] sm:$0xf0]  ;;  %v6526_v27 = vld [vmem:[%s12898_s2 + $0x20] sm:$0xf] }
  0x30   : > { %928 = vmatpush.bf16.msra.mxu0 %v8348_v9  ;;  %v6542_v9 = vld [vmem:[%s12898_s2 + $0x40] sm:$0xf]  ;;  %v8365_v28 = vld [vmem:[%s12898_s2 + $0x24] sm:$0xf0]  ;;  %v6528_v31 = vld [vmem:[%s12898_s2 + $0x28] sm:$0xf0] }
  0x31   : > { %1017 = vmatpush.bf16.msra.mxu1 %v8356_v10  ;;  %1254 = vmatpush.bf16.msra.mxu2 %v6559_v0  ;;  %v8369_v10 = vld [vmem:[%s12898_s2 + $0x44] sm:$0xf0]  ;;  %v6518_v33 = vld [vmem:[%s12898_s2 + $0x10] sm:$0xf]  ;;  %v8363_v34 = vld [vmem:[%s12898_s2 + $0x14] sm:$0xf0] }
  0x32   : > { %1343 = vmatpush.bf16.msra.mxu3 %v6563_v4  ;;  %v6520_v37 = vld [vmem:[%s12898_s2 + $0x18] sm:$0xf0]  ;;  %v6374_v39 = vld [vmem:[%s9066_s24 + $0x70] sm:$0xf]  ;;  %v8327_v40 = vld [vmem:[%s9066_s24 + $0x74] sm:$0xf0] }
  0x33   : > { %v8360_v43 = vld [vmem:[%s12898_s2 + $0x4] sm:$0xf]  ;;  %v8326_v44 = vld [vmem:[%s9066_s24 + $0x74] sm:$0xf]  ;;  %v6376_v45 = vld [vmem:[%s9066_s24 + $0x78] sm:$0xf0]  ;;  %v6375_v49 = vor.u32 %v8327_v40, %v6374_v39 }
  0x34   : > { %929 = vmatpush.bf16.msra.mxu0 %v8347_v11  ;;  %v8368_v11 = vld [vmem:[%s12898_s2 + $0x44] sm:$0xf]  ;;  %v6379_v50 = vor.u32 %v8326_v44, %v6376_v45  ;;  %v6688_v52 = vld [vmem:[%s12790_s5 + $0xf0] sm:$0xf0]  ;;  %v6686_v56 = vld [vmem:[%s12790_s5 + $0xe0] sm:$0xf] }
  0x35   : > { %1018 = vmatpush.bf16.msra.mxu1 %v8355_v12  ;;  %v6544_v12 = vld [vmem:[%s12898_s2 + $0x48] sm:$0xf0]  ;;  %1255 = vmatpush.bf16.msra.mxu2 %v6551_v7  ;;  %v8404_v51 = vld [vmem:[%s12790_s5 + $0xe4] sm:$0xf]  ;;  %v6816_v55 = vld [vmem:[%s12790_s5 + $0x1f0] sm:$0xf0] }
  0x36   : > { %1344 = vmatpush.bf16.msra.mxu3 %v6555_v8  ;;  %v8436_v53 = vld [vmem:[%s12790_s5 + $0x1e4] sm:$0xf]  ;;  %v6691_v54 = vor.u32 %v8404_v51, %v6688_v52  ;;  %v8406_v57 = vld [vmem:[%s12790_s5 + $0xec] sm:$0xf0]  ;;  %v8329_v61 = vld [vmem:[%s9066_s24 + $0x84] sm:$0xf0] }
  0x37   : > { %v6819_v58 = vor.u32 %v8436_v53, %v6816_v55  ;;  %v8328_v62 = vld [vmem:[%s9066_s24 + $0x84] sm:$0xf]  ;;  %v6384_v63 = vld [vmem:[%s9066_s24 + $0x88] sm:$0xf0]  ;;  %v6814_v0 = vld [vmem:[%s12790_s5 + $0x1e0] sm:$0xf] }
  0x38   : > { %930 = vmatpush.bf16.msra.mxu0 %v8346_v13  ;;  %v6543_v13 = vor.u32 %v8369_v10, %v6542_v9  ;;  %v8438_v1 = vld [vmem:[%s12790_s5 + $0x1ec] sm:$0xf0]  ;;  %v6387_v4 = vor.u32 %v8328_v62, %v6384_v63  ;;  %v9276_v7 = vld [vmem:[%s12899_s27] ss:$0 sm:$0xff]  ;;  %v8334_v62 = vld [vmem:[%s9066_s24 + $0xb4] sm:$0xf] }
  0x39   : > { %1019 = vmatpush.bf16.msra.mxu1 %v8354_v14  ;;  %v6366_v14 = vld [vmem:[%s9066_s24 + $0x60] sm:$0xf]  ;;  %v6815_v2 = vor.u32 %v8438_v1, %v6814_v0  ;;  %v6408_v63 = vld [vmem:[%s9066_s24 + $0xb8] sm:$0xf0] }
  0x3a   : > { %1256 = vmatpush.bf16.msra.mxu2 %v6543_v13  ;;  %v6398_v40 = vld [vmem:[%s9066_s24 + $0xa0] sm:$0xf] }
  0x3c   : > { %931 = vmatpush.bf16.msra.mxu0 %v8345_v15  ;;  %v6547_v15 = vor.u32 %v8368_v11, %v6544_v12 }
  0x3d   : > { %1020 = vmatpush.bf16.msra.mxu1 %v8353_v16  ;;  %v8325_v16 = vld [vmem:[%s9066_s24 + $0x64] sm:$0xf0] }
  0x3e   : > { %v6367_v19 = vor.u32 %v8325_v16, %v6366_v14  ;;  %1345 = vmatpush.bf16.msra.mxu3 %v6547_v15  ;;  %v6390_v14 = vld [vmem:[%s9066_s24 + $0x90] sm:$0xf]  ;;  %v8331_v15 = vld [vmem:[%s9066_s24 + $0x94] sm:$0xf0]  ;;  %v8330_v16 = vld [vmem:[%s9066_s24 + $0x94] sm:$0xf] }
  0x40   : > { %932 = vmatpush.bf16.msra.mxu0 %v8344_v17  ;;  %v8324_v17 = vld [vmem:[%s9066_s24 + $0x64] sm:$0xf] }
  0x41   : > { %1021 = vmatpush.bf16.msra.mxu1 %v8352_v18  ;;  %v6368_v18 = vld [vmem:[%s9066_s24 + $0x68] sm:$0xf0] }
  0x42   : > { %v6371_v20 = vor.u32 %v8324_v17, %v6368_v18  ;;  %v6392_v17 = vld [vmem:[%s9066_s24 + $0x98] sm:$0xf0] }
  0x43   : > { %933 = vmatmul.bf16.vlgmr.msra.gmra.mxu0 %v6319_v23  ;;  %v8366_v23 = vld [vmem:[%s12898_s2 + $0x34] sm:$0xf] }
  0x44   : > { %1022 = vmatmul.bf16.vlgmr.msra.gmra.mxu1 %v6323_v24  ;;  %v6535_v24 = vor.u32 %v8367_v22, %v6534_v21  ;;  %v6539_v26 = vor.u32 %v8366_v23, %v6536_v25  ;;  %v6391_v21 = vor.u32 %v8331_v15, %v6390_v14  ;;  %v6395_v22 = vor.u32 %v8330_v16, %v6392_v17  ;;  %v6654_v14 = vld [vmem:[%s12790_s5 + $0xa0] sm:$0xf]  ;;  %v8398_v16 = vld [vmem:[%s12790_s5 + $0xac] sm:$0xf0] }
  0x45   : > { %2010 = vmatpush.bf16.msrb.mxu1 %v6815_v2 }
  0x46   : > { %1257 = vmatpush.bf16.msra.mxu2 %v6535_v24  ;;  %1346 = vmatpush.bf16.msra.mxu3 %v6539_v26  ;;  %v8400_v26 = vld [vmem:[%s12790_s5 + $0xc4] sm:$0xf] }
  0x53   : > { %938 = vmatmul.bf16.gmra.mxu0 %v6327_v29  ;;  %v8364_v29 = vld [vmem:[%s12898_s2 + $0x24] sm:$0xf] }
  0x54   : > { %1027 = vmatmul.bf16.gmra.mxu1 %v6331_v30  ;;  %v6527_v30 = vor.u32 %v8365_v28, %v6526_v27  ;;  %v6531_v32 = vor.u32 %v8364_v29, %v6528_v31  ;;  %v6672_v27 = vld [vmem:[%s12790_s5 + $0xd0] sm:$0xf0]  ;;  %v8432_v29 = vld [vmem:[%s12790_s5 + $0x1c4] sm:$0xf]  ;;  %v6670_v31 = vld [vmem:[%s12790_s5 + $0xc0] sm:$0xf] }
  0x55   : > { %v6675_v28 = vor.u32 %v8400_v26, %v6672_v27  ;;  %v6416_v26 = vld [vmem:[%s9066_s24 + $0xc8] sm:$0xf0] }
  0x56   : > { %1258 = vmatpush.bf16.msra.mxu2 %v6527_v30  ;;  %1347 = vmatpush.bf16.msra.mxu3 %v6531_v32  ;;  %v6800_v30 = vld [vmem:[%s12790_s5 + $0x1d0] sm:$0xf0] }
  0x57   : > { %v6803_v32 = vor.u32 %v8432_v29, %v6800_v30  ;;  %v6782_v29 = vld [vmem:[%s12790_s5 + $0x1a0] sm:$0xf]  ;;  %v8430_v30 = vld [vmem:[%s12790_s5 + $0x1ac] sm:$0xf0] }
  0x63   : > { %943 = vmatmul.bf16.gmra.mxu0 %v6335_v35  ;;  %v8362_v35 = vld [vmem:[%s12898_s2 + $0x14] sm:$0xf] }
  0x64   : > { %1032 = vmatmul.bf16.gmra.mxu1 %v6339_v36  ;;  %v6519_v36 = vor.u32 %v8363_v34, %v6518_v33  ;;  %v6523_v38 = vor.u32 %v8362_v35, %v6520_v37  ;;  %v8402_v33 = vld [vmem:[%s12790_s5 + $0xcc] sm:$0xf0] }
  0x66   : > { %1259 = vmatpush.bf16.msra.mxu2 %v6519_v36  ;;  %1348 = vmatpush.bf16.msra.mxu3 %v6523_v38  ;;  %v6671_v36 = vor.u32 %v8402_v33, %v6670_v31  ;;  %v6783_v31 = vor.u32 %v8430_v30, %v6782_v29  ;;  %v6440_v29 = vld [vmem:[%s9066_s24 + $0xf8] sm:$0xf0] }
  0x73   : > { %948 = vmatmul.bf16.gmra.mxu0 %v6343_v41  ;;  %v6510_v41 = vld [vmem:[%s12898_s2] sm:$0xf] }
  0x74   : > { %1037 = vmatmul.bf16.gmra.mxu1 %v6347_v42  ;;  %v8361_v42 = vld [vmem:[%s12898_s2 + $0x4] sm:$0xf0] }
  0x75   : > { %v6511_v46 = vor.u32 %v8361_v42, %v6510_v41  ;;  %v8333_v41 = vld [vmem:[%s9066_s24 + $0xa4] sm:$0xf0]  ;;  %v8332_v42 = vld [vmem:[%s9066_s24 + $0xa4] sm:$0xf] }
  0x77   : > { %1260 = vmatpush.bf16.msra.mxu2 %v6511_v46  ;;  %v6798_v46 = vld [vmem:[%s12790_s5 + $0x1c0] sm:$0xf] }
  0x7b   : > { %2099 = vmatpush.bf16.msrb.mxu2 %v6691_v54 }
  0x7f   : > { %2100 = vmatpush.bf16.msrb.mxu2 %v6675_v28 }
  0x83   : > { %953 = vmatmul.bf16.gmra.mxu0 %v6351_v47  ;;  %v6512_v47 = vld [vmem:[%s12898_s2 + $0x8] sm:$0xf0] }
  0x84   : > { %1042 = vmatmul.bf16.gmra.mxu1 %v6355_v48  ;;  %v6515_v48 = vor.u32 %v8360_v43, %v6512_v47  ;;  %v6400_v43 = vld [vmem:[%s9066_s24 + $0xa8] sm:$0xf0]  ;;  %v8434_v47 = vld [vmem:[%s12790_s5 + $0x1cc] sm:$0xf0] }
  0x85   : > { %v6403_v51 = vor.u32 %v8332_v42, %v6400_v43  ;;  %v6422_v43 = vld [vmem:[%s9066_s24 + $0xd0] sm:$0xf] }
  0x86   : > { %1349 = vmatpush.bf16.msra.mxu3 %v6515_v48  ;;  %v6799_v48 = vor.u32 %v8434_v47, %v6798_v46  ;;  %v6424_v46 = vld [vmem:[%s9066_s24 + $0xd8] sm:$0xf0] }
  0x88   : > { %2011 = vmatpush.bf16.msrb.mxu1 %v6799_v48 }
  0x8a   : > { %2188 = vmatpush.bf16.msrb.mxu3 %v6819_v58 }
  0x8c   : > { %2012 = vmatpush.bf16.msrb.mxu1 %v6783_v31 }
  0x8e   : > { %2189 = vmatpush.bf16.msrb.mxu3 %v6803_v32 }
  0x93   : > { %958 = vmatmul.bf16.gmra.mxu0 %v6359_v59  ;;  %v6687_v59 = vor.u32 %v8406_v57, %v6686_v56 }
  0x94   : > { %1047 = vmatmul.bf16.gmra.mxu1 %v6363_v60  ;;  %v6382_v60 = vld [vmem:[%s9066_s24 + $0x80] sm:$0xf] }
  0x95   : > { %1921 = vmatpush.bf16.msrb.mxu0 %v6687_v59  ;;  %v6383_v3 = vor.u32 %v8329_v61, %v6382_v60  ;;  %v6406_v60 = vld [vmem:[%s9066_s24 + $0xb0] sm:$0xf]  ;;  %v8335_v61 = vld [vmem:[%s9066_s24 + $0xb4] sm:$0xf0] }
  0x99   : > { %1922 = vmatpush.bf16.msrb.mxu0 %v6671_v36 }
  0xa3   : > { %963 = vmatmul.bf16.gmra.mxu0 %v6367_v19 }
  0xa4   : > { %1052 = vmatmul.bf16.gmra.mxu1 %v6371_v20 }
  0xb3   : > { %968 = vmatmul.bf16.gmra.mxu0 %v6375_v49 }
  0xb4   : > { %1057 = vmatmul.bf16.gmra.mxu1 %v6379_v50  ;;  %v6399_v50 = vor.u32 %v8333_v41, %v6398_v40 }
  0xc0   : > { %v934_v5 = vpop.f32.mrf.mxu0 }
  0xc1   : > { %v1023_v6 = vpop.f32.mrf.mxu1  ;;  %v935_v8 = vadd.f32 %v9276_v7, %v934_v5 }
  0xc3   : > { %973 = vmatmul.bf16.gmra.mxu0 %v6383_v3  ;;  %v1024_v11 = vadd.f32 %v1023_v6, %v935_v8  ;;  %v6407_v3 = vor.u32 %v8335_v61, %v6406_v60  ;;  %v6638_v60 = vld [vmem:[%s12790_s5 + $0x80] sm:$0xf] }
  0xc4   : > { %1062 = vmatmul.bf16.gmra.mxu1 %v6387_v4  ;;  %v6411_v4 = vor.u32 %v8334_v62, %v6408_v63  ;;  %v8394_v62 = vld [vmem:[%s12790_s5 + $0x8c] sm:$0xf0] }
  0xc5   : > { %v1103_v18 = vmax.f32 %v1024_v11, 0.0 }
  0xc8   : > { %v936_v9 = vpop.f32.mrf.mxu0 }
  0xc9   : > { %v1025_v10 = vpop.f32.mrf.mxu1  ;;  %v937_v12 = vadd.f32 %v9276_v7, %v936_v9  ;;  %v8396_v9 = vld [vmem:[%s12790_s5 + $0xa4] sm:$0xf] }
  0xcb   : > { %v1026_v13 = vadd.f32 %v1025_v10, %v937_v12  ;;  %v6656_v10 = vld [vmem:[%s12790_s5 + $0xb0] sm:$0xf0]  ;;  %v8428_v12 = vld [vmem:[%s12790_s5 + $0x1a4] sm:$0xf] }
  0xcc   : > { %v6659_v11 = vor.u32 %v8396_v9, %v6656_v10  ;;  %v6432_v9 = vld [vmem:[%s9066_s24 + $0xe8] sm:$0xf0] }
  0xcd   : > { %v1104_v19 = vmax.f32 %v1026_v13, 0.0  ;;  %v6784_v13 = vld [vmem:[%s12790_s5 + $0x1b0] sm:$0xf0] }
  0xce   : > { %v6787_v15 = vor.u32 %v8428_v12, %v6784_v13  ;;  %2101 = vmatpush.bf16.msrb.mxu2 %v6659_v11  ;;  %v6766_v12 = vld [vmem:[%s12790_s5 + $0x180] sm:$0xf]  ;;  %v8426_v13 = vld [vmem:[%s12790_s5 + $0x18c] sm:$0xf0] }
  0xcf   : > { %v1135_v20 = vpack.c.bf16 %v1104_v19, %v1103_v18  ;;  %v6655_v19 = vor.u32 %v8398_v16, %v6654_v14  ;;  %v6767_v14 = vor.u32 %v8426_v13, %v6766_v12 }
  0xd0   : > { %v939_v23 = vpop.f32.mrf.mxu0  ;;  %2190 = vmatpush.bf16.msrb.mxu3 %v6787_v15 }
  0xd1   : > { %v1028_v24 = vpop.f32.mrf.mxu1  ;;  %1261 = vmatmul.bf16.vlgmr.msra.gmra.mxu2 %v1135_v20  ;;  %1350 = vmatmul.bf16.vlgmr.msra.gmra.mxu3 %v1135_v20  ;;  %v940_v25 = vadd.f32 %v9276_v7, %v939_v23  ;;  %v6414_v23 = vld [vmem:[%s9066_s24 + $0xc0] sm:$0xf] }
  0xd2   : > { %1923 = vmatpush.bf16.msrb.mxu0 %v6655_v19  ;;  %2013 = vmatpush.bf16.msrb.mxu1 %v6767_v14 }
  0xd3   : > { %978 = vmatmul.bf16.gmra.mxu0 %v6391_v21  ;;  %v1029_v37 = vadd.f32 %v1028_v24, %v940_v25  ;;  %v8337_v24 = vld [vmem:[%s9066_s24 + $0xc4] sm:$0xf0]  ;;  %v8336_v25 = vld [vmem:[%s9066_s24 + $0xc4] sm:$0xf] }
  0xd4   : > { %1067 = vmatmul.bf16.gmra.mxu1 %v6395_v22  ;;  %v6415_v33 = vor.u32 %v8337_v24, %v6414_v23 }
  0xd5   : > { %v1105_v44 = vmax.f32 %v1029_v37, 0.0 }
  0xd8   : > { %v941_v34 = vpop.f32.mrf.mxu0 }
  0xd9   : > { %v1030_v35 = vpop.f32.mrf.mxu1  ;;  %v942_v38 = vadd.f32 %v9276_v7, %v941_v34  ;;  %v6419_v34 = vor.u32 %v8336_v25, %v6416_v26  ;;  %v6438_v26 = vld [vmem:[%s9066_s24 + $0xf0] sm:$0xf] }
  0xdb   : > { %v1031_v39 = vadd.f32 %v1030_v35, %v942_v38 }
  0xdd   : > { %v1106_v45 = vmax.f32 %v1031_v39, 0.0 }
  0xdf   : > { %v1136_v49 = vpack.c.bf16 %v1106_v45, %v1105_v44  ;;  %v8339_v44 = vld [vmem:[%s9066_s24 + $0xd4] sm:$0xf0]  ;;  %v8338_v45 = vld [vmem:[%s9066_s24 + $0xd4] sm:$0xf] }
  0xe0   : > { %v944_v52 = vpop.f32.mrf.mxu0 }
  0xe1   : > { %v1033_v53 = vpop.f32.mrf.mxu1  ;;  %1266 = vmatmul.bf16.gmra.mxu2 %v1136_v49  ;;  %1355 = vmatmul.bf16.gmra.mxu3 %v1136_v49  ;;  %v945_v54 = vadd.f32 %v9276_v7, %v944_v52 }
  0xe3   : > { %983 = vmatmul.bf16.gmra.mxu0 %v6399_v50  ;;  %v1034_v57 = vadd.f32 %v1033_v53, %v945_v54  ;;  %v6423_v50 = vor.u32 %v8339_v44, %v6422_v43  ;;  %v8388_v44 = vld [vmem:[%s12790_s5 + $0x64] sm:$0xf] }
  0xe4   : > { %1072 = vmatmul.bf16.gmra.mxu1 %v6403_v51  ;;  %v6427_v51 = vor.u32 %v8338_v45, %v6424_v46  ;;  %v6624_v45 = vld [vmem:[%s12790_s5 + $0x70] sm:$0xf0] }
  0xe5   : > { %v1107_v0 = vmax.f32 %v1034_v57, 0.0  ;;  %v6627_v46 = vor.u32 %v8388_v44, %v6624_v45 }
  0xe8   : > { %v946_v55 = vpop.f32.mrf.mxu0 }
  0xe9   : > { %v1035_v56 = vpop.f32.mrf.mxu1  ;;  %v947_v58 = vadd.f32 %v9276_v7, %v946_v55  ;;  %v8392_v55 = vld [vmem:[%s12790_s5 + $0x84] sm:$0xf] }
  0xeb   : > { %v1036_v59 = vadd.f32 %v1035_v56, %v947_v58  ;;  %v6640_v56 = vld [vmem:[%s12790_s5 + $0x90] sm:$0xf0]  ;;  %v8424_v58 = vld [vmem:[%s12790_s5 + $0x184] sm:$0xf] }
  0xec   : > { %v6643_v57 = vor.u32 %v8392_v55, %v6640_v56 }
  0xed   : > { %v1108_v1 = vmax.f32 %v1036_v59, 0.0  ;;  %v6768_v59 = vld [vmem:[%s12790_s5 + $0x190] sm:$0xf0] }
  0xee   : > { %v6771_v61 = vor.u32 %v8424_v58, %v6768_v59  ;;  %2102 = vmatpush.bf16.msrb.mxu2 %v6643_v57 }
  0xef   : > { %v1137_v2 = vpack.c.bf16 %v1108_v1, %v1107_v0  ;;  %v6639_v1 = vor.u32 %v8394_v62, %v6638_v60  ;;  %v6590_v60 = vld [vmem:[%s12790_s5 + $0x20] sm:$0xf] }
  0xf0   : > { %v949_v5 = vpop.f32.mrf.mxu0  ;;  %2191 = vmatpush.bf16.msrb.mxu3 %v6771_v61  ;;  %v8382_v61 = vld [vmem:[%s12790_s5 + $0x2c] sm:$0xf0]  ;;  %v6718_v62 = vld [vmem:[%s12790_s5 + $0x120] sm:$0xf] }
  0xf1   : > { %v1038_v6 = vpop.f32.mrf.mxu1  ;;  %1271 = vmatmul.bf16.gmra.mxu2 %v1137_v2  ;;  %1360 = vmatmul.bf16.gmra.mxu3 %v1137_v2  ;;  %v950_v8 = vadd.f32 %v9276_v7, %v949_v5  ;;  %v6430_v5 = vld [vmem:[%s9066_s24 + $0xe0] sm:$0xf] }
  0xf2   : > { %1924 = vmatpush.bf16.msrb.mxu0 %v6639_v1  ;;  %2103 = vmatpush.bf16.msrb.mxu2 %v6627_v46 }
  0xf3   : > { %988 = vmatmul.bf16.gmra.mxu0 %v6407_v3  ;;  %v1039_v20 = vadd.f32 %v1038_v6, %v950_v8  ;;  %v8341_v6 = vld [vmem:[%s9066_s24 + $0xe4] sm:$0xf0]  ;;  %v8340_v8 = vld [vmem:[%s9066_s24 + $0xe4] sm:$0xf] }
  0xf4   : > { %1077 = vmatmul.bf16.gmra.mxu1 %v6411_v4  ;;  %v6431_v16 = vor.u32 %v8341_v6, %v6430_v5  ;;  %v6574_v5 = vld [vmem:[%s12790_s5] sm:$0xf]  ;;  %v8378_v6 = vld [vmem:[%s12790_s5 + $0xc] sm:$0xf0] }
  0xf5   : > { %v1109_v27 = vmax.f32 %v1039_v20, 0.0 }
  0xf8   : > { %v951_v17 = vpop.f32.mrf.mxu0 }
  0xf9   : > { %v1040_v18 = vpop.f32.mrf.mxu1  ;;  %v952_v21 = vadd.f32 %v9276_v7, %v951_v17  ;;  %v6435_v17 = vor.u32 %v8340_v8, %v6432_v9  ;;  %v6575_v8 = vor.u32 %v8378_v6, %v6574_v5  ;;  %v6702_v9 = vld [vmem:[%s12790_s5 + $0x100] sm:$0xf] }
  0xfb   : > { %v1041_v22 = vadd.f32 %v1040_v18, %v952_v21 }
  0xfd   : > { %v1110_v28 = vmax.f32 %v1041_v22, 0.0 }
  0xff   : > { %v1138_v32 = vpack.c.bf16 %v1110_v28, %v1109_v27  ;;  %v8343_v27 = vld [vmem:[%s9066_s24 + $0xf4] sm:$0xf0]  ;;  %v8342_v28 = vld [vmem:[%s9066_s24 + $0xf4] sm:$0xf] }
 0x100   : > { %v954_v35 = vpop.f32.mrf.mxu0 }
 0x101   : > { %v1043_v36 = vpop.f32.mrf.mxu1  ;;  %1276 = vmatmul.bf16.gmra.mxu2 %v1138_v32  ;;  %1365 = vmatmul.bf16.gmra.mxu3 %v1138_v32  ;;  %v955_v37 = vadd.f32 %v9276_v7, %v954_v35 }
 0x103   : > { %993 = vmatmul.bf16.gmra.mxu0 %v6415_v33  ;;  %v1044_v40 = vadd.f32 %v1043_v36, %v955_v37  ;;  %v6439_v33 = vor.u32 %v8343_v27, %v6438_v26  ;;  %v6622_v37 = vld [vmem:[%s12790_s5 + $0x60] sm:$0xf] }
 0x104   : > { %1082 = vmatmul.bf16.gmra.mxu1 %v6419_v34  ;;  %v6443_v34 = vor.u32 %v8342_v28, %v6440_v29  ;;  %v1167_v26 = vld [vmem:[%s12789_s4] sm:$0x3] }
 0x105   : > { %v1111_v47 = vmax.f32 %v1044_v40, 0.0 }
 0x108   : > { %v956_v38 = vpop.f32.mrf.mxu0 }
 0x109   : > { %v1045_v39 = vpop.f32.mrf.mxu1  ;;  %v957_v41 = vadd.f32 %v9276_v7, %v956_v38  ;;  %v8390_v38 = vld [vmem:[%s12790_s5 + $0x6c] sm:$0xf0] }
 0x10a   : > { %v6623_v40 = vor.u32 %v8390_v38, %v6622_v37 }
 0x10b   : > { %v1046_v42 = vadd.f32 %v1045_v39, %v957_v41  ;;  %v6750_v39 = vld [vmem:[%s12790_s5 + $0x160] sm:$0xf]  ;;  %v8422_v41 = vld [vmem:[%s12790_s5 + $0x16c] sm:$0xf0] }
 0x10c   : > { %1925 = vmatpush.bf16.msrb.mxu0 %v6623_v40 }
 0x10d   : > { %v1112_v48 = vmax.f32 %v1046_v42, 0.0  ;;  %v6751_v42 = vor.u32 %v8422_v41, %v6750_v39 }
 0x10f   : > { %v1139_v49 = vpack.c.bf16 %v1112_v48, %v1111_v47  ;;  %2014 = vmatpush.bf16.msrb.mxu1 %v6751_v42  ;;  %v8420_v47 = vld [vmem:[%s12790_s5 + $0x164] sm:$0xf]  ;;  %v6752_v48 = vld [vmem:[%s12790_s5 + $0x170] sm:$0xf0] }
 0x110   : > { %v959_v52 = vpop.f32.mrf.mxu0 }
 0x111   : > { %v1048_v53 = vpop.f32.mrf.mxu1  ;;  %1281 = vmatmul.bf16.gmra.mxu2 %v1139_v49  ;;  %1370 = vmatmul.bf16.gmra.mxu3 %v1139_v49  ;;  %v960_v54 = vadd.f32 %v9276_v7, %v959_v52  ;;  %v6606_v49 = vld [vmem:[%s12790_s5 + $0x40] sm:$0xf] }
 0x112   : > { %v6734_v52 = vld [vmem:[%s12790_s5 + $0x140] sm:$0xf] }
 0x113   : > { %998 = vmatmul.bf16.gmra.mxu0 %v6423_v50  ;;  %v1049_v2 = vadd.f32 %v1048_v53, %v960_v54  ;;  %v6755_v50 = vor.u32 %v8420_v47, %v6752_v48  ;;  %v8418_v53 = vld [vmem:[%s12790_s5 + $0x14c] sm:$0xf0] }
 0x114   : > { %1087 = vmatmul.bf16.gmra.mxu1 %v6427_v51  ;;  %v8386_v51 = vld [vmem:[%s12790_s5 + $0x4c] sm:$0xf0]  ;;  %v6735_v57 = vor.u32 %v8418_v53, %v6734_v52 }
 0x115   : > { %v1113_v10 = vmax.f32 %v1049_v2, 0.0  ;;  %v6607_v56 = vor.u32 %v8386_v51, %v6606_v49  ;;  %2192 = vmatpush.bf16.msrb.mxu3 %v6755_v50 }
 0x116   : > { %2015 = vmatpush.bf16.msrb.mxu1 %v6735_v57 }
 0x117   : > { %1926 = vmatpush.bf16.msrb.mxu0 %v6607_v56 }
 0x118   : > { %v961_v63 = vpop.f32.mrf.mxu0 }
 0x119   : > { %v1050_v0 = vpop.f32.mrf.mxu1  ;;  %v962_v3 = vadd.f32 %v9276_v7, %v961_v63  ;;  %v6591_v63 = vor.u32 %v8382_v61, %v6590_v60 }
 0x11b   : > { %v1051_v4 = vadd.f32 %v1050_v0, %v962_v3  ;;  %v8414_v0 = vld [vmem:[%s12790_s5 + $0x12c] sm:$0xf0]  ;;  %1927 = vmatpush.bf16.msrb.mxu0 %v6591_v63 }
 0x11c   : > { %v6719_v2 = vor.u32 %v8414_v0, %v6718_v62 }
 0x11d   : > { %v1114_v11 = vmax.f32 %v1051_v4, 0.0 }
 0x11e   : > { %2016 = vmatpush.bf16.msrb.mxu1 %v6719_v2 }
 0x11f   : > { %v1140_v15 = vpack.c.bf16 %v1114_v11, %v1113_v10  ;;  %v8410_v10 = vld [vmem:[%s12790_s5 + $0x10c] sm:$0xf0]  ;;  %1928 = vmatpush.bf16.msrb.mxu0 %v6575_v8 }
 0x120   : > { %v964_v18 = vpop.f32.mrf.mxu0  ;;  %v6703_v12 = vor.u32 %v8410_v10, %v6702_v9 }
 0x121   : > { %v1053_v19 = vpop.f32.mrf.mxu1  ;;  %1286 = vmatmul.bf16.gmra.mxu2 %v1140_v15  ;;  %1375 = vmatmul.bf16.gmra.mxu3 %v1140_v15  ;;  %v965_v20 = vadd.f32 %v9276_v7, %v964_v18 }
 0x122   : > { %2017 = vmatpush.bf16.msrb.mxu1 %v6703_v12 }
 0x123   : > { %1003 = vmatmul.bf16.gmra.mxu0 %v6431_v16  ;;  %v1054_v23 = vadd.f32 %v1053_v19, %v965_v20 }
 0x124   : > { %1092 = vmatmul.bf16.gmra.mxu1 %v6435_v17 }
 0x125   : > { %v1115_v30 = vmax.f32 %v1054_v23, 0.0 }
 0x128   : > { %v966_v21 = vpop.f32.mrf.mxu0 }
 0x129   : > { %v1055_v22 = vpop.f32.mrf.mxu1  ;;  %v967_v24 = vadd.f32 %v9276_v7, %v966_v21 }
 0x12b   : > { %v1056_v25 = vadd.f32 %v1055_v22, %v967_v24 }
 0x12d   : > { %v1116_v31 = vmax.f32 %v1056_v25, 0.0 }
 0x12f   : > { %v1141_v32 = vpack.c.bf16 %v1116_v31, %v1115_v30  ;;  %v8384_v30 = vld [vmem:[%s12790_s5 + $0x44] sm:$0xf]  ;;  %v6608_v31 = vld [vmem:[%s12790_s5 + $0x50] sm:$0xf0] }
 0x130   : > { %v969_v35 = vpop.f32.mrf.mxu0 }
 0x131   : > { %v1058_v36 = vpop.f32.mrf.mxu1  ;;  %1291 = vmatmul.bf16.gmra.mxu2 %v1141_v32  ;;  %1380 = vmatmul.bf16.gmra.mxu3 %v1141_v32  ;;  %v970_v43 = vadd.f32 %v9276_v7, %v969_v35  ;;  %v9466_v32 = vperm.slane %v1167_v26, 0  ;;  %v6736_v35 = vld [vmem:[%s12790_s5 + $0x150] sm:$0xf0] }
 0x133   : > { %1008 = vmatmul.bf16.gmra.mxu0 %v6439_v33  ;;  %v1059_v58 = vadd.f32 %v1058_v36, %v970_v43  ;;  %v6611_v33 = vor.u32 %v8384_v30, %v6608_v31  ;;  %v9474_v36 = vperm.slane %v1167_v26, 1  ;;  %v6592_v26 = vld [vmem:[%s12790_s5 + $0x30] sm:$0xf0] }
 0x134   : > { %1097 = vmatmul.bf16.gmra.mxu1 %v6443_v34  ;;  %v8416_v34 = vld [vmem:[%s12790_s5 + $0x144] sm:$0xf] }
 0x135   : > { %v1117_v3 = vmax.f32 %v1059_v58, 0.0  ;;  %v6739_v37 = vor.u32 %v8416_v34, %v6736_v35  ;;  %2104 = vmatpush.bf16.msrb.mxu2 %v6611_v33 }
 0x137   : > { %2193 = vmatpush.bf16.msrb.mxu3 %v6739_v37 }
 0x138   : > { %v971_v54 = vpop.f32.mrf.mxu0 }
 0x139   : > { %v1060_v55 = vpop.f32.mrf.mxu1  ;;  %v972_v59 = vadd.f32 %v9276_v7, %v971_v54 }
 0x13b   : > { %v1061_v1 = vadd.f32 %v1060_v55, %v972_v59 }
 0x13d   : > { %v1118_v4 = vmax.f32 %v1061_v1, 0.0 }
 0x13f   : > { %v1142_v11 = vpack.c.bf16 %v1118_v4, %v1117_v3 }
 0x140   : > { %v974_v13 = vpop.f32.mrf.mxu0 }
 0x141   : > { %v1063_v14 = vpop.f32.mrf.mxu1  ;;  %1296 = vmatmul.bf16.gmra.mxu2 %v1142_v11  ;;  %1385 = vmatmul.bf16.gmra.mxu3 %v1142_v11  ;;  %v975_v15 = vadd.f32 %v9276_v7, %v974_v13 }
 0x143   : > { %v1064_v18 = vadd.f32 %v1063_v14, %v975_v15 }
 0x145   : > { %v1119_v21 = vmax.f32 %v1064_v18, 0.0 }
 0x148   : > { %v976_v16 = vpop.f32.mrf.mxu0 }
 0x149   : > { %v1065_v17 = vpop.f32.mrf.mxu1  ;;  %v977_v19 = vadd.f32 %v9276_v7, %v976_v16 }
 0x14b   : > { %v1066_v20 = vadd.f32 %v1065_v17, %v977_v19 }
 0x14d   : > { %v1120_v22 = vmax.f32 %v1066_v20, 0.0 }
 0x14f   : > { %v1143_v23 = vpack.c.bf16 %v1120_v22, %v1119_v21 }
 0x150   : > { %v979_v24 = vpop.f32.mrf.mxu0 }
 0x151   : > { %v1068_v25 = vpop.f32.mrf.mxu1  ;;  %1301 = vmatmul.bf16.gmra.mxu2 %v1143_v23  ;;  %1390 = vmatmul.bf16.gmra.mxu3 %v1143_v23  ;;  %v980_v29 = vadd.f32 %v9276_v7, %v979_v24 }
 0x153   : > { %v1069_v40 = vadd.f32 %v1068_v25, %v980_v29  ;;  %v8380_v25 = vld [vmem:[%s12790_s5 + $0x24] sm:$0xf]  ;;  %v6720_v29 = vld [vmem:[%s12790_s5 + $0x130] sm:$0xf0] }
 0x154   : > { %v1262_v27 = vpop.f32.mrf.mxu2  ;;  %v1351_v28 = vpop.f32.mrf.mxu3 }
 0x155   : > { %v1263_v42 = vadd.f32 %v1262_v27, %v9466_v32  ;;  %v1352_v43 = vadd.f32 %v1351_v28, %v9474_v36  ;;  %v1121_v47 = vmax.f32 %v1069_v40, 0.0  ;;  %v6595_v27 = vor.u32 %v8380_v25, %v6592_v26  ;;  %v8412_v28 = vld [vmem:[%s12790_s5 + $0x124] sm:$0xf]  ;;  %v6576_v25 = vld [vmem:[%s12790_s5 + $0x10] sm:$0xf0] }
 0x156   : > { %v6723_v30 = vor.u32 %v8412_v28, %v6720_v29  ;;  %v6704_v28 = vld [vmem:[%s12790_s5 + $0x110] sm:$0xf0] }
 0x157   : > { %v1431_v51 = vmax.f32 %v1263_v42, 0.0  ;;  %v1432_v52 = vmax.f32 %v1352_v43, 0.0  ;;  %2105 = vmatpush.bf16.msrb.mxu2 %v6595_v27  ;;  %v8408_v27 = vld [vmem:[%s12790_s5 + $0x104] sm:$0xf] }
 0x158   : > { %v981_v38 = vpop.f32.mrf.mxu0  ;;  %2194 = vmatpush.bf16.msrb.mxu3 %v6723_v30  ;;  %v6707_v29 = vor.u32 %v8408_v27, %v6704_v28  ;;  %v8437_v27 = vld [vmem:[%s12790_s5 + $0x1ec] sm:$0xf]  ;;  %v6824_v28 = vld [vmem:[%s12790_s5 + $0x1f8] sm:$0xf0] }
 0x159   : > { %v1070_v39 = vpop.f32.mrf.mxu1  ;;  %v982_v41 = vadd.f32 %v9276_v7, %v981_v38 }
 0x15b   : > { %v1071_v44 = vadd.f32 %v1070_v39, %v982_v41 }
 0x15c   : > { %v1264_v45 = vpop.f32.mrf.mxu2  ;;  %v1353_v46 = vpop.f32.mrf.mxu3  ;;  %2195 = vmatpush.bf16.msrb.mxu3 %v6707_v29 }
 0x15d   : > { %v1122_v48 = vmax.f32 %v1071_v44, 0.0  ;;  %v1265_v49 = vadd.f32 %v1264_v45, %v9466_v32  ;;  %v1354_v50 = vadd.f32 %v1353_v46, %v9474_v36 }
 0x15f   : > { %v1433_v53 = vmax.f32 %v1265_v49, 0.0  ;;  %v1434_v54 = vmax.f32 %v1354_v50, 0.0  ;;  %v1144_v55 = vpack.c.bf16 %v1122_v48, %v1121_v47 }
 0x160   : > { %v984_v56 = vpop.f32.mrf.mxu0 }
 0x161   : > { %v1073_v57 = vpop.f32.mrf.mxu1  ;;  %v9481_v58 = vpack.c.bf16 %v1433_v53, %v1431_v51  ;;  %v9483_v59 = vpack.c.bf16 %v1434_v54, %v1432_v52  ;;  %1306 = vmatmul.bf16.gmra.mxu2 %v1144_v55  ;;  %1395 = vmatmul.bf16.gmra.mxu3 %v1144_v55  ;;  %v985_v62 = vadd.f32 %v9276_v7, %v984_v56 }
 0x163   : > { %1929 = vmatmul.bf16.vlgmr.msrb.gmra.mxu0 %v9481_v58  ;;  %2018 = vmatmul.bf16.vlgmr.msrb.gmra.mxu1 %v9483_v59  ;;  %v1074_v1 = vadd.f32 %v1073_v57, %v985_v62 }
 0x164   : > { %v1267_v60 = vpop.f32.mrf.mxu2  ;;  %v1356_v61 = vpop.f32.mrf.mxu3 }
 0x165   : > { %v1268_v3 = vadd.f32 %v1267_v60, %v9466_v32  ;;  %v1357_v4 = vadd.f32 %v1356_v61, %v9474_v36  ;;  %v1123_v9 = vmax.f32 %v1074_v1, 0.0 }
 0x167   : > { %v1435_v13 = vmax.f32 %v1268_v3, 0.0  ;;  %v1436_v14 = vmax.f32 %v1357_v4, 0.0 }
 0x168   : > { %v986_v63 = vpop.f32.mrf.mxu0 }
 0x169   : > { %v1075_v0 = vpop.f32.mrf.mxu1  ;;  %v987_v2 = vadd.f32 %v9276_v7, %v986_v63 }
 0x16b   : > { %v1076_v5 = vadd.f32 %v1075_v0, %v987_v2 }
 0x16c   : > { %v1269_v6 = vpop.f32.mrf.mxu2  ;;  %v1358_v8 = vpop.f32.mrf.mxu3 }
 0x16d   : > { %v1124_v10 = vmax.f32 %v1076_v5, 0.0  ;;  %v1270_v11 = vadd.f32 %v1269_v6, %v9466_v32  ;;  %v1359_v12 = vadd.f32 %v1358_v8, %v9474_v36 }
 0x16f   : > { %v1437_v15 = vmax.f32 %v1270_v11, 0.0  ;;  %v1438_v16 = vmax.f32 %v1359_v12, 0.0  ;;  %v1145_v17 = vpack.c.bf16 %v1124_v10, %v1123_v9 }
 0x170   : > { %v989_v18 = vpop.f32.mrf.mxu0 }
 0x171   : > { %v1078_v19 = vpop.f32.mrf.mxu1  ;;  %v9493_v20 = vpack.c.bf16 %v1437_v15, %v1435_v13  ;;  %v9495_v21 = vpack.c.bf16 %v1438_v16, %v1436_v14  ;;  %1311 = vmatmul.bf16.gmra.mxu2 %v1145_v17  ;;  %1400 = vmatmul.bf16.gmra.mxu3 %v1145_v17  ;;  %v990_v24 = vadd.f32 %v9276_v7, %v989_v18 }
 0x173   : > { %1934 = vmatmul.bf16.gmra.mxu0 %v9493_v20  ;;  %2023 = vmatmul.bf16.gmra.mxu1 %v9495_v21  ;;  %v1079_v34 = vadd.f32 %v1078_v19, %v990_v24  ;;  %v8376_v24 = vld [vmem:[%s12790_s5 + $0x4] sm:$0xf] }
 0x174   : > { %v1272_v22 = vpop.f32.mrf.mxu2  ;;  %v1361_v23 = vpop.f32.mrf.mxu3  ;;  %v6579_v26 = vor.u32 %v8376_v24, %v6576_v25  ;;  %v8405_v24 = vld [vmem:[%s12790_s5 + $0xec] sm:$0xf]  ;;  %v6696_v25 = vld [vmem:[%s12790_s5 + $0xf8] sm:$0xf0] }
 0x175   : > { %v1273_v37 = vadd.f32 %v1272_v22, %v9466_v32  ;;  %v1362_v38 = vadd.f32 %v1361_v23, %v9474_v36  ;;  %v1125_v42 = vmax.f32 %v1079_v34, 0.0 }
 0x176   : > { %2106 = vmatpush.bf16.msrb.mxu2 %v6579_v26  ;;  %v6699_v26 = vor.u32 %v8405_v24, %v6696_v25  ;;  %v8401_v25 = vld [vmem:[%s12790_s5 + $0xcc] sm:$0xf] }
 0x177   : > { %v1439_v46 = vmax.f32 %v1273_v37, 0.0  ;;  %v1440_v47 = vmax.f32 %v1362_v38, 0.0 }
 0x178   : > { %v991_v31 = vpop.f32.mrf.mxu0 }
 0x179   : > { %v1080_v33 = vpop.f32.mrf.mxu1  ;;  %v992_v35 = vadd.f32 %v9276_v7, %v991_v31 }
 0x17a   : > { %2455 = vmatpush.bf16.msra.mxu2 %v6699_v26  ;;  %v6680_v26 = vld [vmem:[%s12790_s5 + $0xd8] sm:$0xf0] }
 0x17b   : > { %v1081_v39 = vadd.f32 %v1080_v33, %v992_v35 }
 0x17c   : > { %v1274_v40 = vpop.f32.mrf.mxu2  ;;  %v1363_v41 = vpop.f32.mrf.mxu3 }
 0x17d   : > { %v1126_v43 = vmax.f32 %v1081_v39, 0.0  ;;  %v1275_v44 = vadd.f32 %v1274_v40, %v9466_v32  ;;  %v1364_v45 = vadd.f32 %v1363_v41, %v9474_v36 }
 0x17f   : > { %v1441_v48 = vmax.f32 %v1275_v44, 0.0  ;;  %v1442_v49 = vmax.f32 %v1364_v45, 0.0  ;;  %v1146_v50 = vpack.c.bf16 %v1126_v43, %v1125_v42 }
 0x180   : > { %v994_v51 = vpop.f32.mrf.mxu0 }
 0x181   : > { %v1083_v52 = vpop.f32.mrf.mxu1  ;;  %v9517_v53 = vpack.c.bf16 %v1441_v48, %v1439_v46  ;;  %v9519_v54 = vpack.c.bf16 %v1442_v49, %v1440_v47  ;;  %1316 = vmatmul.bf16.gmra.mxu2 %v1146_v50  ;;  %1405 = vmatmul.bf16.gmra.mxu3 %v1146_v50  ;;  %v995_v57 = vadd.f32 %v9276_v7, %v994_v51 }
 0x183   : > { %1939 = vmatmul.bf16.gmra.mxu0 %v9517_v53  ;;  %2028 = vmatmul.bf16.gmra.mxu1 %v9519_v54  ;;  %v1084_v62 = vadd.f32 %v1083_v52, %v995_v57 }
 0x184   : > { %v1277_v55 = vpop.f32.mrf.mxu2  ;;  %v1366_v56 = vpop.f32.mrf.mxu3 }
 0x185   : > { %v1278_v0 = vadd.f32 %v1277_v55, %v9466_v32  ;;  %v1367_v1 = vadd.f32 %v1366_v56, %v9474_v36  ;;  %v1127_v5 = vmax.f32 %v1084_v62, 0.0 }
 0x187   : > { %v1443_v10 = vmax.f32 %v1278_v0, 0.0  ;;  %v1444_v11 = vmax.f32 %v1367_v1, 0.0 }
 0x188   : > { %v996_v60 = vpop.f32.mrf.mxu0 }
 0x189   : > { %v1085_v61 = vpop.f32.mrf.mxu1  ;;  %v997_v63 = vadd.f32 %v9276_v7, %v996_v60 }
 0x18b   : > { %v1086_v2 = vadd.f32 %v1085_v61, %v997_v63 }
 0x18c   : > { %v1279_v3 = vpop.f32.mrf.mxu2  ;;  %v1368_v4 = vpop.f32.mrf.mxu3 }
 0x18d   : > { %v1128_v6 = vmax.f32 %v1086_v2, 0.0  ;;  %v1280_v8 = vadd.f32 %v1279_v3, %v9466_v32  ;;  %v1369_v9 = vadd.f32 %v1368_v4, %v9474_v36 }
 0x18f   : > { %v1445_v12 = vmax.f32 %v1280_v8, 0.0  ;;  %v1446_v13 = vmax.f32 %v1369_v9, 0.0  ;;  %v1147_v14 = vpack.c.bf16 %v1128_v6, %v1127_v5 }
 0x190   : > { %v999_v15 = vpop.f32.mrf.mxu0 }
 0x191   : > { %v1088_v16 = vpop.f32.mrf.mxu1  ;;  %v9529_v17 = vpack.c.bf16 %v1445_v12, %v1443_v10  ;;  %v9531_v18 = vpack.c.bf16 %v1446_v13, %v1444_v11  ;;  %1321 = vmatmul.bf16.gmra.mxu2 %v1147_v14  ;;  %1410 = vmatmul.bf16.gmra.mxu3 %v1147_v14  ;;  %v1000_v23 = vadd.f32 %v9276_v7, %v999_v15 }
 0x193   : > { %1944 = vmatmul.bf16.gmra.mxu0 %v9529_v17  ;;  %2033 = vmatmul.bf16.gmra.mxu1 %v9531_v18  ;;  %v1089_v33 = vadd.f32 %v1088_v16, %v1000_v23 }
 0x194   : > { %v1282_v19 = vpop.f32.mrf.mxu2  ;;  %v1371_v22 = vpop.f32.mrf.mxu3 }
 0x195   : > { %v1283_v35 = vadd.f32 %v1282_v19, %v9466_v32  ;;  %v1372_v37 = vadd.f32 %v1371_v22, %v9474_v36  ;;  %v1129_v41 = vmax.f32 %v1089_v33, 0.0 }
 0x197   : > { %v1447_v45 = vmax.f32 %v1283_v35, 0.0  ;;  %v1448_v46 = vmax.f32 %v1372_v37, 0.0  ;;  %v8407_v35 = vld [vmem:[%s12790_s5 + $0xf4] sm:$0xf0] }
 0x198   : > { %v1001_v30 = vpop.f32.mrf.mxu0 }
 0x199   : > { %v1090_v31 = vpop.f32.mrf.mxu1  ;;  %v1002_v34 = vadd.f32 %v9276_v7, %v1001_v30 }
 0x19b   : > { %v1091_v38 = vadd.f32 %v1090_v31, %v1002_v34  ;;  %v6827_v31 = vor.u32 %v8437_v27, %v6824_v28  ;;  %v6694_v34 = vld [vmem:[%s12790_s5 + $0xe8] sm:$0xf]  ;;  %v8433_v27 = vld [vmem:[%s12790_s5 + $0x1cc] sm:$0xf]  ;;  %v6683_v28 = vor.u32 %v8401_v25, %v6680_v26 }
 0x19c   : > { %v1284_v39 = vpop.f32.mrf.mxu2  ;;  %v1373_v40 = vpop.f32.mrf.mxu3 }
 0x19d   : > { %v1130_v42 = vmax.f32 %v1091_v38, 0.0  ;;  %v1285_v43 = vadd.f32 %v1284_v39, %v9466_v32  ;;  %v1374_v44 = vadd.f32 %v1373_v40, %v9474_v36  ;;  %2544 = vmatpush.bf16.msra.mxu3 %v6827_v31  ;;  %v6695_v38 = vor.u32 %v8407_v35, %v6694_v34  ;;  %v6822_v39 = vld [vmem:[%s12790_s5 + $0x1e8] sm:$0xf]  ;;  %v8439_v40 = vld [vmem:[%s12790_s5 + $0x1f4] sm:$0xf0]  ;;  %2456 = vmatpush.bf16.msra.mxu2 %v6683_v28 }
 0x19e   : > { %v8403_v31 = vld [vmem:[%s12790_s5 + $0xd4] sm:$0xf0] }
 0x19f   : > { %v1449_v47 = vmax.f32 %v1285_v43, 0.0  ;;  %v1450_v48 = vmax.f32 %v1374_v44, 0.0  ;;  %v1148_v49 = vpack.c.bf16 %v1130_v42, %v1129_v41  ;;  %v6823_v43 = vor.u32 %v8439_v40, %v6822_v39  ;;  %2277 = vmatpush.bf16.msra.mxu0 %v6695_v38 }
 0x1a0   : > { %v1004_v50 = vpop.f32.mrf.mxu0 }
 0x1a1   : > { %v1093_v51 = vpop.f32.mrf.mxu1  ;;  %v9553_v52 = vpack.c.bf16 %v1449_v47, %v1447_v45  ;;  %v9555_v55 = vpack.c.bf16 %v1450_v48, %v1448_v46  ;;  %1326 = vmatmul.bf16.gmra.mxu2 %v1148_v49  ;;  %1415 = vmatmul.bf16.gmra.mxu3 %v1148_v49  ;;  %v1005_v60 = vadd.f32 %v9276_v7, %v1004_v50 }
 0x1a2   : > { %2366 = vmatpush.bf16.msra.mxu1 %v6823_v43 }
 0x1a3   : > { %1949 = vmatmul.bf16.gmra.mxu0 %v9553_v52  ;;  %2038 = vmatmul.bf16.gmra.mxu1 %v9555_v55  ;;  %v1094_v63 = vadd.f32 %v1093_v51, %v1005_v60 }
 0x1a4   : > { %v1287_v56 = vpop.f32.mrf.mxu2  ;;  %v1376_v57 = vpop.f32.mrf.mxu3 }
 0x1a5   : > { %v1288_v1 = vadd.f32 %v1287_v56, %v9466_v32  ;;  %v1377_v2 = vadd.f32 %v1376_v57, %v9474_v36  ;;  %v1131_v6 = vmax.f32 %v1094_v63, 0.0 }
 0x1a7   : > { %v1451_v11 = vmax.f32 %v1288_v1, 0.0  ;;  %v1452_v12 = vmax.f32 %v1377_v2, 0.0 }
 0x1a8   : > { %v1006_v61 = vpop.f32.mrf.mxu0 }
 0x1a9   : > { %v1095_v62 = vpop.f32.mrf.mxu1  ;;  %v1007_v0 = vadd.f32 %v9276_v7, %v1006_v61 }
 0x1ab   : > { %v1096_v3 = vadd.f32 %v1095_v62, %v1007_v0 }
 0x1ac   : > { %v1289_v4 = vpop.f32.mrf.mxu2  ;;  %v1378_v5 = vpop.f32.mrf.mxu3 }
 0x1ad   : > { %v1132_v8 = vmax.f32 %v1096_v3, 0.0  ;;  %v1290_v9 = vadd.f32 %v1289_v4, %v9466_v32  ;;  %v1379_v10 = vadd.f32 %v1378_v5, %v9474_v36 }
 0x1af   : > { %v1453_v13 = vmax.f32 %v1290_v9, 0.0  ;;  %v1454_v14 = vmax.f32 %v1379_v10, 0.0  ;;  %v1149_v15 = vpack.c.bf16 %v1132_v8, %v1131_v6 }
 0x1b0   : > { %v1009_v16 = vpop.f32.mrf.mxu0 }
 0x1b1   : > { %v1098_v19 = vpop.f32.mrf.mxu1  ;;  %v9565_v22 = vpack.c.bf16 %v1453_v13, %v1451_v11  ;;  %v9567_v23 = vpack.c.bf16 %v1454_v14, %v1452_v12  ;;  %1331 = vmatmul.bf16.gmra.mxu2 %v1149_v15  ;;  %1420 = vmatmul.bf16.gmra.mxu3 %v1149_v15  ;;  %v1010_v33 = vadd.f32 %v9276_v7, %v1009_v16 }
 0x1b3   : > { %12900 = vst [vmem:[#allocation11_spill] sm:$0xff] %v9567_v23  ;;  %1954 = vmatmul.bf16.gmra.mxu0 %v9565_v22  ;;  %2043 = vmatmul.bf16.gmra.mxu1 %v9567_v23  ;;  %v1099_v41 = vadd.f32 %v1098_v19, %v1010_v33  ;;  %v9640_v33 = vld [vmem:[%s12791_s6] sm:$0xf] }
 0x1b4   : > { %v1292_v29 = vpop.f32.mrf.mxu2  ;;  %v1381_v30 = vpop.f32.mrf.mxu3  ;;  %v9647_v43 = vperm.slane %v9640_v33, 0 }
 0x1b5   : > { %v1293_v44 = vadd.f32 %v1292_v29, %v9466_v32  ;;  %v1382_v46 = vadd.f32 %v1381_v30, %v9474_v36  ;;  %v1133_v50 = vmax.f32 %v1099_v41, 0.0  ;;  %v6808_v29 = vld [vmem:[%s12790_s5 + $0x1d8] sm:$0xf0]  ;;  %v6678_v30 = vld [vmem:[%s12790_s5 + $0xc8] sm:$0xf] }
 0x1b6   : > { %v6811_v34 = vor.u32 %v8433_v27, %v6808_v29  ;;  %v6679_v35 = vor.u32 %v8403_v31, %v6678_v30 }
 0x1b7   : > { %v1455_v60 = vmax.f32 %v1293_v44, 0.0  ;;  %v1456_v61 = vmax.f32 %v1382_v46, 0.0  ;;  %v12807_v44 = vlaneseq }
 0x1b8   : > { %v1011_v37 = vpop.f32.mrf.mxu0  ;;  %2545 = vmatpush.bf16.msra.mxu3 %v6811_v34  ;;  %2278 = vmatpush.bf16.msra.mxu0 %v6679_v35 }
 0x1b9   : > { %v1012_v42 = vadd.f32 %v9276_v7, %v1011_v37  ;;  %v1100_v45 = vpop.f32.mrf.mxu1 }
 0x1bb   : > { %v1101_v47 = vadd.f32 %v1100_v45, %v1012_v42 }
 0x1bc   : > { %v1294_v48 = vpop.f32.mrf.mxu2  ;;  %v1383_v49 = vpop.f32.mrf.mxu3 }
 0x1bd   : > { %v1134_v51 = vmax.f32 %v1101_v47, 0.0  ;;  %v1295_v56 = vadd.f32 %v1294_v48, %v9466_v32  ;;  %v1384_v57 = vadd.f32 %v1383_v49, %v9474_v36 }
 0x1bf   : > { %v1457_v7 = vmax.f32 %v1295_v56, 0.0  ;;  %v1458_v62 = vmax.f32 %v1384_v57, 0.0  ;;  %v1150_v63 = vpack.c.bf16 %v1134_v51, %v1133_v50  ;;  %v6806_v51 = vld [vmem:[%s12790_s5 + $0x1c8] sm:$0xf]  ;;  %v8435_v56 = vld [vmem:[%s12790_s5 + $0x1d4] sm:$0xf0] }
 0x1c1   : > { %v9601_v0 = vpack.c.bf16 %v1457_v7, %v1455_v60  ;;  %v9603_v1 = vpack.c.bf16 %v1458_v62, %v1456_v61  ;;  %1336 = vmatmul.bf16.gmra.mxu2 %v1150_v63  ;;  %1425 = vmatmul.bf16.gmra.mxu3 %v1150_v63  ;;  %v9664_v7 = vshrl.u32 %v12807_v44, 7  ;;  %v6807_v62 = vor.u32 %v8435_v56, %v6806_v51 }
 0x1c3   : > { %12901 = vst [vmem:[#allocation12_spill] sm:$0xff] %v9601_v0  ;;  %1959 = vmatmul.bf16.gmra.mxu0 %v9601_v0  ;;  %2048 = vmatmul.bf16.gmra.mxu1 %v9603_v1  ;;  %v2765_v26 = vadd.s32 16, %v9664_v7  ;;  %v2766_v51 = vadd.s32 24, %v9664_v7 }
 0x1c4   : > { %12902 = vst [vmem:[#allocation13_spill] sm:$0xff] %v9603_v1  ;;  %v1297_v2 = vpop.f32.mrf.mxu2  ;;  %v1386_v3 = vpop.f32.mrf.mxu3  ;;  %2367 = vmatpush.bf16.msra.mxu1 %v6807_v62 }
 0x1c5   : > { %v1298_v4 = vadd.f32 %v1297_v2, %v9466_v32  ;;  %v1387_v5 = vadd.f32 %v1386_v3, %v9474_v36  ;;  %v9668_v2 = vstv %s6828_s25 }
 0x1c7   : > { %v1459_v11 = vmax.f32 %v1298_v4, 0.0  ;;  %v1460_v12 = vmax.f32 %v1387_v5, 0.0  ;;  %v2764_v5 = vadd.s32 8, %v9664_v7 }
 0x1cc   : > { %v1299_v6 = vpop.f32.mrf.mxu2  ;;  %v1388_v8 = vpop.f32.mrf.mxu3 }
 0x1cd   : > { %v1300_v9 = vadd.f32 %v1299_v6, %v9466_v32  ;;  %v1389_v10 = vadd.f32 %v1388_v8, %v9474_v36  ;;  %v9673_v6 = vadd.s32 %v9668_v2, %v9664_v7 }
 0x1cf   : > { %v1461_v13 = vmax.f32 %v1300_v9, 0.0  ;;  %v1462_v14 = vmax.f32 %v1389_v10, 0.0  ;;  %v9676_v10 = vadd.s32 %v9668_v2, %v2764_v5  ;;  %vm2828_vm1 = vcmp.lt.s32.totalorder %v9673_v6, 600  ;;  %v8397_v5 = vld [vmem:[%s12790_s5 + $0xac] sm:$0xf] }
 0x1d1   : > { %v9611_v15 = vpack.c.bf16 %v1461_v13, %v1459_v11  ;;  %v9613_v16 = vpack.c.bf16 %v1462_v14, %v1460_v12  ;;  %2107 = vmatmul.bf16.vlgmr.msrb.gmra.mxu2 %v9481_v58  ;;  %2196 = vmatmul.bf16.vlgmr.msrb.gmra.mxu3 %v9483_v59  ;;  %vm12823_vm2 = vcmp.lt.s32.totalorder %v9676_v10, 600 }
 0x1d3   : > { %12903 = vst [vmem:[#allocation14_spill] sm:$0xff] %v9611_v15  ;;  %1964 = vmatmul.bf16.gmra.mxu0 %v9611_v15  ;;  %2053 = vmatmul.bf16.gmra.mxu1 %v9613_v16 }
 0x1d4   : > { %12904 = vst [vmem:[#allocation15_spill] sm:$0xff] %v9613_v16  ;;  %v1302_v19 = vpop.f32.mrf.mxu2  ;;  %v1391_v24 = vpop.f32.mrf.mxu3 }
 0x1d5   : > { %v1303_v37 = vadd.f32 %v1302_v19, %v9466_v32  ;;  %v1392_v38 = vadd.f32 %v1391_v24, %v9474_v36 }
 0x1d7   : > { %v1463_v45 = vmax.f32 %v1303_v37, 0.0  ;;  %v1464_v46 = vmax.f32 %v1392_v38, 0.0 }
 0x1dc   : > { %v1304_v39 = vpop.f32.mrf.mxu2  ;;  %v1393_v40 = vpop.f32.mrf.mxu3 }
 0x1dd   : > { %v1305_v41 = vadd.f32 %v1304_v39, %v9466_v32  ;;  %v1394_v42 = vadd.f32 %v1393_v40, %v9474_v36 }
 0x1df   : > { %v1465_v47 = vmax.f32 %v1305_v41, 0.0  ;;  %v1466_v48 = vmax.f32 %v1394_v42, 0.0  ;;  %v9691_v42 = vadd.s32 %v9668_v2, %v2765_v26 }
 0x1e0   : > { %v1930_v49 = vpop.f32.mrf.mxu0  ;;  %v2019_v50 = vpop.f32.mrf.mxu1 }
 0x1e1   : > { %v9655_v57 = vpack.c.bf16 %v1465_v47, %v1463_v45  ;;  %v9657_v60 = vpack.c.bf16 %v1466_v48, %v1464_v46  ;;  %v1931_v61 = vadd.f32 %v1930_v49, %v9647_v43  ;;  %2112 = vmatmul.bf16.gmra.mxu2 %v9493_v20  ;;  %2201 = vmatmul.bf16.gmra.mxu3 %v9495_v21  ;;  %vm12826_vm3 = vcmp.lt.s32.totalorder %v9691_v42, 600 }
 0x1e3   : > { %12905 = vst [vmem:[#allocation16_spill] sm:$0xff] %v9657_v60  ;;  %v2020_v63 = vadd.f32 %v2019_v50, %v1931_v61  ;;  %1969 = vmatmul.bf16.gmra.mxu0 %v9655_v57  ;;  %2058 = vmatmul.bf16.gmra.mxu1 %v9657_v60 }
 0x1e4   : > { %v1307_v3 = vpop.f32.mrf.mxu2  ;;  %v1396_v4 = vpop.f32.mrf.mxu3 }
 0x1e5   : > { %v2633_v12 = vmax.f32 %v2020_v63, 0.0  ;;  %v1308_v13 = vadd.f32 %v1307_v3, %v9466_v32  ;;  %v1397_v14 = vadd.f32 %v1396_v4, %v9474_v36  ;;  %v9707_v4 = vadd.s32 %v9668_v2, %v2766_v51 }
 0x1e7   : > { %v2924_v30 = vsel %vm2828_vm1, %v2633_v12, -inf  ;;  %v1467_v31 = vmax.f32 %v1308_v13, 0.0  ;;  %v1468_v34 = vmax.f32 %v1397_v14, 0.0  ;;  %v6792_v13 = vld [vmem:[%s12790_s5 + $0x1b8] sm:$0xf0]  ;;  %vm12827_vm4 = vcmp.lt.s32.totalorder %v9707_v4, 600 }
 0x1e8   : > { %v1932_v8 = vpop.f32.mrf.mxu0  ;;  %v2021_v9 = vpop.f32.mrf.mxu1  ;;  %v6662_v14 = vld [vmem:[%s12790_s5 + $0xa8] sm:$0xf] }
 0x1e9   : > { %v1933_v11 = vadd.f32 %v1932_v8, %v9647_v43  ;;  %v6664_v8 = vld [vmem:[%s12790_s5 + $0xb8] sm:$0xf0] }
 0x1ea   : > { %v6667_v12 = vor.u32 %v8397_v5, %v6664_v8 }
 0x1eb   : > { %v2022_v19 = vadd.f32 %v2021_v9, %v1933_v11  ;;  %v8429_v9 = vld [vmem:[%s12790_s5 + $0x1ac] sm:$0xf] }
 0x1ec   : > { %v1309_v24 = vpop.f32.mrf.mxu2  ;;  %v1398_v25 = vpop.f32.mrf.mxu3  ;;  %2457 = vmatpush.bf16.msra.mxu2 %v6667_v12  ;;  %v2768_v12 = vadd.s32 40, %v9664_v7 }
 0x1ed   : > { %v2637_v27 = vmax.f32 %v2022_v19, 0.0  ;;  %v1310_v28 = vadd.f32 %v1309_v24, %v9466_v32  ;;  %v1399_v29 = vadd.f32 %v1398_v25, %v9474_v36  ;;  %v8399_v19 = vld [vmem:[%s12790_s5 + $0xb4] sm:$0xf0]  ;;  %v6795_v25 = vor.u32 %v8429_v9, %v6792_v13 }
 0x1ee   : > { %v6663_v26 = vor.u32 %v8399_v19, %v6662_v14 }
 0x1ef   : > { %v2928_v35 = vsel %vm12823_vm2, %v2637_v27, -inf  ;;  %v1469_v37 = vmax.f32 %v1310_v28, 0.0  ;;  %v1470_v38 = vmax.f32 %v1399_v29, 0.0  ;;  %2546 = vmatpush.bf16.msra.mxu3 %v6795_v25 }
 0x1f0   : > { %v3053_v39 = vmax.f32 %v2924_v30, %v2928_v35  ;;  %v1935_v40 = vpop.f32.mrf.mxu0  ;;  %v2024_v41 = vpop.f32.mrf.mxu1  ;;  %2279 = vmatpush.bf16.msra.mxu0 %v6663_v26  ;;  %v9759_v26 = vadd.s32 %v9668_v2, %v2768_v12 }
 0x1f1   : > { %v9693_v45 = vpack.c.bf16 %v1469_v37, %v1467_v31  ;;  %v9695_v46 = vpack.c.bf16 %v1470_v38, %v1468_v34  ;;  %v1936_v47 = vadd.f32 %v1935_v40, %v9647_v43  ;;  %2117 = vmatmul.bf16.gmra.mxu2 %v9517_v53  ;;  %2206 = vmatmul.bf16.gmra.mxu3 %v9519_v54  ;;  %v2767_v31 = vadd.s32 32, %v9664_v7 }
 0x1f2   : > { %vm12835_vm6 = vcmp.lt.s32.totalorder %v9759_v26, 600 }
 0x1f3   : > { %12906 = vst [vmem:[#allocation17_spill] sm:$0xff] %v9695_v46  ;;  %v2025_v48 = vadd.f32 %v2024_v41, %v1936_v47  ;;  %1974 = vmatmul.bf16.gmra.mxu0 %v9693_v45  ;;  %2063 = vmatmul.bf16.gmra.mxu1 %v9695_v46  ;;  %v9737_v51 = vadd.s32 %v9668_v2, %v2767_v31 }
 0x1f4   : > { %v1312_v49 = vpop.f32.mrf.mxu2  ;;  %v1401_v50 = vpop.f32.mrf.mxu3 }
 0x1f5   : > { %v2641_v56 = vmax.f32 %v2025_v48, 0.0  ;;  %v1313_v24 = vadd.f32 %v1312_v49, %v9466_v32  ;;  %v1402_v27 = vadd.f32 %v1401_v50, %v9474_v36  ;;  %12907 = vst [vmem:[#allocation18_spill] sm:$0xff] %v9737_v51  ;;  %vm12834_vm5 = vcmp.lt.s32.totalorder %v9737_v51, 600 }
 0x1f7   : > { %v2932_v61 = vsel %vm12826_vm3, %v2641_v56, -inf  ;;  %v1471_v38 = vmax.f32 %v1313_v24, 0.0  ;;  %v6790_v56 = vld [vmem:[%s12790_s5 + $0x1a8] sm:$0xf] }
 0x1f8   : > { %v3054_v62 = vmax.f32 %v3053_v39, %v2932_v61  ;;  %v1937_v63 = vpop.f32.mrf.mxu0  ;;  %v2026_v3 = vpop.f32.mrf.mxu1  ;;  %v1472_v39 = vmax.f32 %v1402_v27, 0.0  ;;  %v8431_v61 = vld [vmem:[%s12790_s5 + $0x1b4] sm:$0xf0] }
 0x1f9   : > { %v1938_v11 = vadd.f32 %v1937_v63, %v9647_v43 }
 0x1fb   : > { %v2027_v28 = vadd.f32 %v2026_v3, %v1938_v11 }
 0x1fc   : > { %v1314_v29 = vpop.f32.mrf.mxu2  ;;  %v1403_v30 = vpop.f32.mrf.mxu3 }
 0x1fd   : > { %v2645_v34 = vmax.f32 %v2027_v28, 0.0  ;;  %v1315_v35 = vadd.f32 %v1314_v29, %v9466_v32  ;;  %v1404_v37 = vadd.f32 %v1403_v30, %v9474_v36 }
 0x1ff   : > { %v2936_v40 = vsel %vm12827_vm4, %v2645_v34, -inf  ;;  %v1473_v41 = vmax.f32 %v1315_v35, 0.0  ;;  %v1474_v47 = vmax.f32 %v1404_v37, 0.0  ;;  %v2769_v35 = vadd.s32 48, %v9664_v7 }
 0x200   : > { %v3055_v48 = vmax.f32 %v3054_v62, %v2936_v40  ;;  %v1940_v49 = vpop.f32.mrf.mxu0  ;;  %v2029_v50 = vpop.f32.mrf.mxu1  ;;  %v6791_v62 = vor.u32 %v8431_v61, %v6790_v56 }
 0x201   : > { %v9745_v63 = vpack.c.bf16 %v1473_v41, %v1471_v38  ;;  %v9747_v3 = vpack.c.bf16 %v1474_v47, %v1472_v39  ;;  %v1941_v5 = vadd.f32 %v1940_v49, %v9647_v43  ;;  %2122 = vmatmul.bf16.gmra.mxu2 %v9529_v17  ;;  %2211 = vmatmul.bf16.gmra.mxu3 %v9531_v18 }
 0x202   : > { %2368 = vmatpush.bf16.msra.mxu1 %v6791_v62 }
 0x203   : > { %12908 = vst [vmem:[#allocation19_spill] sm:$0xff] %v9745_v63  ;;  %v2030_v8 = vadd.f32 %v2029_v50, %v1941_v5  ;;  %1979 = vmatmul.bf16.gmra.mxu0 %v9745_v63  ;;  %2068 = vmatmul.bf16.gmra.mxu1 %v9747_v3  ;;  %v9771_v5 = vadd.s32 %v9668_v2, %v2769_v35 }
 0x204   : > { %12909 = vst [vmem:[#allocation20_spill] sm:$0xff] %v9747_v3  ;;  %v1317_v9 = vpop.f32.mrf.mxu2  ;;  %v1406_v11 = vpop.f32.mrf.mxu3 }
 0x205   : > { %v2649_v13 = vmax.f32 %v2030_v8, 0.0  ;;  %v1318_v28 = vadd.f32 %v1317_v9, %v9466_v32  ;;  %v1407_v29 = vadd.f32 %v1406_v11, %v9474_v36  ;;  %vm12838_vm7 = vcmp.lt.s32.totalorder %v9771_v5, 600 }
 0x207   : > { %v2940_v14 = vsel %vm12834_vm5, %v2649_v13, -inf  ;;  %v1475_v40 = vmax.f32 %v1318_v28, 0.0  ;;  %v1476_v41 = vmax.f32 %v1407_v29, 0.0 }
 0x208   : > { %v3056_v19 = vmax.f32 %v3055_v48, %v2940_v14  ;;  %v1942_v24 = vpop.f32.mrf.mxu0  ;;  %v2031_v25 = vpop.f32.mrf.mxu1  ;;  %v2770_v14 = vadd.s32 56, %v9664_v7 }
 0x209   : > { %v1943_v27 = vadd.f32 %v1942_v24, %v9647_v43 }
 0x20a   : > { %v9787_v29 = vadd.s32 %v9668_v2, %v2770_v14 }
 0x20b   : > { %v2032_v30 = vadd.f32 %v2031_v25, %v1943_v27 }
 0x20c   : > { %v1319_v31 = vpop.f32.mrf.mxu2  ;;  %v1408_v34 = vpop.f32.mrf.mxu3  ;;  %vm12839_vm8 = vcmp.lt.s32.totalorder %v9787_v29, 600 }
 0x20d   : > { %v2653_v37 = vmax.f32 %v2032_v30, 0.0  ;;  %v1320_v38 = vadd.f32 %v1319_v31, %v9466_v32  ;;  %v1409_v39 = vadd.f32 %v1408_v34, %v9474_v36  ;;  %v8393_v30 = vld [vmem:[%s12790_s5 + $0x8c] sm:$0xf]  ;;  %v6648_v31 = vld [vmem:[%s12790_s5 + $0x98] sm:$0xf0] }
 0x20e   : > { %v8425_v34 = vld [vmem:[%s12790_s5 + $0x18c] sm:$0xf] }
 0x20f   : > { %v2944_v47 = vsel %vm12835_vm6, %v2653_v37, -inf  ;;  %v1477_v48 = vmax.f32 %v1320_v38, 0.0  ;;  %v1478_v49 = vmax.f32 %v1409_v39, 0.0  ;;  %v6651_v37 = vor.u32 %v8393_v30, %v6648_v31  ;;  %v6776_v38 = vld [vmem:[%s12790_s5 + $0x198] sm:$0xf0] }
 0x210   : > { %v3057_v50 = vmax.f32 %v3056_v19, %v2944_v47  ;;  %v1945_v56 = vpop.f32.mrf.mxu0  ;;  %v2034_v61 = vpop.f32.mrf.mxu1  ;;  %v6646_v39 = vld [vmem:[%s12790_s5 + $0x88] sm:$0xf]  ;;  %v6779_v47 = vor.u32 %v8425_v34, %v6776_v38  ;;  %v8427_v38 = vld [vmem:[%s12790_s5 + $0x194] sm:$0xf0] }
 0x211   : > { %v9773_v62 = vpack.c.bf16 %v1477_v48, %v1475_v40  ;;  %v9775_v8 = vpack.c.bf16 %v1478_v49, %v1476_v41  ;;  %v1946_v9 = vadd.f32 %v1945_v56, %v9647_v43  ;;  %2127 = vmatmul.bf16.gmra.mxu2 %v9553_v52  ;;  %2216 = vmatmul.bf16.gmra.mxu3 %v9555_v55  ;;  %v8395_v40 = vld [vmem:[%s12790_s5 + $0x94] sm:$0xf0] }
 0x212   : > { %v6647_v48 = vor.u32 %v8395_v40, %v6646_v39  ;;  %2458 = vmatpush.bf16.msra.mxu2 %v6651_v37  ;;  %2547 = vmatpush.bf16.msra.mxu3 %v6779_v47  ;;  %v6774_v37 = vld [vmem:[%s12790_s5 + $0x188] sm:$0xf] }
 0x213   : > { %12910 = vst [vmem:[#allocation21_spill] sm:$0xff] %v9775_v8  ;;  %v2035_v11 = vadd.f32 %v2034_v61, %v1946_v9  ;;  %1984 = vmatmul.bf16.gmra.mxu0 %v9773_v62  ;;  %2073 = vmatmul.bf16.gmra.mxu1 %v9775_v8  ;;  %v2771_v9 = vadd.s32 64, %v9664_v7 }
 0x214   : > { %v1322_v12 = vpop.f32.mrf.mxu2  ;;  %v1411_v13 = vpop.f32.mrf.mxu3  ;;  %2280 = vmatpush.bf16.msra.mxu0 %v6647_v48 }
 0x215   : > { %v2657_v19 = vmax.f32 %v2035_v11, 0.0  ;;  %v1323_v41 = vadd.f32 %v1322_v12, %v9466_v32  ;;  %v1412_v49 = vadd.f32 %v1411_v13, %v9474_v36 }
 0x217   : > { %v2948_v24 = vsel %vm12838_vm7, %v2657_v19, -inf  ;;  %v1479_v12 = vmax.f32 %v1323_v41, 0.0 }
 0x218   : > { %v3058_v25 = vmax.f32 %v3057_v50, %v2948_v24  ;;  %v1947_v27 = vpop.f32.mrf.mxu0  ;;  %v2036_v28 = vpop.f32.mrf.mxu1  ;;  %v1480_v24 = vmax.f32 %v1412_v49, 0.0 }
 0x219   : > { %v1948_v35 = vadd.f32 %v1947_v27, %v9647_v43 }
 0x21b   : > { %v2037_v50 = vadd.f32 %v2036_v28, %v1948_v35  ;;  %v9817_v35 = vadd.s32 %v9668_v2, %v2771_v9 }
 0x21c   : > { %v1324_v56 = vpop.f32.mrf.mxu2  ;;  %v1413_v61 = vpop.f32.mrf.mxu3 }
 0x21d   : > { %v2661_v11 = vmax.f32 %v2037_v50, 0.0  ;;  %v1325_v14 = vadd.f32 %v1324_v56, %v9466_v32  ;;  %v1414_v19 = vadd.f32 %v1413_v61, %v9474_v36  ;;  %12911 = vst [vmem:[#allocation22_spill] sm:$0xff] %v9817_v35  ;;  %vm12846_vm9 = vcmp.lt.s32.totalorder %v9817_v35, 600 }
 0x21e   : > { %v2772_v50 = vadd.s32 72, %v9664_v7 }
 0x21f   : > { %v2952_v13 = vsel %vm12839_vm8, %v2661_v11, -inf  ;;  %v1481_v27 = vmax.f32 %v1325_v14, 0.0  ;;  %v1482_v28 = vmax.f32 %v1414_v19, 0.0 }
 0x220   : > { %v3059_v30 = vmax.f32 %v3058_v25, %v2952_v13  ;;  %v1950_v31 = vpop.f32.mrf.mxu0  ;;  %v2039_v34 = vpop.f32.mrf.mxu1  ;;  %v6775_v25 = vor.u32 %v8427_v38, %v6774_v37  ;;  %v9839_v19 = vadd.s32 %v9668_v2, %v2772_v50 }
 0x221   : > { %v9825_v39 = vpack.c.bf16 %v1481_v27, %v1479_v12  ;;  %v9827_v40 = vpack.c.bf16 %v1482_v28, %v1480_v24  ;;  %v1951_v41 = vadd.f32 %v1950_v31, %v9647_v43  ;;  %2132 = vmatmul.bf16.gmra.mxu2 %v9565_v22  ;;  %2221 = vmatmul.bf16.gmra.mxu3 %v9567_v23 }
 0x222   : > { %2369 = vmatpush.bf16.msra.mxu1 %v6775_v25  ;;  %vm12847_vm10 = vcmp.lt.s32.totalorder %v9839_v19, 600 }
 0x223   : > { %12912 = vst [vmem:[#allocation23_spill] sm:$0xff] %v9825_v39  ;;  %v2040_v47 = vadd.f32 %v2039_v34, %v1951_v41  ;;  %1989 = vmatmul.bf16.gmra.mxu0 %v9825_v39  ;;  %2078 = vmatmul.bf16.gmra.mxu1 %v9827_v40  ;;  %v2773_v34 = vadd.s32 80, %v9664_v7 }
 0x224   : > { %12913 = vst [vmem:[#allocation24_spill] sm:$0xff] %v9827_v40  ;;  %v1327_v48 = vpop.f32.mrf.mxu2  ;;  %v1416_v49 = vpop.f32.mrf.mxu3 }
 0x225   : > { %v2665_v56 = vmax.f32 %v2040_v47, 0.0  ;;  %v1328_v24 = vadd.f32 %v1327_v48, %v9466_v32  ;;  %v1417_v13 = vadd.f32 %v1416_v49, %v9474_v36 }
 0x227   : > { %v2956_v61 = vsel %vm12846_vm9, %v2665_v56, -inf  ;;  %v1483_v41 = vmax.f32 %v1328_v24, 0.0  ;;  %v1484_v25 = vmax.f32 %v1417_v13, 0.0  ;;  %v6630_v24 = vld [vmem:[%s12790_s5 + $0x68] sm:$0xf] }
 0x228   : > { %v3060_v9 = vmax.f32 %v3059_v30, %v2956_v61  ;;  %v1952_v11 = vpop.f32.mrf.mxu0  ;;  %v2041_v14 = vpop.f32.mrf.mxu1  ;;  %v6758_v13 = vld [vmem:[%s12790_s5 + $0x168] sm:$0xf] }
 0x229   : > { %v1953_v12 = vadd.f32 %v1952_v11, %v9647_v43  ;;  %v9851_v11 = vadd.s32 %v9668_v2, %v2773_v34 }
 0x22b   : > { %v2042_v27 = vadd.f32 %v2041_v14, %v1953_v12  ;;  %12914 = vst [vmem:[#allocation25_spill] sm:$0xff] %v9851_v11  ;;  %vm12850_vm11 = vcmp.lt.s32.totalorder %v9851_v11, 600 }
 0x22c   : > { %v1329_v28 = vpop.f32.mrf.mxu2  ;;  %v1418_v31 = vpop.f32.mrf.mxu3 }
 0x22d   : > { %v2669_v37 = vmax.f32 %v2042_v27, 0.0  ;;  %v1330_v30 = vadd.f32 %v1329_v28, %v9466_v32  ;;  %v1419_v38 = vadd.f32 %v1418_v31, %v9474_v36  ;;  %v8423_v31 = vld [vmem:[%s12790_s5 + $0x174] sm:$0xf0] }
 0x22f   : > { %v2960_v47 = vsel %vm12847_vm10, %v2669_v37, -inf  ;;  %v1485_v48 = vmax.f32 %v1330_v30, 0.0  ;;  %v1486_v50 = vmax.f32 %v1419_v38, 0.0  ;;  %v6759_v37 = vor.u32 %v8423_v31, %v6758_v13 }
 0x230   : > { %v3061_v49 = vmax.f32 %v3060_v9, %v2960_v47  ;;  %v1955_v56 = vpop.f32.mrf.mxu0  ;;  %v2044_v61 = vpop.f32.mrf.mxu1  ;;  %v8391_v9 = vld [vmem:[%s12790_s5 + $0x74] sm:$0xf0]  ;;  %v6614_v47 = vld [vmem:[%s12790_s5 + $0x48] sm:$0xf] }
 0x231   : > { %v9853_v14 = vpack.c.bf16 %v1485_v48, %v1483_v41  ;;  %v9855_v12 = vpack.c.bf16 %v1486_v50, %v1484_v25  ;;  %v1956_v27 = vadd.f32 %v1955_v56, %v9647_v43  ;;  %2137 = vmatmul.bf16.gmra.mxu2 %v9601_v0  ;;  %2226 = vmatmul.bf16.gmra.mxu3 %v9603_v1  ;;  %v2774_v41 = vadd.s32 88, %v9664_v7  ;;  %v8387_v48 = vld [vmem:[%s12790_s5 + $0x54] sm:$0xf0]  ;;  %v6742_v56 = vld [vmem:[%s12790_s5 + $0x148] sm:$0xf] }
 0x232   : > { %v6631_v28 = vor.u32 %v8391_v9, %v6630_v24  ;;  %2370 = vmatpush.bf16.msra.mxu1 %v6759_v37  ;;  %v6615_v50 = vor.u32 %v8387_v48, %v6614_v47  ;;  %v6632_v37 = vld [vmem:[%s12790_s5 + $0x78] sm:$0xf0]  ;;  %v6598_v48 = vld [vmem:[%s12790_s5 + $0x28] sm:$0xf] }
 0x233   : > { %12915 = vst [vmem:[#allocation26_spill] sm:$0xff] %v9855_v12  ;;  %v2045_v34 = vadd.f32 %v2044_v61, %v1956_v27  ;;  %1994 = vmatmul.bf16.gmra.mxu0 %v9853_v14  ;;  %2083 = vmatmul.bf16.gmra.mxu1 %v9855_v12  ;;  %v8419_v61 = vld [vmem:[%s12790_s5 + $0x154] sm:$0xf0]  ;;  %v9893_v31 = vadd.s32 %v9668_v2, %v2774_v41  ;;  %v6760_v41 = vld [vmem:[%s12790_s5 + $0x178] sm:$0xf0] }
 0x234   : > { %v1332_v30 = vpop.f32.mrf.mxu2  ;;  %v1421_v38 = vpop.f32.mrf.mxu3  ;;  %2281 = vmatpush.bf16.msra.mxu0 %v6631_v28  ;;  %v6743_v24 = vor.u32 %v8419_v61, %v6742_v56  ;;  %v8383_v56 = vld [vmem:[%s12790_s5 + $0x34] sm:$0xf0] }
 0x235   : > { %v2673_v25 = vmax.f32 %v2045_v34, 0.0  ;;  %12916 = vst [vmem:[#allocation27_spill] sm:$0xff] %v9893_v31  ;;  %v8389_v34 = vld [vmem:[%s12790_s5 + $0x6c] sm:$0xf]  ;;  %v1333_v61 = vadd.f32 %v1332_v30, %v9466_v32  ;;  %vm12857_vm12 = vcmp.lt.s32.totalorder %v9893_v31, 600  ;;  %v2775_v30 = vadd.s32 96, %v9664_v7 }
 0x236   : > { %v6635_v47 = vor.u32 %v8389_v34, %v6632_v37  ;;  %2371 = vmatpush.bf16.msra.mxu1 %v6743_v24  ;;  %v6726_v34 = vld [vmem:[%s12790_s5 + $0x128] sm:$0xf]  ;;  %v8415_v24 = vld [vmem:[%s12790_s5 + $0x134] sm:$0xf0] }
 0x237   : > { %v2964_v27 = vsel %vm12850_vm11, %v2673_v25, -inf  ;;  %v8421_v25 = vld [vmem:[%s12790_s5 + $0x16c] sm:$0xf]  ;;  %v6727_v44 = vor.u32 %v8415_v24, %v6726_v34 }
 0x238   : > { %v9890_v9 = vmax.f32 %v3061_v49, %v2964_v27  ;;  %v1957_v13 = vpop.f32.mrf.mxu0  ;;  %v2046_v28 = vpop.f32.mrf.mxu1  ;;  %2282 = vmatpush.bf16.msra.mxu0 %v6615_v50  ;;  %v1422_v50 = vadd.f32 %v1421_v38, %v9474_v36  ;;  %v6763_v27 = vor.u32 %v8421_v25, %v6760_v41  ;;  %2459 = vmatpush.bf16.msra.mxu2 %v6635_v47  ;;  %v1487_v47 = vmax.f32 %v1333_v61, 0.0 }
 0x239   : > { %v1958_v49 = vadd.f32 %v1957_v13, %v9647_v43  ;;  %v6599_v13 = vor.u32 %v8383_v56, %v6598_v48 }
 0x23a   : > { %2548 = vmatpush.bf16.msra.mxu3 %v6763_v27  ;;  %2372 = vmatpush.bf16.msra.mxu1 %v6727_v44  ;;  %v1488_v48 = vmax.f32 %v1422_v50, 0.0  ;;  %v6710_v27 = vld [vmem:[%s12790_s5 + $0x108] sm:$0xf]  ;;  %v9942_v50 = vadd.s32 %v9668_v2, %v2775_v30 }
 0x23b   : > { %v2047_v37 = vadd.f32 %v2046_v28, %v1958_v49  ;;  %v6582_v28 = vld [vmem:[%s12790_s5 + $0x8] sm:$0xf]  ;;  %v8379_v49 = vld [vmem:[%s12790_s5 + $0x14] sm:$0xf0] }
 0x23c   : > { %v1334_v1 = vpop.f32.mrf.mxu2  ;;  %v1423_v0 = vpop.f32.mrf.mxu3  ;;  %2283 = vmatpush.bf16.msra.mxu0 %v6599_v13  ;;  %v6583_v56 = vor.u32 %v8379_v49, %v6582_v28  ;;  %12917 = vst [vmem:[#allocation28_spill] sm:$0xff] %v9942_v50  ;;  %vm12860_vm13 = vcmp.lt.s32.totalorder %v9942_v50, 600 }
 0x23d   : > { %v2677_v38 = vmax.f32 %v2047_v37, 0.0  ;;  %v1335_v25 = vadd.f32 %v1334_v1, %v9466_v32  ;;  %v1424_v41 = vadd.f32 %v1423_v0, %v9474_v36  ;;  %v8411_v0 = vld [vmem:[%s12790_s5 + $0x114] sm:$0xf0] }
 0x23e   : > { %v6711_v34 = vor.u32 %v8411_v0, %v6710_v27 }
 0x23f   : > { %v2968_v1 = vsel %vm12857_vm12, %v2677_v38, -inf  ;;  %v1489_v44 = vmax.f32 %v1335_v25, 0.0  ;;  %v1490_v13 = vmax.f32 %v1424_v41, 0.0  ;;  %v2776_v25 = vadd.s32 104, %v9664_v7 }
 0x240   : > { %v3063_v24 = vmax.f32 %v9890_v9, %v2968_v1  ;;  %v1960_v37 = vpop.f32.mrf.mxu0  ;;  %v2049_v61 = vpop.f32.mrf.mxu1  ;;  %2284 = vmatpush.bf16.msra.mxu0 %v6583_v56  ;;  %2373 = vmatpush.bf16.msra.mxu1 %v6711_v34 }
 0x241   : > { %v9944_v28 = vpack.c.bf16 %v1489_v44, %v1487_v47  ;;  %v9946_v49 = vpack.c.bf16 %v1490_v13, %v1488_v48  ;;  %v1961_v23 = vadd.f32 %v1960_v37, %v9647_v43  ;;  %2142 = vmatmul.bf16.gmra.mxu2 %v9611_v15  ;;  %2231 = vmatmul.bf16.gmra.mxu3 %v9613_v16 }
 0x242   : > { %v9958_v0 = vadd.s32 %v9668_v2, %v2776_v25 }
 0x243   : > { %12918 = vst [vmem:[#allocation29_spill] sm:$0xff] %v9944_v28  ;;  %v2050_v38 = vadd.f32 %v2049_v61, %v1961_v23  ;;  %1999 = vmatmul.bf16.gmra.mxu0 %v9944_v28  ;;  %2088 = vmatmul.bf16.gmra.mxu1 %v9946_v49  ;;  %v2777_v61 = vadd.s32 112, %v9664_v7 }
 0x244   : > { %12919 = vst [vmem:[#allocation30_spill] sm:$0xff] %v9946_v49  ;;  %v1337_v9 = vpop.f32.mrf.mxu2  ;;  %v1426_v30 = vpop.f32.mrf.mxu3  ;;  %vm12867_vm14 = vcmp.lt.s32.totalorder %v9958_v0, 600 }
 0x245   : > { %v2681_v41 = vmax.f32 %v2050_v38, 0.0  ;;  %12920 = vst [vmem:[#allocation31_spill] sm:$0xff] %v9958_v0  ;;  %v1338_v1 = vadd.f32 %v1337_v9, %v9466_v32  ;;  %v1427_v44 = vadd.f32 %v1426_v30, %v9474_v36  ;;  %v9970_v15 = vadd.s32 %v9668_v2, %v2777_v61 }
 0x247   : > { %v2972_v47 = vsel %vm12860_vm13, %v2681_v41, -inf  ;;  %v1491_v25 = vmax.f32 %v1338_v1, 0.0  ;;  %vm12868_vm15 = vcmp.lt.s32.totalorder %v9970_v15, 600 }
 0x248   : > { %v3064_v48 = vmax.f32 %v3063_v24, %v2972_v47  ;;  %v1962_v56 = vpop.f32.mrf.mxu0  ;;  %v2051_v27 = vpop.f32.mrf.mxu1  ;;  %v1492_v47 = vmax.f32 %v1427_v44, 0.0 }
 0x249   : > { %v1963_v23 = vadd.f32 %v1962_v56, %v9647_v43 }
 0x24b   : > { %v2052_v13 = vadd.f32 %v2051_v27, %v1963_v23 }
 0x24c   : > { %v1339_v34 = vpop.f32.mrf.mxu2  ;;  %v1428_v37 = vpop.f32.mrf.mxu3 }
 0x24d   : > { %v2685_v38 = vmax.f32 %v2052_v13, 0.0  ;;  %v1340_v24 = vadd.f32 %v1339_v34, %v9466_v32  ;;  %v1429_v41 = vadd.f32 %v1428_v37, %v9474_v36  ;;  %v9980_v36 = vperm.slane %v9640_v33, 1 }
 0x24f   : > { %v2976_v56 = vsel %vm12867_vm14, %v2685_v38, -inf  ;;  %v1493_v9 = vmax.f32 %v1340_v24, 0.0  ;;  %v1494_v16 = vmax.f32 %v1429_v41, 0.0 }
 0x250   : > { %v3065_v30 = vmax.f32 %v3064_v48, %v2976_v56  ;;  %v1965_v27 = vpop.f32.mrf.mxu0  ;;  %v2054_v23 = vpop.f32.mrf.mxu1  ;;  %v6616_v56 = vld [vmem:[%s12790_s5 + $0x58] sm:$0xf0] }
 0x251   : > { %v9972_v50 = vpack.c.bf16 %v1493_v9, %v1491_v25  ;;  %v9974_v13 = vpack.c.bf16 %v1494_v16, %v1492_v47  ;;  %v1966_v32 = vadd.f32 %v1965_v27, %v9647_v43  ;;  %2147 = vmatmul.bf16.gmra.mxu2 %v9655_v57  ;;  %2236 = vmatmul.bf16.gmra.mxu3 %v9657_v60  ;;  %v2778_v16 = vadd.s32 120, %v9664_v7  ;;  %v8385_v47 = vld [vmem:[%s12790_s5 + $0x4c] sm:$0xf] }
 0x252   : > { %v8417_v9 = vld [vmem:[%s12790_s5 + $0x14c] sm:$0xf] }
 0x253   : > { %12921 = vst [vmem:[#allocation32_spill] sm:$0xff] %v9972_v50  ;;  %v2055_v1 = vadd.f32 %v2054_v23, %v1966_v32  ;;  %2004 = vmatmul.bf16.gmra.mxu0 %v9972_v50  ;;  %2093 = vmatmul.bf16.gmra.mxu1 %v9974_v13  ;;  %v9990_v25 = vadd.s32 %v9668_v2, %v2778_v16  ;;  %v6744_v23 = vld [vmem:[%s12790_s5 + $0x158] sm:$0xf0]  ;;  %v2779_v16 = vadd.s32 128, %v9664_v7 }
 0x254   : > { %12922 = vst [vmem:[#allocation33_spill] sm:$0xff] %v9974_v13  ;;  %v2108_v48 = vpop.f32.mrf.mxu2  ;;  %v2197_v44 = vpop.f32.mrf.mxu3  ;;  %v6747_v32 = vor.u32 %v8417_v9, %v6744_v23 }
 0x255   : > { %v2689_v34 = vmax.f32 %v2055_v1, 0.0  ;;  %v2109_v37 = vadd.f32 %v2108_v48, %v9980_v36  ;;  %12923 = vst [vmem:[#allocation34_spill] sm:$0xff] %v9990_v25  ;;  %vm12822_vm0 = vcmp.lt.s32.totalorder %v9990_v25, 600 }
 0x256   : > { %2549 = vmatpush.bf16.msra.mxu3 %v6747_v32 }
 0x257   : > { %v2980_v61 = vsel %vm12868_vm15, %v2689_v34, -inf  ;;  %v2198_v38 = vadd.f32 %v2197_v44, %v2109_v37 }
 0x258   : > { %v3066_v33 = vmax.f32 %v3065_v30, %v2980_v61  ;;  %v1967_v24 = vpop.f32.mrf.mxu0  ;;  %v2056_v41 = vpop.f32.mrf.mxu1  ;;  %v6619_v30 = vor.u32 %v8385_v47, %v6616_v56 }
 0x259   : > { %v1968_v27 = vadd.f32 %v1967_v24, %v9647_v43  ;;  %v2634_v61 = vmax.f32 %v2198_v38, 0.0 }
 0x25a   : > { %2460 = vmatpush.bf16.msra.mxu2 %v6619_v30 }
 0x25b   : > { %v2057_v1 = vadd.f32 %v2056_v41, %v1968_v27  ;;  %v10011_v41 = vadd.s32 %v9668_v2, %v2779_v16  ;;  %v2925_v38 = vsel %vm2828_vm1, %v2634_v61, -inf }
 0x25c   : > { %v2110_v48 = vpop.f32.mrf.mxu2  ;;  %v2199_v44 = vpop.f32.mrf.mxu3 }
 0x25d   : > { %v2693_v34 = vmax.f32 %v2057_v1, 0.0  ;;  %v2111_v37 = vadd.f32 %v2110_v48, %v9980_v36  ;;  %v2780_v48 = vadd.s32 136, %v9664_v7 }
 0x25f   : > { %v2984_v24 = vsel %vm12822_vm0, %v2693_v34, -inf  ;;  %v2200_v47 = vadd.f32 %v2199_v44, %v2111_v37  ;;  %vm2844_vm0 = vcmp.lt.s32.totalorder %v10011_v41, 600 }
 0x260   : > { %v3067_v56 = vmax.f32 %v3066_v33, %v2984_v24  ;;  %v1970_v60 = vpop.f32.mrf.mxu0  ;;  %v2059_v9 = vpop.f32.mrf.mxu1 }
 0x261   : > { %v2638_v27 = vmax.f32 %v2200_v47, 0.0  ;;  %v1971_v30 = vadd.f32 %v1970_v60, %v9647_v43  ;;  %2152 = vmatmul.bf16.gmra.mxu2 %v9693_v45  ;;  %2241 = vmatmul.bf16.gmra.mxu3 %v9695_v46 }
 0x263   : > { %v2929_v23 = vsel %vm12823_vm2, %v2638_v27, -inf  ;;  %v2060_v32 = vadd.f32 %v2059_v9, %v1971_v30  ;;  %2285 = vmatmul.bf16.vlgmr.msra.gmra.mxu0 %v9481_v58  ;;  %2374 = vmatmul.bf16.vlgmr.msra.gmra.mxu1 %v9483_v59  ;;  %v10028_v9 = vadd.s32 %v9668_v2, %v2780_v48 }
 0x264   : > { %v3090_v33 = vmax.f32 %v2925_v38, %v2929_v23  ;;  %v2113_v1 = vpop.f32.mrf.mxu2  ;;  %v2202_v60 = vpop.f32.mrf.mxu3 }
 0x265   : > { %v2697_v44 = vmax.f32 %v2060_v32, 0.0  ;;  %v2114_v16 = vadd.f32 %v2113_v1, %v9980_v36  ;;  %12924 = vst [vmem:[#allocation35_spill] sm:$0xff] %v10028_v9  ;;  %vm12874_vm2 = vcmp.lt.s32.totalorder %v10028_v9, 600 }
 0x267   : > { %v2988_v34 = vsel %vm2844_vm0, %v2697_v44, -inf  ;;  %v2203_v37 = vadd.f32 %v2202_v60, %v2114_v16  ;;  %v2781_v60 = vadd.s32 144, %v9664_v7 }
 0x268   : > { %v3068_v61 = vmax.f32 %v3067_v56, %v2988_v34  ;;  %v1972_v24 = vpop.f32.mrf.mxu0  ;;  %v2061_v47 = vpop.f32.mrf.mxu1 }
 0x269   : > { %v2642_v27 = vmax.f32 %v2203_v37, 0.0  ;;  %v1973_v30 = vadd.f32 %v1972_v24, %v9647_v43 }
 0x26b   : > { %v2933_v38 = vsel %vm12826_vm3, %v2642_v27, -inf  ;;  %v2062_v23 = vadd.f32 %v2061_v47, %v1973_v30  ;;  %v10039_v27 = vadd.s32 %v9668_v2, %v2781_v60 }
 0x26c   : > { %v3091_v32 = vmax.f32 %v3090_v33, %v2933_v38  ;;  %v2115_v1 = vpop.f32.mrf.mxu2  ;;  %v2204_v46 = vpop.f32.mrf.mxu3 }
 0x26d   : > { %v2701_v56 = vmax.f32 %v2062_v23, 0.0  ;;  %v2116_v44 = vadd.f32 %v2115_v1, %v9980_v36  ;;  %vm2846_vm3 = vcmp.lt.s32.totalorder %v10039_v27, 600  ;;  %v2782_v1 = vadd.s32 152, %v9664_v7 }
 0x26f   : > { %v2992_v48 = vsel %vm12874_vm2, %v2701_v56, -inf  ;;  %v2205_v16 = vadd.f32 %v2204_v46, %v2116_v44 }
 0x270   : > { %v3069_v34 = vmax.f32 %v3068_v61, %v2992_v48  ;;  %v1975_v37 = vpop.f32.mrf.mxu0  ;;  %v2064_v24 = vpop.f32.mrf.mxu1 }
 0x271   : > { %v2646_v33 = vmax.f32 %v2205_v16, 0.0  ;;  %v1976_v47 = vadd.f32 %v1975_v37, %v9647_v43  ;;  %2157 = vmatmul.bf16.gmra.mxu2 %v9745_v63  ;;  %2246 = vmatmul.bf16.gmra.mxu3 %v9747_v3 }
 0x273   : > { %v2937_v30 = vsel %vm12827_vm4, %v2646_v33, -inf  ;;  %v2065_v38 = vadd.f32 %v2064_v24, %v1976_v47  ;;  %2290 = vmatmul.bf16.gmra.mxu0 %v9493_v20  ;;  %2379 = vmatmul.bf16.gmra.mxu1 %v9495_v21  ;;  %v10054_v33 = vadd.s32 %v9668_v2, %v2782_v1  ;;  %v6600_v47 = vld [vmem:[%s12790_s5 + $0x38] sm:$0xf0] }
 0x274   : > { %v3092_v46 = vmax.f32 %v3091_v32, %v2937_v30  ;;  %v2118_v61 = vpop.f32.mrf.mxu2  ;;  %v2207_v23 = vpop.f32.mrf.mxu3  ;;  %v8381_v32 = vld [vmem:[%s12790_s5 + $0x2c] sm:$0xf] }
 0x275   : > { %v2705_v60 = vmax.f32 %v2065_v38, 0.0  ;;  %v2119_v56 = vadd.f32 %v2118_v61, %v9980_v36  ;;  %v8413_v30 = vld [vmem:[%s12790_s5 + $0x12c] sm:$0xf]  ;;  %v6603_v61 = vor.u32 %v8381_v32, %v6600_v47  ;;  %vm12875_vm4 = vcmp.lt.s32.totalorder %v10054_v33, 600 }
 0x277   : > { %v2996_v44 = vsel %vm2846_vm3, %v2705_v60, -inf  ;;  %v2208_v48 = vadd.f32 %v2207_v23, %v2119_v56  ;;  %v6728_v23 = vld [vmem:[%s12790_s5 + $0x138] sm:$0xf0]  ;;  %2461 = vmatpush.bf16.msra.mxu2 %v6603_v61 }
 0x278   : > { %v3070_v16 = vmax.f32 %v3069_v34, %v2996_v44  ;;  %v1977_v37 = vpop.f32.mrf.mxu0  ;;  %v2066_v24 = vpop.f32.mrf.mxu1  ;;  %v6731_v1 = vor.u32 %v8413_v30, %v6728_v23 }
 0x279   : > { %v2650_v38 = vmax.f32 %v2208_v48, 0.0  ;;  %v1978_v34 = vadd.f32 %v1977_v37, %v9647_v43  ;;  %v2783_v48 = vadd.s32 160, %v9664_v7 }
 0x27a   : > { %2550 = vmatpush.bf16.msra.mxu3 %v6731_v1 }
 0x27b   : > { %v2941_v60 = vsel %vm12834_vm5, %v2650_v38, -inf  ;;  %v2067_v56 = vadd.f32 %v2066_v24, %v1978_v34  ;;  %v10077_v24 = vadd.s32 %v9668_v2, %v2783_v48 }
 0x27c   : > { %v3093_v44 = vmax.f32 %v3092_v46, %v2941_v60  ;;  %v2120_v3 = vpop.f32.mrf.mxu2  ;;  %v2209_v63 = vpop.f32.mrf.mxu3  ;;  %v2784_v60 = vadd.s32 168, %v9664_v7 }
 0x27d   : > { %v2709_v37 = vmax.f32 %v2067_v56, 0.0  ;;  %v2121_v32 = vadd.f32 %v2120_v3, %v9980_v36  ;;  %vm2848_vm5 = vcmp.lt.s32.totalorder %v10077_v24, 600 }
 0x27f   : > { %v3000_v47 = vsel %vm12875_vm4, %v2709_v37, -inf  ;;  %v2210_v30 = vadd.f32 %v2209_v63, %v2121_v32 }
 0x280   : > { %v3071_v23 = vmax.f32 %v3070_v16, %v3000_v47  ;;  %v1980_v51 = vpop.f32.mrf.mxu0  ;;  %v2069_v38 = vpop.f32.mrf.mxu1 }
 0x281   : > { %v2654_v46 = vmax.f32 %v2210_v30, 0.0  ;;  %v1981_v34 = vadd.f32 %v1980_v51, %v9647_v43  ;;  %2162 = vmatmul.bf16.gmra.mxu2 %v9773_v62  ;;  %2251 = vmatmul.bf16.gmra.mxu3 %v9775_v8 }
 0x283   : > { %v2945_v3 = vsel %vm12835_vm6, %v2654_v46, -inf  ;;  %v2070_v61 = vadd.f32 %v2069_v38, %v1981_v34  ;;  %2295 = vmatmul.bf16.gmra.mxu0 %v9517_v53  ;;  %2384 = vmatmul.bf16.gmra.mxu1 %v9519_v54  ;;  %v10092_v38 = vadd.s32 %v9668_v2, %v2784_v60 }
 0x284   : > { %v3094_v63 = vmax.f32 %v3093_v44, %v2945_v3  ;;  %v2123_v16 = vpop.f32.mrf.mxu2  ;;  %v2212_v1 = vpop.f32.mrf.mxu3 }
 0x285   : > { %v2713_v51 = vmax.f32 %v2070_v61, 0.0  ;;  %v2124_v56 = vadd.f32 %v2123_v16, %v9980_v36  ;;  %vm2849_vm6 = vcmp.lt.s32.totalorder %v10092_v38, 600 }
 0x287   : > { %v3004_v48 = vsel %vm2848_vm5, %v2713_v51, -inf  ;;  %v2213_v37 = vadd.f32 %v2212_v1, %v2124_v56  ;;  %v2785_v1 = vadd.s32 176, %v9664_v7 }
 0x288   : > { %v3072_v32 = vmax.f32 %v3071_v23, %v3004_v48  ;;  %v1982_v47 = vpop.f32.mrf.mxu0  ;;  %v2071_v30 = vpop.f32.mrf.mxu1 }
 0x289   : > { %v2658_v44 = vmax.f32 %v2213_v37, 0.0  ;;  %v1983_v46 = vadd.f32 %v1982_v47, %v9647_v43 }
 0x28b   : > { %v2949_v34 = vsel %vm12838_vm7, %v2658_v44, -inf  ;;  %v2072_v3 = vadd.f32 %v2071_v30, %v1983_v46  ;;  %v10103_v44 = vadd.s32 %v9668_v2, %v2785_v1 }
 0x28c   : > { %v3095_v61 = vmax.f32 %v3094_v63, %v2949_v34  ;;  %v2125_v16 = vpop.f32.mrf.mxu2  ;;  %v2214_v8 = vpop.f32.mrf.mxu3 }
 0x28d   : > { %v2717_v23 = vmax.f32 %v2072_v3, 0.0  ;;  %v2126_v51 = vadd.f32 %v2125_v16, %v9980_v36  ;;  %vm2850_vm7 = vcmp.lt.s32.totalorder %v10103_v44, 600  ;;  %v2786_v16 = vadd.s32 184, %v9664_v7 }
 0x28f   : > { %v3008_v60 = vsel %vm2849_vm6, %v2717_v23, -inf  ;;  %v2215_v56 = vadd.f32 %v2214_v8, %v2126_v51 }
 0x290   : > { %v3073_v48 = vmax.f32 %v3072_v32, %v3008_v60  ;;  %v1985_v37 = vpop.f32.mrf.mxu0  ;;  %v2074_v47 = vpop.f32.mrf.mxu1 }
 0x291   : > { %v2662_v63 = vmax.f32 %v2215_v56, 0.0  ;;  %v1986_v30 = vadd.f32 %v1985_v37, %v9647_v43  ;;  %2167 = vmatmul.bf16.gmra.mxu2 %v9825_v39  ;;  %2256 = vmatmul.bf16.gmra.mxu3 %v9827_v40 }
 0x293   : > { %v2953_v46 = vsel %vm12839_vm8, %v2662_v63, -inf  ;;  %v2075_v34 = vadd.f32 %v2074_v47, %v1986_v30  ;;  %2300 = vmatmul.bf16.gmra.mxu0 %v9529_v17  ;;  %2389 = vmatmul.bf16.gmra.mxu1 %v9531_v18  ;;  %v10118_v63 = vadd.s32 %v9668_v2, %v2786_v16  ;;  %v6584_v30 = vld [vmem:[%s12790_s5 + $0x18] sm:$0xf0] }
 0x294   : > { %v3096_v8 = vmax.f32 %v3095_v61, %v2953_v46  ;;  %v2128_v32 = vpop.f32.mrf.mxu2  ;;  %v2217_v3 = vpop.f32.mrf.mxu3  ;;  %v8377_v61 = vld [vmem:[%s12790_s5 + $0xc] sm:$0xf] }
 0x295   : > { %v2721_v1 = vmax.f32 %v2075_v34, 0.0  ;;  %v2129_v23 = vadd.f32 %v2128_v32, %v9980_v36  ;;  %v8409_v46 = vld [vmem:[%s12790_s5 + $0x10c] sm:$0xf]  ;;  %v6587_v32 = vor.u32 %v8377_v61, %v6584_v30  ;;  %vm2851_vm8 = vcmp.lt.s32.totalorder %v10118_v63, 600 }
 0x297   : > { %v3012_v51 = vsel %vm2850_vm7, %v2721_v1, -inf  ;;  %v2218_v60 = vadd.f32 %v2217_v3, %v2129_v23  ;;  %v6712_v3 = vld [vmem:[%s12790_s5 + $0x118] sm:$0xf0]  ;;  %2462 = vmatpush.bf16.msra.mxu2 %v6587_v32 }
 0x298   : > { %v3074_v56 = vmax.f32 %v3073_v48, %v3012_v51  ;;  %v1987_v37 = vpop.f32.mrf.mxu0  ;;  %v2076_v47 = vpop.f32.mrf.mxu1  ;;  %v6715_v16 = vor.u32 %v8409_v46, %v6712_v3 }
 0x299   : > { %v2666_v34 = vmax.f32 %v2218_v60, 0.0  ;;  %v1988_v48 = vadd.f32 %v1987_v37, %v9647_v43  ;;  %v2787_v60 = vadd.s32 192, %v9664_v7 }
 0x29a   : > { %2551 = vmatpush.bf16.msra.mxu3 %v6715_v16 }
 0x29b   : > { %v2957_v1 = vsel %vm12846_vm9, %v2666_v34, -inf  ;;  %v2077_v23 = vadd.f32 %v2076_v47, %v1988_v48  ;;  %v10141_v47 = vadd.s32 %v9668_v2, %v2787_v60 }
 0x29c   : > { %v3097_v51 = vmax.f32 %v3096_v8, %v2957_v1  ;;  %v2130_v40 = vpop.f32.mrf.mxu2  ;;  %v2219_v39 = vpop.f32.mrf.mxu3  ;;  %v2788_v1 = vadd.s32 200, %v9664_v7 }
 0x29d   : > { %v2725_v37 = vmax.f32 %v2077_v23, 0.0  ;;  %v2131_v61 = vadd.f32 %v2130_v40, %v9980_v36  ;;  %12925 = vst [vmem:[#allocation36_spill] sm:$0xff] %v10141_v47  ;;  %vm2852_vm9 = vcmp.lt.s32.totalorder %v10141_v47, 600 }
 0x29f   : > { %v3016_v30 = vsel %vm2851_vm8, %v2725_v37, -inf  ;;  %v2220_v46 = vadd.f32 %v2219_v39, %v2131_v61 }
 0x2a0   : > { %v3075_v3 = vmax.f32 %v3074_v56, %v3016_v30  ;;  %v1990_v35 = vpop.f32.mrf.mxu0  ;;  %v2079_v34 = vpop.f32.mrf.mxu1 }
 0x2a1   : > { %v2670_v8 = vmax.f32 %v2220_v46, 0.0  ;;  %v1991_v48 = vadd.f32 %v1990_v35, %v9647_v43  ;;  %2172 = vmatmul.bf16.gmra.mxu2 %v9853_v14  ;;  %2261 = vmatmul.bf16.gmra.mxu3 %v9855_v12 }
 0x2a3   : > { %v2961_v40 = vsel %vm12847_vm10, %v2670_v8, -inf  ;;  %v2080_v32 = vadd.f32 %v2079_v34, %v1991_v48  ;;  %2305 = vmatmul.bf16.gmra.mxu0 %v9553_v52  ;;  %2394 = vmatmul.bf16.gmra.mxu1 %v9555_v55  ;;  %v10156_v34 = vadd.s32 %v9668_v2, %v2788_v1 }
 0x2a4   : > { %v3098_v39 = vmax.f32 %v3097_v51, %v2961_v40  ;;  %v2133_v56 = vpop.f32.mrf.mxu2  ;;  %v2222_v16 = vpop.f32.mrf.mxu3 }
 0x2a5   : > { %v2729_v35 = vmax.f32 %v2080_v32, 0.0  ;;  %v2134_v23 = vadd.f32 %v2133_v56, %v9980_v36  ;;  %12926 = vst [vmem:[#allocation37_spill] sm:$0xff] %v10156_v34  ;;  %vm2853_vm10 = vcmp.lt.s32.totalorder %v10156_v34, 600 }
 0x2a7   : > { %v3020_v60 = vsel %vm2852_vm9, %v2729_v35, -inf  ;;  %v2223_v37 = vadd.f32 %v2222_v16, %v2134_v23  ;;  %v2789_v16 = vadd.s32 208, %v9664_v7 }
 0x2a8   : > { %v3076_v61 = vmax.f32 %v3075_v3, %v3020_v60  ;;  %v1992_v30 = vpop.f32.mrf.mxu0  ;;  %v2081_v46 = vpop.f32.mrf.mxu1 }
 0x2a9   : > { %v2674_v51 = vmax.f32 %v2223_v37, 0.0  ;;  %v1993_v8 = vadd.f32 %v1992_v30, %v9647_v43 }
 0x2ab   : > { %v2965_v48 = vsel %vm12850_vm11, %v2674_v51, -inf  ;;  %v2082_v40 = vadd.f32 %v2081_v46, %v1993_v8  ;;  %v10167_v51 = vadd.s32 %v9668_v2, %v2789_v16  ;;  %v2790_v16 = vadd.s32 216, %v9664_v7 }
 0x2ac   : > { %v3099_v32 = vmax.f32 %v3098_v39, %v2965_v48  ;;  %v2135_v56 = vpop.f32.mrf.mxu2  ;;  %v2224_v12 = vpop.f32.mrf.mxu3 }
 0x2ad   : > { %v2733_v3 = vmax.f32 %v2082_v40, 0.0  ;;  %v2136_v35 = vadd.f32 %v2135_v56, %v9980_v36  ;;  %12927 = vst [vmem:[#allocation38_spill] sm:$0xff] %v10167_v51  ;;  %vm2854_vm11 = vcmp.lt.s32.totalorder %v10167_v51, 600 }
 0x2af   : > { %v3024_v1 = vsel %vm2853_vm10, %v2733_v3, -inf  ;;  %v2225_v23 = vadd.f32 %v2224_v12, %v2136_v35  ;;  %v12928_v12 = vld [vmem:[#allocation11_spill] sm:$0xff] }
 0x2b0   : > { %v3077_v60 = vmax.f32 %v3076_v61, %v3024_v1  ;;  %v1995_v37 = vpop.f32.mrf.mxu0  ;;  %v2084_v30 = vpop.f32.mrf.mxu1 }
 0x2b1   : > { %v2678_v39 = vmax.f32 %v2225_v23, 0.0  ;;  %v1996_v46 = vadd.f32 %v1995_v37, %v9647_v43  ;;  %2177 = vmatmul.bf16.gmra.mxu2 %v9944_v28  ;;  %2266 = vmatmul.bf16.gmra.mxu3 %v9946_v49 }
 0x2b3   : > { %v2969_v8 = vsel %vm12857_vm12, %v2678_v39, -inf  ;;  %v2085_v48 = vadd.f32 %v2084_v30, %v1996_v46  ;;  %2310 = vmatmul.bf16.gmra.mxu0 %v9565_v22  ;;  %2399 = vmatmul.bf16.gmra.mxu1 %v12928_v12  ;;  %v10182_v46 = vadd.s32 %v9668_v2, %v2790_v16 }
 0x2b4   : > { %v3100_v61 = vmax.f32 %v3099_v32, %v2969_v8  ;;  %v2138_v40 = vpop.f32.mrf.mxu2  ;;  %v2227_v56 = vpop.f32.mrf.mxu3 }
 0x2b5   : > { %v2737_v3 = vmax.f32 %v2085_v48, 0.0  ;;  %v2139_v35 = vadd.f32 %v2138_v40, %v9980_v36  ;;  %12929 = vst [vmem:[#allocation11_spill] sm:$0xff] %v10182_v46  ;;  %vm2855_vm12 = vcmp.lt.s32.totalorder %v10182_v46, 600  ;;  %v12961_v46 = vld [vmem:[#allocation27_spill] sm:$0xff] }
 0x2b7   : > { %v3028_v1 = vsel %vm2854_vm11, %v2737_v3, -inf  ;;  %v2228_v23 = vadd.f32 %v2227_v56, %v2139_v35  ;;  %v2791_v56 = vadd.s32 224, %v9664_v7 }
 0x2b8   : > { %v3078_v37 = vmax.f32 %v3077_v60, %v3028_v1  ;;  %v1997_v30 = vpop.f32.mrf.mxu0  ;;  %v2086_v39 = vpop.f32.mrf.mxu1 }
 0x2b9   : > { %v2682_v32 = vmax.f32 %v2228_v23, 0.0  ;;  %v1998_v8 = vadd.f32 %v1997_v30, %v9647_v43 }
 0x2bb   : > { %v2973_v28 = vsel %vm12860_vm13, %v2682_v32, -inf  ;;  %v2087_v31 = vadd.f32 %v2086_v39, %v1998_v8  ;;  %v10193_v32 = vadd.s32 %v9668_v2, %v2791_v56  ;;  %v12932_v8 = vld [vmem:[#allocation12_spill] sm:$0xff] }
 0x2bc   : > { %v3101_v48 = vmax.f32 %v3100_v61, %v2973_v28  ;;  %v2140_v40 = vpop.f32.mrf.mxu2  ;;  %v2229_v11 = vpop.f32.mrf.mxu3 }
 0x2bd   : > { %v2741_v60 = vmax.f32 %v2087_v31, 0.0  ;;  %v2141_v3 = vadd.f32 %v2140_v40, %v9980_v36  ;;  %12931 = vst [vmem:[#allocation39_spill] sm:$0xff] %v10193_v32  ;;  %vm2856_vm13 = vcmp.lt.s32.totalorder %v10193_v32, 600 }
 0x2bf   : > { %v3032_v16 = vsel %vm2855_vm12, %v2741_v60, -inf  ;;  %v2230_v35 = vadd.f32 %v2229_v11, %v2141_v3  ;;  %v12933_v11 = vld [vmem:[#allocation13_spill] sm:$0xff]  ;;  %v2792_v60 = vadd.s32 232, %v9664_v7 }
 0x2c0   : > { %v3079_v1 = vmax.f32 %v3078_v37, %v3032_v16  ;;  %v2000_v23 = vpop.f32.mrf.mxu0  ;;  %v2089_v30 = vpop.f32.mrf.mxu1 }
 0x2c1   : > { %v2686_v28 = vmax.f32 %v2230_v35, 0.0  ;;  %v2001_v61 = vadd.f32 %v2000_v23, %v9647_v43  ;;  %2182 = vmatmul.bf16.gmra.mxu2 %v9972_v50  ;;  %2271 = vmatmul.bf16.gmra.mxu3 %v9974_v13  ;;  %v10208_v13 = vadd.s32 %v9668_v2, %v2792_v60 }
 0x2c3   : > { %v2977_v31 = vsel %vm12867_vm14, %v2686_v28, -inf  ;;  %v2090_v39 = vadd.f32 %v2089_v30, %v2001_v61  ;;  %2315 = vmatmul.bf16.gmra.mxu0 %v12932_v8  ;;  %2404 = vmatmul.bf16.gmra.mxu1 %v12933_v11  ;;  %12934 = vst [vmem:[#allocation12_spill] sm:$0xff] %v10208_v13  ;;  %vm12869_vm14 = vcmp.lt.s32.totalorder %v10208_v13, 600 }
 0x2c4   : > { %v3102_v37 = vmax.f32 %v3101_v48, %v2977_v31  ;;  %v2143_v40 = vpop.f32.mrf.mxu2  ;;  %v2232_v56 = vpop.f32.mrf.mxu3 }
 0x2c5   : > { %v2745_v3 = vmax.f32 %v2090_v39, 0.0  ;;  %v2144_v16 = vadd.f32 %v2143_v40, %v9980_v36 }
 0x2c7   : > { %v3036_v35 = vsel %vm2856_vm13, %v2745_v3, -inf  ;;  %v2233_v23 = vadd.f32 %v2232_v56, %v2144_v16  ;;  %v2793_v56 = vadd.s32 240, %v9664_v7 }
 0x2c8   : > { %v3080_v28 = vmax.f32 %v3079_v1, %v3036_v35  ;;  %v2002_v30 = vpop.f32.mrf.mxu0  ;;  %v2091_v61 = vpop.f32.mrf.mxu1 }
 0x2c9   : > { %v2690_v48 = vmax.f32 %v2233_v23, 0.0  ;;  %v2003_v31 = vadd.f32 %v2002_v30, %v9647_v43 }
 0x2cb   : > { %v2981_v50 = vsel %vm12868_vm15, %v2690_v48, -inf  ;;  %v2092_v0 = vadd.f32 %v2091_v61, %v2003_v31  ;;  %v10219_v48 = vadd.s32 %v9668_v2, %v2793_v56  ;;  %vm12936_vm15 = vcmp.lt.s32.totalorder %v9990_v25, 600  ;;  %v12937_v31 = vld [vmem:[#allocation14_spill] sm:$0xff] }
 0x2cc   : > { %v3103_v39 = vmax.f32 %v3102_v37, %v2981_v50  ;;  %v2145_v40 = vpop.f32.mrf.mxu2  ;;  %v2234_v49 = vpop.f32.mrf.mxu3 }
 0x2cd   : > { %v2749_v1 = vmax.f32 %v2092_v0, 0.0  ;;  %v2146_v3 = vadd.f32 %v2145_v40, %v9980_v36  ;;  %12935 = vst [vmem:[#allocation13_spill] sm:$0xff] %v10219_v48 }
 0x2cf   : > { %v3040_v60 = vsel %vm12869_vm14, %v2749_v1, -inf  ;;  %v2235_v16 = vadd.f32 %v2234_v49, %v2146_v3  ;;  %v12938_v49 = vld [vmem:[#allocation15_spill] sm:$0xff]  ;;  %vm2858_vm14 = vcmp.lt.s32.totalorder %v10219_v48, 600  ;;  %v2794_v1 = vadd.s32 248, %v9664_v7 }
 0x2d0   : > { %v3081_v35 = vmax.f32 %v3080_v28, %v3040_v60  ;;  %v2005_v23 = vpop.f32.mrf.mxu0  ;;  %v2094_v30 = vpop.f32.mrf.mxu1 }
 0x2d1   : > { %v2694_v50 = vmax.f32 %v2235_v16, 0.0  ;;  %v2006_v37 = vadd.f32 %v2005_v23, %v9647_v43  ;;  %2463 = vmatmul.bf16.vlgmr.msra.gmra.mxu2 %v9481_v58  ;;  %2552 = vmatmul.bf16.vlgmr.msra.gmra.mxu3 %v9483_v59 }
 0x2d3   : > { %v2985_v0 = vsel %vm12936_vm15, %v2694_v50, -inf  ;;  %v2095_v61 = vadd.f32 %v2094_v30, %v2006_v37  ;;  %2320 = vmatmul.bf16.gmra.mxu0 %v12937_v31  ;;  %2409 = vmatmul.bf16.gmra.mxu1 %v12938_v49  ;;  %v10234_v50 = vadd.s32 %v9668_v2, %v2794_v1  ;;  %v10244_v2 = vld [vmem:[%s12791_s6] sm:$0xf] }
 0x2d4   : > { %v3104_v28 = vmax.f32 %v3103_v39, %v2985_v0  ;;  %v2148_v40 = vpop.f32.mrf.mxu2  ;;  %v2237_v56 = vpop.f32.mrf.mxu3 }
 0x2d5   : > { %v2753_v3 = vmax.f32 %v2095_v61, 0.0  ;;  %v2149_v58 = vadd.f32 %v2148_v40, %v9980_v36  ;;  %12939 = vst [vmem:[#allocation14_spill] sm:$0xff] %v10234_v50  ;;  %vm2859_vm15 = vcmp.lt.s32.totalorder %v10234_v50, 600 }
 0x2d7   : > { %v3044_v59 = vsel %vm2858_vm14, %v2753_v3, -inf  ;;  %v2238_v60 = vadd.f32 %v2237_v56, %v2149_v58  ;;  %v10247_v56 = vperm.slane %v10244_v2, 2 }
 0x2d8   : > { %v3082_v16 = vmax.f32 %v3081_v35, %v3044_v59  ;;  %v2007_v23 = vpop.f32.mrf.mxu0  ;;  %v2096_v30 = vpop.f32.mrf.mxu1 }
 0x2d9   : > { %v2698_v39 = vmax.f32 %v2238_v60, 0.0  ;;  %v2008_v37 = vadd.f32 %v2007_v23, %v9647_v43 }
 0x2db   : > { %v2989_v0 = vsel %vm2844_vm0, %v2698_v39, -inf  ;;  %v2097_v7 = vadd.f32 %v2096_v30, %v2008_v37  ;;  %v12940_v37 = vld [vmem:[#allocation16_spill] sm:$0xff] }
 0x2dc   : > { %v3105_v61 = vmax.f32 %v3104_v28, %v2989_v0  ;;  %v2150_v40 = vpop.f32.mrf.mxu2  ;;  %v2239_v25 = vpop.f32.mrf.mxu3 }
 0x2dd   : > { %v2757_v3 = vmax.f32 %v2097_v7, 0.0  ;;  %v2151_v35 = vadd.f32 %v2150_v40, %v9980_v36 }
 0x2df   : > { %v3048_v43 = vsel %vm2859_vm15, %v2757_v3, -inf  ;;  %v2240_v1 = vadd.f32 %v2239_v25, %v2151_v35 }
 0x2e0   : > { %v10251_v28 = vmax.f32 %v3082_v16, %v3048_v43  ;;  %v2286_v58 = vpop.f32.mrf.mxu0  ;;  %v2375_v59 = vpop.f32.mrf.mxu1 }
 0x2e1   : > { %v2702_v60 = vmax.f32 %v2240_v1, 0.0  ;;  %v2287_v23 = vadd.f32 %v2286_v58, %v10247_v56  ;;  %2468 = vmatmul.bf16.gmra.mxu2 %v9493_v20  ;;  %2557 = vmatmul.bf16.gmra.mxu3 %v9495_v21 }
 0x2e2   : > { %v3084_v32 = vrot.slane %v10251_v28, 4 }
 0x2e3   : > { %v2993_v30 = vsel %vm12874_vm2, %v2702_v60, -inf  ;;  %v2376_v39 = vadd.f32 %v2375_v59, %v2287_v23  ;;  %2325 = vmatmul.bf16.gmra.mxu0 %v9655_v57  ;;  %2414 = vmatmul.bf16.gmra.mxu1 %v12940_v37  ;;  %vm12941_vm2 = vcmp.lt.s32.totalorder %v9676_v10, 600 }
 0x2e4   : > { %v3106_v25 = vmax.f32 %v3105_v61, %v2993_v30  ;;  %v2153_v16 = vpop.f32.mrf.mxu2  ;;  %v2242_v0 = vpop.f32.mrf.mxu3 }
 0x2e5   : > { %v2154_v7 = vadd.f32 %v2153_v16, %v9980_v36  ;;  %v2635_v21 = vmax.f32 %v2376_v39, 0.0 }
 0x2e7   : > { %v2243_v40 = vadd.f32 %v2242_v0, %v2154_v7  ;;  %v2926_v30 = vsel %vm2828_vm1, %v2635_v21, -inf }
 0x2e8   : > { %v2288_v3 = vpop.f32.mrf.mxu0  ;;  %v2377_v35 = vpop.f32.mrf.mxu1 }
 0x2e9   : > { %v2706_v43 = vmax.f32 %v2243_v40, 0.0  ;;  %v2289_v20 = vadd.f32 %v2288_v3, %v10247_v56 }
 0x2eb   : > { %v2997_v1 = vsel %vm2846_vm3, %v2706_v43, -inf  ;;  %v2378_v58 = vadd.f32 %v2377_v35, %v2289_v20  ;;  %v12942_v20 = vld [vmem:[#allocation17_spill] sm:$0xff] }
 0x2ec   : > { %v3107_v59 = vmax.f32 %v3106_v25, %v2997_v1  ;;  %v2155_v60 = vpop.f32.mrf.mxu2  ;;  %v2244_v23 = vpop.f32.mrf.mxu3 }
 0x2ed   : > { %v2639_v9 = vmax.f32 %v2378_v58, 0.0  ;;  %v2156_v61 = vadd.f32 %v2155_v60, %v9980_v36 }
 0x2ef   : > { %v2930_v16 = vsel %vm12941_vm2, %v2639_v9, -inf  ;;  %v2245_v0 = vadd.f32 %v2244_v23, %v2156_v61  ;;  %vm12943_vm2 = vcmp.lt.s32.totalorder %v9691_v42, 600 }
 0x2f0   : > { %v3127_v7 = vmax.f32 %v2926_v30, %v2930_v16  ;;  %v2291_v40 = vpop.f32.mrf.mxu0  ;;  %v2380_v39 = vpop.f32.mrf.mxu1 }
 0x2f1   : > { %v2710_v3 = vmax.f32 %v2245_v0, 0.0  ;;  %v2292_v43 = vadd.f32 %v2291_v40, %v10247_v56  ;;  %2473 = vmatmul.bf16.gmra.mxu2 %v9517_v53  ;;  %2562 = vmatmul.bf16.gmra.mxu3 %v9519_v54 }
 0x2f3   : > { %v3001_v25 = vsel %vm12875_vm4, %v2710_v3, -inf  ;;  %v2381_v35 = vadd.f32 %v2380_v39, %v2292_v43  ;;  %2330 = vmatmul.bf16.gmra.mxu0 %v9693_v45  ;;  %2419 = vmatmul.bf16.gmra.mxu1 %v12942_v20  ;;  %vm12944_vm4 = vcmp.lt.s32.totalorder %v9707_v4, 600 }
 0x2f4   : > { %v3108_v9 = vmax.f32 %v3107_v59, %v3001_v25  ;;  %v2158_v21 = vpop.f32.mrf.mxu2  ;;  %v2247_v1 = vpop.f32.mrf.mxu3 }
 0x2f5   : > { %v2643_v58 = vmax.f32 %v2381_v35, 0.0  ;;  %v2159_v60 = vadd.f32 %v2158_v21, %v9980_v36 }
 0x2f7   : > { %v2934_v23 = vsel %vm12943_vm2, %v2643_v58, -inf  ;;  %v2248_v53 = vadd.f32 %v2247_v1, %v2159_v60  ;;  %vm12949_vm2 = vcmp.lt.s32.totalorder %v9759_v26, 600 }
 0x2f8   : > { %v3128_v61 = vmax.f32 %v3127_v7, %v2934_v23  ;;  %v2293_v54 = vpop.f32.mrf.mxu0  ;;  %v2382_v30 = vpop.f32.mrf.mxu1 }
 0x2f9   : > { %v2714_v16 = vmax.f32 %v2248_v53, 0.0  ;;  %v2294_v0 = vadd.f32 %v2293_v54, %v10247_v56 }
 0x2fb   : > { %v3005_v40 = vsel %vm2848_vm5, %v2714_v16, -inf  ;;  %v2383_v39 = vadd.f32 %v2382_v30, %v2294_v0  ;;  %v12945_v30 = vld [vmem:[#allocation19_spill] sm:$0xff]  ;;  %v12946_v16 = vld [vmem:[#allocation20_spill] sm:$0xff] }
 0x2fc   : > { %v3109_v59 = vmax.f32 %v3108_v9, %v3005_v40  ;;  %v2160_v3 = vpop.f32.mrf.mxu2  ;;  %v2249_v43 = vpop.f32.mrf.mxu3 }
 0x2fd   : > { %v2647_v25 = vmax.f32 %v2383_v39, 0.0  ;;  %v2161_v35 = vadd.f32 %v2160_v3, %v9980_v36 }
 0x2ff   : > { %v2938_v21 = vsel %vm12944_vm4, %v2647_v25, -inf  ;;  %v2250_v1 = vadd.f32 %v2249_v43, %v2161_v35  ;;  %v12947_v43 = vld [vmem:[#allocation18_spill] sm:$0xff] }
 0x300   : > { %v3129_v7 = vmax.f32 %v3128_v61, %v2938_v21  ;;  %v2296_v58 = vpop.f32.mrf.mxu0  ;;  %v2385_v60 = vpop.f32.mrf.mxu1  ;;  %vm12948_vm4 = vcmp.lt.s32.totalorder %v12947_v43, 600 }
 0x301   : > { %v2718_v23 = vmax.f32 %v2250_v1, 0.0  ;;  %v2297_v53 = vadd.f32 %v2296_v58, %v10247_v56  ;;  %2478 = vmatmul.bf16.gmra.mxu2 %v9529_v17  ;;  %2567 = vmatmul.bf16.gmra.mxu3 %v9531_v18 }
 0x303   : > { %v3009_v9 = vsel %vm2849_vm6, %v2718_v23, -inf  ;;  %v2386_v54 = vadd.f32 %v2385_v60, %v2297_v53  ;;  %2335 = vmatmul.bf16.gmra.mxu0 %v12945_v30  ;;  %2424 = vmatmul.bf16.gmra.mxu1 %v12946_v16 }
 0x304   : > { %v3110_v0 = vmax.f32 %v3109_v59, %v3009_v9  ;;  %v2163_v40 = vpop.f32.mrf.mxu2  ;;  %v2252_v61 = vpop.f32.mrf.mxu3 }
 0x305   : > { %v2651_v39 = vmax.f32 %v2386_v54, 0.0  ;;  %v2164_v3 = vadd.f32 %v2163_v40, %v9980_v36 }
 0x307   : > { %v2942_v25 = vsel %vm12948_vm4, %v2651_v39, -inf  ;;  %v2253_v17 = vadd.f32 %v2252_v61, %v2164_v3  ;;  %vm12951_vm4 = vcmp.lt.s32.totalorder %v9771_v5, 600 }
 0x308   : > { %v3130_v35 = vmax.f32 %v3129_v7, %v2942_v25  ;;  %v2298_v18 = vpop.f32.mrf.mxu0  ;;  %v2387_v21 = vpop.f32.mrf.mxu1 }
 0x309   : > { %v2722_v1 = vmax.f32 %v2253_v17, 0.0  ;;  %v2299_v58 = vadd.f32 %v2298_v18, %v10247_v56 }
 0x30b   : > { %v3013_v60 = vsel %vm2850_vm7, %v2722_v1, -inf  ;;  %v2388_v23 = vadd.f32 %v2387_v21, %v2299_v58  ;;  %v12950_v1 = vld [vmem:[#allocation21_spill] sm:$0xff] }
 0x30c   : > { %v3111_v59 = vmax.f32 %v3110_v0, %v3013_v60  ;;  %v2165_v53 = vpop.f32.mrf.mxu2  ;;  %v2254_v9 = vpop.f32.mrf.mxu3 }
 0x30d   : > { %v2655_v54 = vmax.f32 %v2388_v23, 0.0  ;;  %v2166_v40 = vadd.f32 %v2165_v53, %v9980_v36 }
 0x30f   : > { %v2946_v39 = vsel %vm12949_vm2, %v2655_v54, -inf  ;;  %v2255_v61 = vadd.f32 %v2254_v9, %v2166_v40  ;;  %vm12952_vm2 = vcmp.lt.s32.totalorder %v9787_v29, 600 }
 0x310   : > { %v3131_v7 = vmax.f32 %v3130_v35, %v2946_v39  ;;  %v2301_v3 = vpop.f32.mrf.mxu0  ;;  %v2390_v25 = vpop.f32.mrf.mxu1 }
 0x311   : > { %v2726_v17 = vmax.f32 %v2255_v61, 0.0  ;;  %v2302_v18 = vadd.f32 %v2301_v3, %v10247_v56  ;;  %2483 = vmatmul.bf16.gmra.mxu2 %v9553_v52  ;;  %2572 = vmatmul.bf16.gmra.mxu3 %v9555_v55 }
 0x313   : > { %v3017_v0 = vsel %vm2851_vm8, %v2726_v17, -inf  ;;  %v2391_v21 = vadd.f32 %v2390_v25, %v2302_v18  ;;  %2340 = vmatmul.bf16.gmra.mxu0 %v9773_v62  ;;  %2429 = vmatmul.bf16.gmra.mxu1 %v12950_v1 }
 0x314   : > { %v3112_v58 = vmax.f32 %v3111_v59, %v3017_v0  ;;  %v2168_v60 = vpop.f32.mrf.mxu2  ;;  %v2257_v35 = vpop.f32.mrf.mxu3 }
 0x315   : > { %v2659_v23 = vmax.f32 %v2391_v21, 0.0  ;;  %v2169_v53 = vadd.f32 %v2168_v60, %v9980_v36 }
 0x317   : > { %v2950_v9 = vsel %vm12951_vm4, %v2659_v23, -inf  ;;  %v2258_v52 = vadd.f32 %v2257_v35, %v2169_v53 }
 0x318   : > { %v3132_v54 = vmax.f32 %v3131_v7, %v2950_v9  ;;  %v2303_v55 = vpop.f32.mrf.mxu0  ;;  %v2392_v40 = vpop.f32.mrf.mxu1 }
 0x319   : > { %v2730_v39 = vmax.f32 %v2258_v52, 0.0  ;;  %v2304_v61 = vadd.f32 %v2303_v55, %v10247_v56 }
 0x31b   : > { %v3021_v3 = vsel %vm2852_vm9, %v2730_v39, -inf  ;;  %v2393_v25 = vadd.f32 %v2392_v40, %v2304_v61  ;;  %v12953_v40 = vld [vmem:[#allocation23_spill] sm:$0xff]  ;;  %v12954_v39 = vld [vmem:[#allocation24_spill] sm:$0xff] }
 0x31c   : > { %v3113_v59 = vmax.f32 %v3112_v58, %v3021_v3  ;;  %v2170_v17 = vpop.f32.mrf.mxu2  ;;  %v2259_v18 = vpop.f32.mrf.mxu3 }
 0x31d   : > { %v2663_v0 = vmax.f32 %v2393_v25, 0.0  ;;  %v2171_v21 = vadd.f32 %v2170_v17, %v9980_v36 }
 0x31f   : > { %v2954_v60 = vsel %vm12952_vm2, %v2663_v0, -inf  ;;  %v2260_v35 = vadd.f32 %v2259_v18, %v2171_v21  ;;  %v12955_v18 = vld [vmem:[#allocation22_spill] sm:$0xff]  ;;  %vm12957_vm2 = vcmp.lt.s32.totalorder %v9839_v19, 600 }
 0x320   : > { %v3133_v7 = vmax.f32 %v3132_v54, %v2954_v60  ;;  %v2306_v23 = vpop.f32.mrf.mxu0  ;;  %v2395_v53 = vpop.f32.mrf.mxu1  ;;  %vm12956_vm4 = vcmp.lt.s32.totalorder %v12955_v18, 600 }
 0x321   : > { %v2734_v9 = vmax.f32 %v2260_v35, 0.0  ;;  %v2307_v52 = vadd.f32 %v2306_v23, %v10247_v56  ;;  %2488 = vmatmul.bf16.gmra.mxu2 %v9565_v22  ;;  %2577 = vmatmul.bf16.gmra.mxu3 %v12928_v12 }
 0x323   : > { %v3025_v58 = vsel %vm2853_vm10, %v2734_v9, -inf  ;;  %v2396_v55 = vadd.f32 %v2395_v53, %v2307_v52  ;;  %2345 = vmatmul.bf16.gmra.mxu0 %v12953_v40  ;;  %2434 = vmatmul.bf16.gmra.mxu1 %v12954_v39 }
 0x324   : > { %v3114_v61 = vmax.f32 %v3113_v59, %v3025_v58  ;;  %v2173_v3 = vpop.f32.mrf.mxu2  ;;  %v2262_v54 = vpop.f32.mrf.mxu3 }
 0x325   : > { %v2667_v25 = vmax.f32 %v2396_v55, 0.0  ;;  %v2174_v17 = vadd.f32 %v2173_v3, %v9980_v36 }
 0x327   : > { %v2958_v0 = vsel %vm12956_vm4, %v2667_v25, -inf  ;;  %v2263_v22 = vadd.f32 %v2262_v54, %v2174_v17 }
 0x328   : > { %v3134_v21 = vmax.f32 %v3133_v7, %v2958_v0  ;;  %v2308_v12 = vpop.f32.mrf.mxu0  ;;  %v2397_v60 = vpop.f32.mrf.mxu1 }
 0x329   : > { %v2738_v35 = vmax.f32 %v2263_v22, 0.0  ;;  %v2309_v23 = vadd.f32 %v2308_v12, %v10247_v56 }
 0x32b   : > { %v3029_v53 = vsel %vm2854_vm11, %v2738_v35, -inf  ;;  %v2398_v9 = vadd.f32 %v2397_v60, %v2309_v23  ;;  %v12958_v35 = vld [vmem:[#allocation26_spill] sm:$0xff] }
 0x32c   : > { %v3115_v59 = vmax.f32 %v3114_v61, %v3029_v53  ;;  %v2175_v52 = vpop.f32.mrf.mxu2  ;;  %v2264_v58 = vpop.f32.mrf.mxu3 }
 0x32d   : > { %v2671_v55 = vmax.f32 %v2398_v9, 0.0  ;;  %v2176_v3 = vadd.f32 %v2175_v52, %v9980_v36 }
 0x32f   : > { %v2962_v25 = vsel %vm12957_vm2, %v2671_v55, -inf  ;;  %v2265_v54 = vadd.f32 %v2264_v58, %v2176_v3  ;;  %v12959_v58 = vld [vmem:[#allocation25_spill] sm:$0xff]  ;;  %vm12962_vm2 = vcmp.lt.s32.totalorder %v12961_v46, 600 }
 0x330   : > { %v3135_v7 = vmax.f32 %v3134_v21, %v2962_v25  ;;  %v2311_v17 = vpop.f32.mrf.mxu0  ;;  %v2400_v0 = vpop.f32.mrf.mxu1  ;;  %vm12960_vm4 = vcmp.lt.s32.totalorder %v12959_v58, 600 }
 0x331   : > { %v2742_v22 = vmax.f32 %v2265_v54, 0.0  ;;  %v2312_v12 = vadd.f32 %v2311_v17, %v10247_v56  ;;  %2493 = vmatmul.bf16.gmra.mxu2 %v12932_v8  ;;  %2582 = vmatmul.bf16.gmra.mxu3 %v12933_v11 }
 0x333   : > { %v3033_v61 = vsel %vm2855_vm12, %v2742_v22, -inf  ;;  %v2401_v60 = vadd.f32 %v2400_v0, %v2312_v12  ;;  %2350 = vmatmul.bf16.gmra.mxu0 %v9853_v14  ;;  %2439 = vmatmul.bf16.gmra.mxu1 %v12958_v35 }
 0x334   : > { %v3116_v23 = vmax.f32 %v3115_v59, %v3033_v61  ;;  %v2178_v53 = vpop.f32.mrf.mxu2  ;;  %v2267_v21 = vpop.f32.mrf.mxu3 }
 0x335   : > { %v2675_v9 = vmax.f32 %v2401_v60, 0.0  ;;  %v2179_v52 = vadd.f32 %v2178_v53, %v9980_v36 }
 0x337   : > { %v2966_v55 = vsel %vm12960_vm4, %v2675_v9, -inf  ;;  %v2268_v8 = vadd.f32 %v2267_v21, %v2179_v52  ;;  %vm12963_vm4 = vcmp.lt.s32.totalorder %v10208_v13, 600 }
 0x338   : > { %v3136_v3 = vmax.f32 %v3135_v7, %v2966_v55  ;;  %v2313_v11 = vpop.f32.mrf.mxu0  ;;  %v2402_v25 = vpop.f32.mrf.mxu1 }
 0x339   : > { %v2746_v54 = vmax.f32 %v2268_v8, 0.0  ;;  %v2314_v17 = vadd.f32 %v2313_v11, %v10247_v56 }
 0x33b   : > { %v3037_v0 = vsel %vm2856_vm13, %v2746_v54, -inf  ;;  %v2403_v22 = vadd.f32 %v2402_v25, %v2314_v17  ;;  %v12964_v54 = vld [vmem:[#allocation29_spill] sm:$0xff]  ;;  %v12965_v17 = vld [vmem:[#allocation30_spill] sm:$0xff] }
 0x33c   : > { %v3117_v59 = vmax.f32 %v3116_v23, %v3037_v0  ;;  %v2180_v12 = vpop.f32.mrf.mxu2  ;;  %v2269_v61 = vpop.f32.mrf.mxu3 }
 0x33d   : > { %v2679_v60 = vmax.f32 %v2403_v22, 0.0  ;;  %v2181_v53 = vadd.f32 %v2180_v12, %v9980_v36 }
 0x33f   : > { %v2970_v9 = vsel %vm12962_vm2, %v2679_v60, -inf  ;;  %v2270_v21 = vadd.f32 %v2269_v61, %v2181_v53  ;;  %v12966_v60 = vld [vmem:[#allocation28_spill] sm:$0xff] }
 0x340   : > { %v3137_v7 = vmax.f32 %v3136_v3, %v2970_v9  ;;  %v2316_v52 = vpop.f32.mrf.mxu0  ;;  %v2405_v55 = vpop.f32.mrf.mxu1  ;;  %vm12967_vm2 = vcmp.lt.s32.totalorder %v12966_v60, 600 }
 0x341   : > { %v2750_v8 = vmax.f32 %v2270_v21, 0.0  ;;  %v2317_v11 = vadd.f32 %v2316_v52, %v10247_v56  ;;  %2498 = vmatmul.bf16.gmra.mxu2 %v12937_v31  ;;  %2587 = vmatmul.bf16.gmra.mxu3 %v12938_v49 }
 0x343   : > { %v3041_v23 = vsel %vm12963_vm4, %v2750_v8, -inf  ;;  %v2406_v25 = vadd.f32 %v2405_v55, %v2317_v11  ;;  %2355 = vmatmul.bf16.gmra.mxu0 %v12964_v54  ;;  %2444 = vmatmul.bf16.gmra.mxu1 %v12965_v17 }
 0x344   : > { %v3118_v0 = vmax.f32 %v3117_v59, %v3041_v23  ;;  %v2183_v22 = vpop.f32.mrf.mxu2  ;;  %v2272_v3 = vpop.f32.mrf.mxu3 }
 0x345   : > { %v2683_v12 = vmax.f32 %v2406_v25, 0.0  ;;  %v2184_v61 = vadd.f32 %v2183_v22, %v9980_v36 }
 0x347   : > { %v2974_v53 = vsel %vm12967_vm2, %v2683_v12, -inf  ;;  %v2273_v31 = vadd.f32 %v2272_v3, %v2184_v61  ;;  %v12968_v12 = vld [vmem:[#allocation31_spill] sm:$0xff]  ;;  %vm12972_vm2 = vcmp.lt.s32.totalorder %v9970_v15, 600 }
 0x348   : > { %v3138_v9 = vmax.f32 %v3137_v7, %v2974_v53  ;;  %v2318_v49 = vpop.f32.mrf.mxu0  ;;  %v2407_v21 = vpop.f32.mrf.mxu1  ;;  %vm12969_vm4 = vcmp.lt.s32.totalorder %v12968_v12, 600 }
 0x349   : > { %v2754_v52 = vmax.f32 %v2273_v31, 0.0  ;;  %v2319_v55 = vadd.f32 %v2318_v49, %v10247_v56 }
 0x34b   : > { %v3045_v8 = vsel %vm2858_vm14, %v2754_v52, -inf  ;;  %v2408_v11 = vadd.f32 %v2407_v21, %v2319_v55 }
 0x34c   : > { %v3119_v59 = vmax.f32 %v3118_v0, %v3045_v8  ;;  %v2185_v23 = vpop.f32.mrf.mxu2  ;;  %v2274_v13 = vpop.f32.mrf.mxu3  ;;  %v10370_v0 = vperm.slane %v10244_v2, 3 }
 0x34d   : > { %v2687_v25 = vmax.f32 %v2408_v11, 0.0  ;;  %v2186_v22 = vadd.f32 %v2185_v23, %v9980_v36  ;;  %v3085_v36 = vmax.f32 %v10251_v28, %v3084_v32 }
 0x34f   : > { %v2978_v7 = vsel %vm12969_vm4, %v2687_v25, -inf  ;;  %v2275_v3 = vadd.f32 %v2274_v13, %v2186_v22  ;;  %v12970_v13 = vld [vmem:[#allocation32_spill] sm:$0xff] }
 0x350   : > { %v3139_v61 = vmax.f32 %v3138_v9, %v2978_v7  ;;  %v2321_v53 = vpop.f32.mrf.mxu0  ;;  %v2410_v31 = vpop.f32.mrf.mxu1  ;;  %v12971_v9 = vld [vmem:[#allocation33_spill] sm:$0xff] }
 0x351   : > { %v2758_v49 = vmax.f32 %v2275_v3, 0.0  ;;  %v2322_v48 = vadd.f32 %v2321_v53, %v10247_v56  ;;  %2503 = vmatmul.bf16.gmra.mxu2 %v9655_v57  ;;  %2592 = vmatmul.bf16.gmra.mxu3 %v12940_v37  ;;  %v3086_v37 = vrot.slane %v3085_v36, 2 }
 0x353   : > { %v3049_v21 = vsel %vm2859_vm15, %v2758_v49, -inf  ;;  %v2411_v52 = vadd.f32 %v2410_v31, %v2322_v48  ;;  %2360 = vmatmul.bf16.gmra.mxu0 %v12970_v13  ;;  %2449 = vmatmul.bf16.gmra.mxu1 %v12971_v9  ;;  %v3087_v53 = vmax.f32 %v3085_v36, %v3086_v37 }
 0x354   : > { %v3120_v55 = vmax.f32 %v3119_v59, %v3049_v21  ;;  %v2464_v8 = vpop.f32.mrf.mxu2  ;;  %v2553_v11 = vpop.f32.mrf.mxu3 }
 0x355   : > { %v2691_v23 = vmax.f32 %v2411_v52, 0.0  ;;  %v2465_v57 = vadd.f32 %v2464_v8, %v10370_v0  ;;  %v3088_v51 = vrot.slane %v3087_v53, 1 }
 0x356   : > { %v3121_v25 = vrot.slane %v3120_v55, 4 }
 0x357   : > { %v2982_v2 = vsel %vm12972_vm2, %v2691_v23, -inf  ;;  %v2554_v32 = vadd.f32 %v2553_v11, %v2465_v57  ;;  %v12973_v23 = vld [vmem:[#allocation34_spill] sm:$0xff]  ;;  %vm3208_vm2 = vcmask 1040384  }
 0x358   : > { %v3122_v28 = vmax.f32 %v3120_v55, %v3121_v25  ;;  %v3140_v22 = vmax.f32 %v3139_v61, %v2982_v2  ;;  %v2323_v7 = vpop.f32.mrf.mxu0  ;;  %v2412_v48 = vpop.f32.mrf.mxu1  ;;  %vm12974_vm4 = vcmp.lt.s32.totalorder %v12973_v23, 600 }
 0x359   : > { %v2324_v3 = vadd.f32 %v2323_v7, %v10247_v56  ;;  %v2636_v47 = vmax.f32 %v2554_v32, 0.0 }
 0x35a   : > { %v3123_v31 = vrot.slane %v3122_v28, 2 }
 0x35b   : > { %v2413_v59 = vadd.f32 %v2412_v48, %v2324_v3  ;;  %v2927_v32 = vsel %vm2828_vm1, %v2636_v47, -inf  ;;  %vm12976_vm1 = vcmp.lt.s32.totalorder %v9691_v42, 600 }
 0x35c   : > { %v3124_v49 = vmax.f32 %v3122_v28, %v3123_v31  ;;  %v2466_v21 = vpop.f32.mrf.mxu2  ;;  %v2555_v52 = vpop.f32.mrf.mxu3  ;;  %v3089_v28 = vmax.f32 %v3087_v53, %v3088_v51 }
 0x35d   : > { %v2695_v50 = vmax.f32 %v2413_v59, 0.0  ;;  %v2467_v8 = vadd.f32 %v2466_v21, %v10370_v0 }
 0x35e   : > { %v3125_v34 = vrot.slane %v3124_v49, 1 }
 0x35f   : > { %v2986_v55 = vsel %vm12974_vm4, %v2695_v50, -inf  ;;  %v2556_v61 = vadd.f32 %v2555_v52, %v2467_v8  ;;  %vm12975_vm4 = vcmp.lt.s32.totalorder %v9676_v10, 600 }
 0x360   : > { %v3126_v11 = vmax.f32 %v3124_v49, %v3125_v34  ;;  %v3141_v57 = vmax.f32 %v3140_v22, %v2986_v55  ;;  %v2326_v25 = vpop.f32.mrf.mxu0  ;;  %v2415_v2 = vpop.f32.mrf.mxu1 }
 0x361   : > { %v2640_v36 = vmax.f32 %v2556_v61, 0.0  ;;  %v2327_v37 = vadd.f32 %v2326_v25, %v10247_v56  ;;  %2508 = vmatmul.bf16.gmra.mxu2 %v9693_v45  ;;  %2597 = vmatmul.bf16.gmra.mxu3 %v12942_v20 }
 0x362   : > { %v3205_v7 = vrot.slane %v3126_v11, 7 }
 0x363   : > { %v2931_v50 = vsel %vm12975_vm4, %v2640_v36, -inf  ;;  %v2416_v34 = vadd.f32 %v2415_v2, %v2327_v37  ;;  %v12977_v2 = vld [vmem:[#allocation35_spill] sm:$0xff]  ;;  %vm12979_vm4 = vcmp.lt.s32.totalorder %v9707_v4, 600 }
 0x364   : > { %v10391_v22 = vsel %vm3208_vm2, %v3089_v28, %v3205_v7  ;;  %v3164_v48 = vmax.f32 %v2927_v32, %v2931_v50  ;;  %v2469_v3 = vpop.f32.mrf.mxu2  ;;  %v2558_v31 = vpop.f32.mrf.mxu3  ;;  %vm12978_vm2 = vcmp.lt.s32.totalorder %v12977_v2, 600 }
 0x365   : > { %v2699_v59 = vmax.f32 %v2416_v34, 0.0  ;;  %v2470_v49 = vadd.f32 %v2469_v3, %v10370_v0 }
 0x367   : > { %v2990_v45 = vsel %vm2844_vm0, %v2699_v59, -inf  ;;  %v2559_v51 = vadd.f32 %v2558_v31, %v2470_v49 }
 0x368   : > { %v3142_v20 = vmax.f32 %v3141_v57, %v2990_v45  ;;  %v2328_v53 = vpop.f32.mrf.mxu0  ;;  %v2417_v6 = vpop.f32.mrf.mxu1 }
 0x369   : > { %v2644_v47 = vmax.f32 %v2559_v51, 0.0  ;;  %v2329_v10 = vadd.f32 %v2328_v53, %v10247_v56 }
 0x36b   : > { %v2935_v21 = vsel %vm12976_vm1, %v2644_v47, -inf  ;;  %v2418_v52 = vadd.f32 %v2417_v6, %v2329_v10  ;;  %vm12980_vm1 = vcmp.lt.s32.totalorder %v12947_v43, 600 }
 0x36c   : > { %v3165_v8 = vmax.f32 %v3164_v48, %v2935_v21  ;;  %v2471_v55 = vpop.f32.mrf.mxu2  ;;  %v2560_v61 = vpop.f32.mrf.mxu3 }
 0x36d   : > { %v2703_v11 = vmax.f32 %v2418_v52, 0.0  ;;  %v2472_v25 = vadd.f32 %v2471_v55, %v10370_v0 }
 0x36f   : > { %v2994_v36 = vsel %vm12978_vm2, %v2703_v11, -inf  ;;  %v2561_v37 = vadd.f32 %v2560_v61, %v2472_v25  ;;  %vm12981_vm2 = vcmp.lt.s32.totalorder %v10054_v33, 600 }
 0x370   : > { %v3143_v57 = vmax.f32 %v3142_v20, %v2994_v36  ;;  %v2331_v28 = vpop.f32.mrf.mxu0  ;;  %v2420_v7 = vpop.f32.mrf.mxu1 }
 0x371   : > { %v2648_v32 = vmax.f32 %v2561_v37, 0.0  ;;  %v2332_v50 = vadd.f32 %v2331_v28, %v10247_v56  ;;  %2513 = vmatmul.bf16.gmra.mxu2 %v12945_v30  ;;  %2602 = vmatmul.bf16.gmra.mxu3 %v12946_v16 }
 0x373   : > { %v2939_v42 = vsel %vm12979_vm4, %v2648_v32, -inf  ;;  %v2421_v34 = vadd.f32 %v2420_v7, %v2332_v50  ;;  %vm12982_vm4 = vcmp.lt.s32.totalorder %v9759_v26, 600 }
 0x374   : > { %v3166_v48 = vmax.f32 %v3165_v8, %v2939_v42  ;;  %v2474_v3 = vpop.f32.mrf.mxu2  ;;  %v2563_v31 = vpop.f32.mrf.mxu3 }
 0x375   : > { %v2707_v59 = vmax.f32 %v2421_v34, 0.0  ;;  %v2475_v49 = vadd.f32 %v2474_v3, %v10370_v0 }
 0x377   : > { %v2998_v45 = vsel %vm2846_vm3, %v2707_v59, -inf  ;;  %v2564_v51 = vadd.f32 %v2563_v31, %v2475_v49 }
 0x378   : > { %v3144_v20 = vmax.f32 %v3143_v57, %v2998_v45  ;;  %v2333_v53 = vpop.f32.mrf.mxu0  ;;  %v2422_v6 = vpop.f32.mrf.mxu1 }
 0x379   : > { %v2652_v30 = vmax.f32 %v2564_v51, 0.0  ;;  %v2334_v16 = vadd.f32 %v2333_v53, %v10247_v56 }
 0x37b   : > { %v2943_v4 = vsel %vm12980_vm1, %v2652_v30, -inf  ;;  %v2423_v47 = vadd.f32 %v2422_v6, %v2334_v16  ;;  %vm12983_vm1 = vcmp.lt.s32.totalorder %v9771_v5, 600 }
 0x37c   : > { %v3167_v10 = vmax.f32 %v3166_v48, %v2943_v4  ;;  %v2476_v21 = vpop.f32.mrf.mxu2  ;;  %v2565_v52 = vpop.f32.mrf.mxu3 }
 0x37d   : > { %v2711_v8 = vmax.f32 %v2423_v47, 0.0  ;;  %v2477_v55 = vadd.f32 %v2476_v21, %v10370_v0 }
 0x37f   : > { %v3002_v61 = vsel %vm12981_vm2, %v2711_v8, -inf  ;;  %v2566_v11 = vadd.f32 %v2565_v52, %v2477_v55  ;;  %vm12984_vm2 = vcmp.lt.s32.totalorder %v9787_v29, 600 }
 0x380   : > { %v3145_v25 = vmax.f32 %v3144_v20, %v3002_v61  ;;  %v2336_v36 = vpop.f32.mrf.mxu0  ;;  %v2425_v43 = vpop.f32.mrf.mxu1 }
 0x381   : > { %v2656_v37 = vmax.f32 %v2566_v11, 0.0  ;;  %v2337_v57 = vadd.f32 %v2336_v36, %v10247_v56  ;;  %2518 = vmatmul.bf16.gmra.mxu2 %v9773_v62  ;;  %2607 = vmatmul.bf16.gmra.mxu3 %v12950_v1 }
 0x383   : > { %v2947_v28 = vsel %vm12982_vm4, %v2656_v37, -inf  ;;  %v2426_v7 = vadd.f32 %v2425_v43, %v2337_v57  ;;  %vm12985_vm4 = vcmp.lt.s32.totalorder %v12955_v18, 600 }
 0x384   : > { %v3168_v32 = vmax.f32 %v3167_v10, %v2947_v28  ;;  %v2479_v50 = vpop.f32.mrf.mxu2  ;;  %v2568_v42 = vpop.f32.mrf.mxu3 }
 0x385   : > { %v2715_v34 = vmax.f32 %v2426_v7, 0.0  ;;  %v2480_v48 = vadd.f32 %v2479_v50, %v10370_v0 }
 0x387   : > { %v3006_v3 = vsel %vm2848_vm5, %v2715_v34, -inf  ;;  %v2569_v31 = vadd.f32 %v2568_v42, %v2480_v48 }
 0x388   : > { %v10424_v59 = vmax.f32 %v3145_v25, %v3006_v3 }
 0x389   : > { %v2660_v62 = vmax.f32 %v2569_v31, 0.0 }
 0x38b   : > { %v2951_v1 = vsel %vm12983_vm1, %v2660_v62, -inf  ;;  %vm12986_vm1 = vcmp.lt.s32.totalorder %v9839_v19, 600 }
 0x38c   : > { %v3169_v49 = vmax.f32 %v3168_v32, %v2951_v1  ;;  %v2481_v26 = vpop.f32.mrf.mxu2  ;;  %v2570_v45 = vpop.f32.mrf.mxu3 }
 0x38d   : > { %v2482_v51 = vadd.f32 %v2481_v26, %v10370_v0 }
 0x38f   : > { %v2571_v20 = vadd.f32 %v2570_v45, %v2482_v51 }
 0x391   : > { %v2664_v53 = vmax.f32 %v2571_v20, 0.0  ;;  %2523 = vmatmul.bf16.gmra.mxu2 %v12953_v40  ;;  %2612 = vmatmul.bf16.gmra.mxu3 %v12954_v39 }
 0x393   : > { %v2955_v6 = vsel %vm12984_vm2, %v2664_v53, -inf  ;;  %vm12987_vm2 = vcmp.lt.s32.totalorder %v12959_v58, 600 }
 0x394   : > { %v3170_v30 = vmax.f32 %v3169_v49, %v2955_v6  ;;  %v2484_v16 = vpop.f32.mrf.mxu2  ;;  %v2573_v4 = vpop.f32.mrf.mxu3 }
 0x395   : > { %v2485_v5 = vadd.f32 %v2484_v16, %v10370_v0 }
 0x397   : > { %v2574_v47 = vadd.f32 %v2573_v4, %v2485_v5 }
 0x399   : > { %v2668_v10 = vmax.f32 %v2574_v47, 0.0 }
 0x39b   : > { %v2959_v21 = vsel %vm12985_vm4, %v2668_v10, -inf  ;;  %vm12988_vm4 = vcmp.lt.s32.totalorder %v12961_v46, 600  ;;  %v10461_v10 = vpop.f32.mrf.mxu0 }
 0x39c   : > { %v3171_v52 = vmax.f32 %v3170_v30, %v2959_v21  ;;  %v2486_v8 = vpop.f32.mrf.mxu2  ;;  %v2575_v55 = vpop.f32.mrf.mxu3 }
 0x39d   : > { %v2487_v40 = vadd.f32 %v2486_v8, %v10370_v0 }
 0x39f   : > { %v2576_v61 = vadd.f32 %v2575_v55, %v2487_v40  ;;  %v10465_v40 = vpop.f32.mrf.mxu1 }
 0x3a1   : > { %v2672_v39 = vmax.f32 %v2576_v61, 0.0  ;;  %2528 = vmatmul.bf16.gmra.mxu2 %v9853_v14  ;;  %2617 = vmatmul.bf16.gmra.mxu3 %v12958_v35 }
 0x3a3   : > { %v2963_v29 = vsel %vm12986_vm1, %v2672_v39, -inf  ;;  %vm12989_vm1 = vcmp.lt.s32.totalorder %v12966_v60, 600  ;;  %v2341_v39 = vpop.f32.mrf.mxu0 }
 0x3a4   : > { %v3172_v11 = vmax.f32 %v3171_v52, %v2963_v29  ;;  %v2489_v25 = vpop.f32.mrf.mxu2  ;;  %v2578_v36 = vpop.f32.mrf.mxu3 }
 0x3a5   : > { %v2490_v18 = vadd.f32 %v2489_v25, %v10370_v0 }
 0x3a7   : > { %v2579_v37 = vadd.f32 %v2578_v36, %v2490_v18 }
 0x3a9   : > { %v2676_v57 = vmax.f32 %v2579_v37, 0.0 }
 0x3ab   : > { %v2967_v43 = vsel %vm12987_vm2, %v2676_v57, -inf  ;;  %vm12990_vm2 = vcmp.lt.s32.totalorder %v12968_v12, 600 }
 0x3ac   : > { %v3173_v28 = vmax.f32 %v3172_v11, %v2967_v43  ;;  %v2491_v7 = vpop.f32.mrf.mxu2  ;;  %v2580_v32 = vpop.f32.mrf.mxu3 }
 0x3ad   : > { %v2492_v14 = vadd.f32 %v2491_v7, %v10370_v0 }
 0x3af   : > { %v2581_v50 = vadd.f32 %v2580_v32, %v2492_v14 }
 0x3b1   : > { %v2680_v35 = vmax.f32 %v2581_v50, 0.0  ;;  %2533 = vmatmul.bf16.gmra.mxu2 %v12964_v54  ;;  %2622 = vmatmul.bf16.gmra.mxu3 %v12965_v17 }
 0x3b3   : > { %v2971_v19 = vsel %vm12988_vm4, %v2680_v35, -inf  ;;  %vm12991_vm4 = vcmp.lt.s32.totalorder %v9970_v15, 600 }
 0x3b4   : > { %v3174_v42 = vmax.f32 %v3173_v28, %v2971_v19  ;;  %v2494_v34 = vpop.f32.mrf.mxu2  ;;  %v2583_v48 = vpop.f32.mrf.mxu3 }
 0x3b5   : > { %v2495_v58 = vadd.f32 %v2494_v34, %v10370_v0  ;;  %v2343_v28 = vpop.f32.mrf.mxu0 }
 0x3b7   : > { %v2584_v3 = vadd.f32 %v2583_v48, %v2495_v58 }
 0x3b9   : > { %v2684_v31 = vmax.f32 %v2584_v3, 0.0 }
 0x3bb   : > { %v2975_v62 = vsel %vm12989_vm1, %v2684_v31, -inf  ;;  %vm12992_vm1 = vcmp.lt.s32.totalorder %v12973_v23, 600  ;;  %v2430_v23 = vpop.f32.mrf.mxu1 }
 0x3bc   : > { %v3175_v1 = vmax.f32 %v3174_v42, %v2975_v62  ;;  %v2496_v49 = vpop.f32.mrf.mxu2  ;;  %v2585_v26 = vpop.f32.mrf.mxu3 }
 0x3bd   : > { %v2497_v54 = vadd.f32 %v2496_v49, %v10370_v0  ;;  %v2346_v31 = vpop.f32.mrf.mxu0 }
 0x3bf   : > { %v2586_v45 = vadd.f32 %v2585_v26, %v2497_v54 }
 0x3c1   : > { %v2688_v17 = vmax.f32 %v2586_v45, 0.0  ;;  %2538 = vmatmul.bf16.gmra.mxu2 %v12970_v13  ;;  %2627 = vmatmul.bf16.gmra.mxu3 %v12971_v9 }
 0x3c3   : > { %v2979_v46 = vsel %vm12990_vm2, %v2688_v17, -inf  ;;  %vm12993_vm2 = vcmp.lt.s32.totalorder %v12977_v2, 600  ;;  %v2432_v41 = vpop.f32.mrf.mxu1 }
 0x3c4   : > { %v3176_v51 = vmax.f32 %v3175_v1, %v2979_v46  ;;  %v2499_v20 = vpop.f32.mrf.mxu2  ;;  %v2588_v53 = vpop.f32.mrf.mxu3 }
 0x3c5   : > { %v2500_v60 = vadd.f32 %v2499_v20, %v10370_v0 }
 0x3c7   : > { %v2589_v6 = vadd.f32 %v2588_v53, %v2500_v60 }
 0x3c9   : > { %v2692_v30 = vmax.f32 %v2589_v6, 0.0 }
 0x3cb   : > { %v2983_v16 = vsel %vm12991_vm4, %v2692_v30, -inf  ;;  %v2435_v49 = vpop.f32.mrf.mxu1 }
 0x3cc   : > { %v3177_v4 = vmax.f32 %v3176_v51, %v2983_v16  ;;  %v2501_v5 = vpop.f32.mrf.mxu2  ;;  %v2590_v47 = vpop.f32.mrf.mxu3 }
 0x3cd   : > { %v2502_v13 = vadd.f32 %v2501_v5, %v10370_v0  ;;  %v2348_v51 = vpop.f32.mrf.mxu0 }
 0x3cf   : > { %v2591_v9 = vadd.f32 %v2590_v47, %v2502_v13 }
 0x3d1   : > { %v2696_v12 = vmax.f32 %v2591_v9, 0.0 }
 0x3d3   : > { %v2987_v21 = vsel %vm12992_vm1, %v2696_v12, -inf  ;;  %v2437_v16 = vpop.f32.mrf.mxu1 }
 0x3d4   : > { %v3178_v52 = vmax.f32 %v3177_v4, %v2987_v21  ;;  %v2504_v8 = vpop.f32.mrf.mxu2  ;;  %v2593_v55 = vpop.f32.mrf.mxu3 }
 0x3d5   : > { %v2505_v15 = vadd.f32 %v2504_v8, %v10370_v0  ;;  %v2351_v4 = vpop.f32.mrf.mxu0 }
 0x3d7   : > { %v2594_v61 = vadd.f32 %v2593_v55, %v2505_v15 }
 0x3d9   : > { %v2700_v29 = vmax.f32 %v2594_v61, 0.0 }
 0x3db   : > { %v2991_v11 = vsel %vm2844_vm0, %v2700_v29, -inf  ;;  %vm12994_vm0 = vcmp.lt.s32.totalorder %v10054_v33, 600  ;;  %v2440_v47 = vpop.f32.mrf.mxu1 }
 0x3dc   : > { %v3179_v25 = vmax.f32 %v3178_v52, %v2991_v11  ;;  %v2506_v36 = vpop.f32.mrf.mxu2  ;;  %v2595_v18 = vpop.f32.mrf.mxu3  ;;  %v2339_v11 = vadd.f32 %v10461_v10, %v10247_v56 }
 0x3dd   : > { %v2507_v37 = vadd.f32 %v2506_v36, %v10370_v0  ;;  %v2353_v13 = vpop.f32.mrf.mxu0 }
 0x3df   : > { %v2596_v57 = vadd.f32 %v2595_v18, %v2507_v37  ;;  %v2342_v18 = vadd.f32 %v2341_v39, %v10247_v56  ;;  %v2352_v39 = vadd.f32 %v2351_v4, %v10247_v56 }
 0x3e1   : > { %v2704_v43 = vmax.f32 %v2596_v57, 0.0  ;;  %v2428_v57 = vadd.f32 %v10465_v40, %v2339_v11 }
 0x3e3   : > { %v2995_v7 = vsel %vm12993_vm2, %v2704_v43, -inf  ;;  %v2442_v21 = vpop.f32.mrf.mxu1  ;;  %v2344_v43 = vadd.f32 %v2343_v28, %v10247_v56 }
 0x3e4   : > { %v3180_v32 = vmax.f32 %v3179_v25, %v2995_v7  ;;  %v2509_v14 = vpop.f32.mrf.mxu2  ;;  %v2598_v50 = vpop.f32.mrf.mxu3  ;;  %v2431_v7 = vadd.f32 %v2430_v23, %v2342_v18  ;;  %v2354_v23 = vadd.f32 %v2353_v13, %v10247_v56 }
 0x3e5   : > { %v2510_v35 = vadd.f32 %v2509_v14, %v10370_v0  ;;  %v2356_v55 = vpop.f32.mrf.mxu0 }
 0x3e7   : > { %v2599_v19 = vadd.f32 %v2598_v50, %v2510_v35  ;;  %v2719_v50 = vmax.f32 %v2428_v57, 0.0  ;;  %v2433_v35 = vadd.f32 %v2432_v41, %v2344_v43 }
 0x3e9   : > { %v2708_v42 = vmax.f32 %v2599_v19, 0.0  ;;  %v2349_v19 = vadd.f32 %v2348_v51, %v10247_v56  ;;  %v3010_v40 = vsel %vm2849_vm6, %v2719_v50, -inf }
 0x3eb   : > { %v2999_v34 = vsel %vm2846_vm3, %v2708_v42, -inf  ;;  %v2445_v24 = vpop.f32.mrf.mxu1  ;;  %v2438_v28 = vadd.f32 %v2437_v16, %v2349_v19 }
 0x3ec   : > { %v3181_v48 = vmax.f32 %v3180_v32, %v2999_v34  ;;  %v2511_v58 = vpop.f32.mrf.mxu2  ;;  %v2600_v3 = vpop.f32.mrf.mxu3  ;;  %v2347_v32 = vadd.f32 %v2346_v31, %v10247_v56  ;;  %v2723_v34 = vmax.f32 %v2431_v7, 0.0  ;;  %v2357_v31 = vadd.f32 %v2356_v55, %v10247_v56 }
 0x3ed   : > { %v2512_v62 = vadd.f32 %v2511_v58, %v10370_v0  ;;  %v2358_v29 = vpop.f32.mrf.mxu0  ;;  %v2727_v58 = vmax.f32 %v2433_v35, 0.0 }
 0x3ee   : > { %v3014_v41 = vsel %vm2850_vm7, %v2723_v34, -inf }
 0x3ef   : > { %v2601_v1 = vadd.f32 %v2600_v3, %v2512_v62 }
 0x3f1   : > { %v2712_v2 = vmax.f32 %v2601_v1, 0.0  ;;  %v2441_v1 = vadd.f32 %v2440_v47, %v2352_v39 }
 0x3f3   : > { %v3003_v26 = vsel %vm12994_vm0, %v2712_v2, -inf  ;;  %v2447_v37 = vpop.f32.mrf.mxu1 }
 0x3f4   : > { %v3182_v54 = vmax.f32 %v3181_v48, %v3003_v26  ;;  %v2514_v45 = vpop.f32.mrf.mxu2  ;;  %v2603_v17 = vpop.f32.mrf.mxu3  ;;  %v2436_v48 = vadd.f32 %v2435_v49, %v2347_v32  ;;  %v3147_v49 = vmax.f32 %v10424_v59, %v3010_v40  ;;  %v2359_v26 = vadd.f32 %v2358_v29, %v10247_v56 }
 0x3f5   : > { %v2515_v46 = vadd.f32 %v2514_v45, %v10370_v0  ;;  %v2361_v14 = vpop.f32.mrf.mxu0  ;;  %v2735_v45 = vmax.f32 %v2438_v28, 0.0  ;;  %v2739_v59 = vmax.f32 %v2441_v1, 0.0 }
 0x3f6   : > { %v2731_v62 = vmax.f32 %v2436_v48, 0.0  ;;  %v2448_v11 = vadd.f32 %v2447_v37, %v2359_v26 }
 0x3f7   : > { %v2604_v27 = vadd.f32 %v2603_v17, %v2515_v46  ;;  %v2443_v17 = vadd.f32 %v2442_v21, %v2354_v23  ;;  %v3030_v35 = vsel %vm2854_vm11, %v2739_v59, -inf }
 0x3f8   : > { %v2751_v34 = vmax.f32 %v2448_v11, 0.0 }
 0x3f9   : > { %v2716_v20 = vmax.f32 %v2604_v27, 0.0  ;;  %v3148_v27 = vmax.f32 %v3147_v49, %v3014_v41  ;;  %v2743_v57 = vmax.f32 %v2443_v17, 0.0 }
 0x3fb   : > { %v3007_v53 = vsel %vm2848_vm5, %v2716_v20, -inf  ;;  %v2450_v3 = vpop.f32.mrf.mxu1  ;;  %v2446_v20 = vadd.f32 %v2445_v24, %v2357_v31 }
 0x3fc   : > { %v10482_v60 = vmax.f32 %v3182_v54, %v3007_v53  ;;  %v2516_v6 = vpop.f32.mrf.mxu2  ;;  %v2605_v30 = vpop.f32.mrf.mxu3  ;;  %v3018_v54 = vsel %vm2851_vm8, %v2727_v58, -inf  ;;  %v2362_v53 = vadd.f32 %v2361_v14, %v10247_v56 }
 0x3fd   : > { %v2517_v2 = vadd.f32 %v2516_v6, %v10370_v0  ;;  %v2363_v46 = vpop.f32.mrf.mxu0  ;;  %v3022_v6 = vsel %vm2852_vm9, %v2731_v62, -inf  ;;  %v3149_v29 = vmax.f32 %v3148_v27, %v3018_v54  ;;  %v2747_v32 = vmax.f32 %v2446_v20, 0.0 }
 0x3fe   : > { %v2364_v21 = vadd.f32 %v2363_v46, %v10247_v56  ;;  %v2451_v14 = vadd.f32 %v2450_v3, %v2362_v53 }
 0x3ff   : > { %v2606_v13 = vadd.f32 %v2605_v30, %v2517_v2  ;;  %v3150_v7 = vmax.f32 %v3149_v29, %v3022_v6  ;;  %v3038_v3 = vsel %vm2856_vm13, %v2747_v32, -inf }
 0x400   : > { %v2755_v31 = vmax.f32 %v2451_v14, 0.0 }
 0x401   : > { %v2720_v19 = vmax.f32 %v2606_v13, 0.0 }
 0x402   : > { %v3046_v27 = vsel %vm2858_vm14, %v2755_v31, -inf }
 0x403   : > { %v2452_v30 = vpop.f32.mrf.mxu1 }
 0x404   : > { %v2519_v5 = vpop.f32.mrf.mxu2  ;;  %v2608_v33 = vpop.f32.mrf.mxu3  ;;  %v2453_v48 = vadd.f32 %v2452_v30, %v2364_v21 }
 0x405   : > { %v2520_v51 = vadd.f32 %v2519_v5, %v10370_v0  ;;  %v3026_v5 = vsel %vm2853_vm10, %v2735_v45, -inf }
 0x406   : > { %v3151_v56 = vmax.f32 %v3150_v7, %v3026_v5 }
 0x407   : > { %v2609_v24 = vadd.f32 %v2608_v33, %v2520_v51  ;;  %v3034_v33 = vsel %vm2855_vm12, %v2743_v57, -inf  ;;  %v13005_v51 = vlaneseq }
 0x408   : > { %v3152_v28 = vmax.f32 %v3151_v56, %v3030_v35 }
 0x409   : > { %v2724_v40 = vmax.f32 %v2609_v24, 0.0 }
 0x40a   : > { %v3153_v49 = vmax.f32 %v3152_v28, %v3034_v33 }
 0x40b   : > { %v3015_v54 = vsel %vm2850_vm7, %v2724_v40, -inf  ;;  %vm3212_vm7 = vcmask 1041408  }
 0x40c   : > { %v2521_v9 = vpop.f32.mrf.mxu2  ;;  %v10484_v12 = vpop.f32.mrf.mxu3  ;;  %v3154_v38 = vmax.f32 %v3153_v49, %v3038_v3 }
 0x40d   : > { %v2522_v55 = vadd.f32 %v2521_v9, %v10370_v0 }
 0x40f   : > { %v2611_v9 = vadd.f32 %v10484_v12, %v2522_v55 }
 0x411   : > { %v2728_v62 = vmax.f32 %v2611_v9, 0.0 }
 0x414   : > { %v2524_v52 = vpop.f32.mrf.mxu2  ;;  %v10486_v8 = vpop.f32.mrf.mxu3 }
 0x415   : > { %v2525_v43 = vadd.f32 %v2524_v52, %v10370_v0 }
 0x417   : > { %v2614_v52 = vadd.f32 %v10486_v8, %v2525_v43  ;;  %v13000_v8 = vld [vmem:[#allocation12_spill] sm:$0xff] }
 0x418   : > { %vm13001_vm3 = vcmp.lt.s32.totalorder %v13000_v8, 600 }
 0x419   : > { %v3042_v26 = vsel %vm13001_vm3, %v2751_v34, -inf  ;;  %v2732_v45 = vmax.f32 %v2614_v52, 0.0  ;;  %vm13004_vm5 = vmmov %vm13001_vm3 }
 0x41a   : > { %v3155_v6 = vmax.f32 %v3154_v38, %v3042_v26 }
 0x41c   : > { %v2526_v15 = vpop.f32.mrf.mxu2  ;;  %v10488_v61 = vpop.f32.mrf.mxu3  ;;  %v3156_v11 = vmax.f32 %v3155_v6, %v3046_v27 }
 0x41d   : > { %v2527_v37 = vadd.f32 %v2526_v15, %v10370_v0  ;;  %v3011_v15 = vsel %vm2849_vm6, %v2720_v19, -inf  ;;  %vm3210_vm6 = vcmask 1042434  }
 0x41f   : > { %v2616_v1 = vadd.f32 %v10488_v61, %v2527_v37  ;;  %v3184_v61 = vmax.f32 %v10482_v60, %v3011_v15 }
 0x421   : > { %v2736_v20 = vmax.f32 %v2616_v1, 0.0  ;;  %v3185_v59 = vmax.f32 %v3184_v61, %v3015_v54 }
 0x423   : > { %v3027_v5 = vsel %vm2853_vm10, %v2736_v20, -inf }
 0x424   : > { %v10492_v25 = vpop.f32.mrf.mxu2  ;;  %v10494_v36 = vpop.f32.mrf.mxu3 }
 0x425   : > { %v2530_v58 = vadd.f32 %v10492_v25, %v10370_v0  ;;  %v2759_v25 = vmax.f32 %v2453_v48, 0.0 }
 0x427   : > { %v2619_v17 = vadd.f32 %v10494_v36, %v2530_v58  ;;  %v3050_v36 = vsel %vm2859_vm15, %v2759_v25, -inf }
 0x428   : > { %v3157_v43 = vmax.f32 %v3156_v11, %v3050_v36 }
 0x429   : > { %v2740_v55 = vmax.f32 %v2619_v17, 0.0  ;;  %v3052_v17 = vld [vmem:[#allocation2] sm:$0xf] }
 0x42a   : > { %v3158_v19 = vrot.slane %v3157_v43, 4 }
 0x42b   : > { %v3031_v32 = vsel %vm2854_vm11, %v2740_v55, -inf }
 0x42c   : > { %v2531_v10 = vpop.f32.mrf.mxu2  ;;  %v10501_v42 = vpop.f32.mrf.mxu3  ;;  %v3159_v33 = vmax.f32 %v3157_v43, %v3158_v19 }
 0x42d   : > { %v2532_v2 = vadd.f32 %v2531_v10, %v10370_v0  ;;  %v3019_v10 = vsel %vm2851_vm8, %v2728_v62, -inf  ;;  %vm3218_vm8 = vcmp.lt.s32.totalorder %v13005_v51, 512 }
 0x42e   : > { %v3186_v60 = vmax.f32 %v3185_v59, %v3019_v10  ;;  %v3160_v31 = vrot.slane %v3159_v33, 2 }
 0x42f   : > { %v2621_v53 = vadd.f32 %v10501_v42, %v2532_v2 }
 0x430   : > { %v3161_v15 = vmax.f32 %v3159_v33, %v3160_v31 }
 0x431   : > { %v2744_v42 = vmax.f32 %v2621_v53, 0.0 }
 0x432   : > { %v3162_v2 = vrot.slane %v3161_v15, 1 }
 0x434   : > { %v2534_v16 = vpop.f32.mrf.mxu2  ;;  %v2623_v4 = vpop.f32.mrf.mxu3  ;;  %v3163_v8 = vmax.f32 %v3161_v15, %v3162_v2 }
 0x435   : > { %v2535_v46 = vadd.f32 %v2534_v16, %v10370_v0  ;;  %v3023_v16 = vsel %vm2852_vm9, %v2732_v45, -inf }
 0x436   : > { %v3187_v7 = vmax.f32 %v3186_v60, %v3023_v16  ;;  %v3206_v54 = vrot.slane %v3163_v8, 6 }
 0x437   : > { %v2624_v29 = vadd.f32 %v2623_v4, %v2535_v46  ;;  %v3035_v4 = vsel %vm2855_vm12, %v2744_v42, -inf }
 0x438   : > { %v3188_v35 = vmax.f32 %v3187_v7, %v3027_v5 }
 0x439   : > { %v2748_v47 = vmax.f32 %v2624_v29, 0.0 }
 0x43a   : > { %v3189_v9 = vmax.f32 %v3188_v35, %v3031_v32 }
 0x43b   : > { %v3039_v18 = vsel %vm2856_vm13, %v2748_v47, -inf }
 0x43c   : > { %v2536_v12 = vpop.f32.mrf.mxu2  ;;  %v2625_v41 = vpop.f32.mrf.mxu3  ;;  %v3190_v56 = vmax.f32 %v3189_v9, %v3035_v4 }
 0x43d   : > { %v2537_v44 = vadd.f32 %v2536_v12, %v10370_v0 }
 0x43e   : > { %v3191_v40 = vmax.f32 %v3190_v56, %v3039_v18 }
 0x43f   : > { %v2626_v57 = vadd.f32 %v2625_v41, %v2537_v44 }
 0x441   : > { %v2752_v30 = vmax.f32 %v2626_v57, 0.0 }
 0x443   : > { %v3043_v48 = vsel %vm13004_vm5, %v2752_v30, -inf }
 0x444   : > { %v2539_v21 = vpop.f32.mrf.mxu2  ;;  %v2628_v63 = vpop.f32.mrf.mxu3  ;;  %v3192_v28 = vmax.f32 %v3191_v40, %v3043_v48 }
 0x445   : > { %v2540_v24 = vadd.f32 %v2539_v21, %v10370_v0 }
 0x447   : > { %v2629_v14 = vadd.f32 %v2628_v63, %v2540_v24 }
 0x449   : > { %v2756_v37 = vmax.f32 %v2629_v14, 0.0 }
 0x44b   : > { %v3047_v39 = vsel %vm2858_vm14, %v2756_v37, -inf }
 0x44c   : > { %v2541_v34 = vpop.f32.mrf.mxu2  ;;  %v2630_v52 = vpop.f32.mrf.mxu3  ;;  %v3193_v23 = vmax.f32 %v3192_v28, %v3047_v39 }
 0x44d   : > { %v2542_v50 = vadd.f32 %v2541_v34, %v10370_v0 }
 0x44f   : > { %v2631_v58 = vadd.f32 %v2630_v52, %v2542_v50 }
 0x451   : > { %v2760_v3 = vmax.f32 %v2631_v58, 0.0 }
 0x453   : > { %v3051_v12 = vsel %vm2859_vm15, %v2760_v3, -inf }
 0x454   : > { %v3194_v41 = vmax.f32 %v3193_v23, %v3051_v12 }
 0x456   : > { %v3195_v62 = vrot.slane %v3194_v41, 4 }
 0x458   : > { %v3196_v1 = vmax.f32 %v3194_v41, %v3195_v62 }
 0x45a   : > { %v3197_v0 = vrot.slane %v3196_v1, 2 }
 0x45c   : > { %v3198_v49 = vmax.f32 %v3196_v1, %v3197_v0 }
 0x45e   : > { %v3199_v26 = vrot.slane %v3198_v49, 1 }
 0x460   : > { %v3200_v25 = vmax.f32 %v3198_v49, %v3199_v26 }
 0x462   : > { %v3207_v45 = vrot.slane %v3200_v25, 5 }
 0x464   : > { %v3211_v46 = vsel %vm3210_vm6, %v3206_v54, %v3207_v45  ;;  %3224 = sbr.rel (%p6829_p5) target bundleno = 1798 (0x706), region = 96 }
 0x465   : > { %v3213_v38 = vsel %vm3212_vm7, %v10391_v22, %v3211_v46 }
 0x466   : > { %v3215_v27 = vmax.f32 %v3052_v17, %v3213_v38 }
 0x468   : > { %3220 = vst.msk [vmem:[#allocation2] sm:$0xf] %vm3218_vm8, %v3215_v27 }
 0x469   : > { %v7056_v61 = vld [vmem:[%s12792_s7 + $0x1c0] sm:$0xf]  ;;  %vm6035_vm9 = vcmask 90112   ;;  %vm5878_vm10 = vcmask 49152   ;;  %vm6211_vm14 = vcmask 0  }
 0x46a   : > { %v8500_v10 = vld [vmem:[%s12792_s7 + $0x1dc] sm:$0xf0] }
 0x46b   : > { %v7312_v20 = vld [vmem:[%s12792_s7 + $0x3c0] sm:$0xf]  ;;  %v7057_v22 = vor.u32 %v8500_v10, %v7056_v61 }
 0x46c   : > { %v8564_v53 = vld [vmem:[%s12792_s7 + $0x3dc] sm:$0xf0] }
 0x46d   : > { %v7568_v44 = vld [vmem:[%s12792_s7 + $0x5c0] sm:$0xf]  ;;  %v7313_v59 = vor.u32 %v8564_v53, %v7312_v20  ;;  %4793 = vmatpush.bf16.msra.mxu0 %v7057_v22 }
 0x46e   : > { %v8628_v6 = vld [vmem:[%s12792_s7 + $0x5dc] sm:$0xf0] }
 0x46f   : > { %v7569_v13 = vor.u32 %v8628_v6, %v7568_v44  ;;  %v7824_v36 = vld [vmem:[%s12792_s7 + $0x7c0] sm:$0xf]  ;;  %4806 = vmatpush.bf16.msra.mxu1 %v7313_v59 }
 0x470   : > { %v8692_v16 = vld [vmem:[%s12792_s7 + $0x7dc] sm:$0xf0] }
 0x471   : > { %v7024_v55 = vld [vmem:[%s12792_s7 + $0x180] sm:$0xf]  ;;  %v7825_v29 = vor.u32 %v8692_v16, %v7824_v36  ;;  %4819 = vmatpush.bf16.msra.mxu2 %v7569_v13 }
 0x472   : > { %v8492_v11 = vld [vmem:[%s12792_s7 + $0x19c] sm:$0xf0] }
 0x473   : > { %v7280_v60 = vld [vmem:[%s12792_s7 + $0x380] sm:$0xf]  ;;  %v7025_v63 = vor.u32 %v8492_v11, %v7024_v55  ;;  %4832 = vmatpush.bf16.msra.mxu3 %v7825_v29 }
 0x474   : > { %v8556_v21 = vld [vmem:[%s12792_s7 + $0x39c] sm:$0xf0] }
 0x475   : > { %v7281_v5 = vor.u32 %v8556_v21, %v7280_v60  ;;  %v7536_v42 = vld [vmem:[%s12792_s7 + $0x580] sm:$0xf]  ;;  %4794 = vmatpush.bf16.msra.mxu0 %v7025_v63 }
 0x476   : > { %v8620_v57 = vld [vmem:[%s12792_s7 + $0x59c] sm:$0xf0] }
 0x477   : > { %v7792_v24 = vld [vmem:[%s12792_s7 + $0x780] sm:$0xf]  ;;  %v7537_v43 = vor.u32 %v8620_v57, %v7536_v42  ;;  %4807 = vmatpush.bf16.msra.mxu1 %v7281_v5 }
 0x478   : > { %v8684_v7 = vld [vmem:[%s12792_s7 + $0x79c] sm:$0xf0] }
 0x479   : > { %v6992_v32 = vld [vmem:[%s12792_s7 + $0x140] sm:$0xf]  ;;  %v7793_v14 = vor.u32 %v8684_v7, %v7792_v24  ;;  %4820 = vmatpush.bf16.msra.mxu2 %v7537_v43 }
 0x47a   : > { %v8484_v47 = vld [vmem:[%s12792_s7 + $0x15c] sm:$0xf0] }
 0x47b   : > { %v7248_v35 = vld [vmem:[%s12792_s7 + $0x340] sm:$0xf]  ;;  %v6993_v19 = vor.u32 %v8484_v47, %v6992_v32  ;;  %4833 = vmatpush.bf16.msra.mxu3 %v7793_v14 }
 0x47c   : > { %v8548_v4 = vld [vmem:[%s12792_s7 + $0x35c] sm:$0xf0] }
 0x47d   : > { %v7504_v30 = vld [vmem:[%s12792_s7 + $0x540] sm:$0xf]  ;;  %v7249_v56 = vor.u32 %v8548_v4, %v7248_v35  ;;  %4795 = vmatpush.bf16.msra.mxu0 %v6993_v19  ;;  %v7058_v19 = vld [vmem:[%s12792_s7 + $0x1e0] sm:$0xf0] }
 0x47e   : > { %v8612_v9 = vld [vmem:[%s12792_s7 + $0x55c] sm:$0xf0] }
 0x47f   : > { %v7760_v18 = vld [vmem:[%s12792_s7 + $0x740] sm:$0xf]  ;;  %v7505_v34 = vor.u32 %v8612_v9, %v7504_v30  ;;  %4808 = vmatpush.bf16.msra.mxu1 %v7249_v56  ;;  %v8496_v30 = vld [vmem:[%s12792_s7 + $0x1c4] sm:$0xf] }
 0x480   : > { %v8676_v37 = vld [vmem:[%s12792_s7 + $0x75c] sm:$0xf0]  ;;  %v8560_v9 = vld [vmem:[%s12792_s7 + $0x3c4] sm:$0xf] }
 0x481   : > { %v6960_v48 = vld [vmem:[%s12792_s7 + $0x100] sm:$0xf]  ;;  %v7761_v40 = vor.u32 %v8676_v37, %v7760_v18  ;;  %4821 = vmatpush.bf16.msra.mxu2 %v7505_v34  ;;  %v7314_v37 = vld [vmem:[%s12792_s7 + $0x3e0] sm:$0xf0] }
 0x482   : > { %v8476_v50 = vld [vmem:[%s12792_s7 + $0x11c] sm:$0xf0]  ;;  %v8624_v56 = vld [vmem:[%s12792_s7 + $0x5c4] sm:$0xf] }
 0x483   : > { %v7216_v33 = vld [vmem:[%s12792_s7 + $0x300] sm:$0xf]  ;;  %v6961_v31 = vor.u32 %v8476_v50, %v6960_v48  ;;  %4834 = vmatpush.bf16.msra.mxu3 %v7761_v40  ;;  %v7570_v34 = vld [vmem:[%s12792_s7 + $0x5e0] sm:$0xf0] }
 0x484   : > { %v8540_v52 = vld [vmem:[%s12792_s7 + $0x31c] sm:$0xf0]  ;;  %v7826_v40 = vld [vmem:[%s12792_s7 + $0x7e0] sm:$0xf0] }
 0x485   : > { %v7472_v39 = vld [vmem:[%s12792_s7 + $0x500] sm:$0xf]  ;;  %v7217_v23 = vor.u32 %v8540_v52, %v7216_v33  ;;  %4796 = vmatpush.bf16.msra.mxu0 %v6961_v31  ;;  %v8688_v33 = vld [vmem:[%s12792_s7 + $0x7c4] sm:$0xf] }
 0x486   : > { %v8604_v58 = vld [vmem:[%s12792_s7 + $0x51c] sm:$0xf0]  ;;  %v7026_v31 = vld [vmem:[%s12792_s7 + $0x1a0] sm:$0xf0] }
 0x487   : > { %v7728_v28 = vld [vmem:[%s12792_s7 + $0x700] sm:$0xf]  ;;  %v7473_v12 = vor.u32 %v8604_v58, %v7472_v39  ;;  %4809 = vmatpush.bf16.msra.mxu1 %v7217_v23  ;;  %v7061_v39 = vor.u32 %v8496_v30, %v7058_v19  ;;  %v7317_v58 = vor.u32 %v8560_v9, %v7314_v37  ;;  %v8552_v23 = vld [vmem:[%s12792_s7 + $0x384] sm:$0xf] }
 0x488   : > { %v8668_v3 = vld [vmem:[%s12792_s7 + $0x71c] sm:$0xf0]  ;;  %v8592_v30 = vld [vmem:[%s12792_s7 + $0x4c4] sm:$0xf] }
 0x489   : > { %v6928_v41 = vld [vmem:[%s12792_s7 + $0xc0] sm:$0xf]  ;;  %v7729_v1 = vor.u32 %v8668_v3, %v7728_v28  ;;  %4822 = vmatpush.bf16.msra.mxu2 %v7473_v12  ;;  %v7573_v28 = vor.u32 %v8624_v56, %v7570_v34  ;;  %v8488_v3 = vld [vmem:[%s12792_s7 + $0x184] sm:$0xf]  ;;  %v7829_v12 = vor.u32 %v8688_v33, %v7826_v40 }
 0x48a   : > { %v8468_v15 = vld [vmem:[%s12792_s7 + $0xdc] sm:$0xf0]  ;;  %v7442_v19 = vld [vmem:[%s12792_s7 + $0x4e0] sm:$0xf0] }
 0x48b   : > { %v7184_v62 = vld [vmem:[%s12792_s7 + $0x2c0] sm:$0xf]  ;;  %v6929_v25 = vor.u32 %v8468_v15, %v6928_v41  ;;  %4835 = vmatpush.bf16.msra.mxu3 %v7729_v1  ;;  %v7282_v41 = vld [vmem:[%s12792_s7 + $0x3a0] sm:$0xf0] }
 0x48c   : > { %v8532_v2 = vld [vmem:[%s12792_s7 + $0x2dc] sm:$0xf0]  ;;  %v8616_v15 = vld [vmem:[%s12792_s7 + $0x584] sm:$0xf] }
 0x48d   : > { %v7440_v0 = vld [vmem:[%s12792_s7 + $0x4c0] sm:$0xf]  ;;  %v7185_v54 = vor.u32 %v8532_v2, %v7184_v62  ;;  %4797 = vmatpush.bf16.msra.mxu0 %v6929_v25  ;;  %v7538_v62 = vld [vmem:[%s12792_s7 + $0x5a0] sm:$0xf0] }
 0x48e   : > { %v8596_v49 = vld [vmem:[%s12792_s7 + $0x4dc] sm:$0xf0]  ;;  %v8680_v1 = vld [vmem:[%s12792_s7 + $0x784] sm:$0xf] }
 0x48f   : > { %v7696_v8 = vld [vmem:[%s12792_s7 + $0x6c0] sm:$0xf]  ;;  %v7441_v45 = vor.u32 %v8596_v49, %v7440_v0  ;;  %4810 = vmatpush.bf16.msra.mxu1 %v7185_v54  ;;  %v7794_v2 = vld [vmem:[%s12792_s7 + $0x7a0] sm:$0xf0]  ;;  %v7029_v0 = vor.u32 %v8488_v3, %v7026_v31 }
 0x490   : > { %v8660_v26 = vld [vmem:[%s12792_s7 + $0x6dc] sm:$0xf0]  ;;  %v8480_v49 = vld [vmem:[%s12792_s7 + $0x144] sm:$0xf] }
 0x491   : > { %v6896_v17 = vld [vmem:[%s12792_s7 + $0x80] sm:$0xf]  ;;  %v7697_v51 = vor.u32 %v8660_v26, %v7696_v8  ;;  %4823 = vmatpush.bf16.msra.mxu2 %v7441_v45  ;;  %v7285_v8 = vor.u32 %v8552_v23, %v7282_v41  ;;  %v7541_v26 = vor.u32 %v8616_v15, %v7538_v62  ;;  %v6994_v25 = vld [vmem:[%s12792_s7 + $0x160] sm:$0xf0] }
 0x492   : > { %v8460_v46 = vld [vmem:[%s12792_s7 + $0x9c] sm:$0xf0]  ;;  %v8544_v54 = vld [vmem:[%s12792_s7 + $0x344] sm:$0xf] }
 0x493   : > { %v7152_v38 = vld [vmem:[%s12792_s7 + $0x280] sm:$0xf]  ;;  %v6897_v53 = vor.u32 %v8460_v46, %v6896_v17  ;;  %4836 = vmatpush.bf16.msra.mxu3 %v7697_v51  ;;  %v7250_v45 = vld [vmem:[%s12792_s7 + $0x360] sm:$0xf0]  ;;  %v7797_v17 = vor.u32 %v8680_v1, %v7794_v2 }
 0x494   : > { %v8524_v27 = vld [vmem:[%s12792_s7 + $0x29c] sm:$0xf0]  ;;  %v8608_v46 = vld [vmem:[%s12792_s7 + $0x544] sm:$0xf] }
 0x495   : > { %v7408_v61 = vld [vmem:[%s12792_s7 + $0x480] sm:$0xf]  ;;  %v7153_v44 = vor.u32 %v8524_v27, %v7152_v38  ;;  %4798 = vmatpush.bf16.msra.mxu0 %v6897_v53  ;;  %v7506_v38 = vld [vmem:[%s12792_s7 + $0x560] sm:$0xf0] }
 0x496   : > { %v8588_v10 = vld [vmem:[%s12792_s7 + $0x49c] sm:$0xf0]  ;;  %v8672_v51 = vld [vmem:[%s12792_s7 + $0x744] sm:$0xf] }
 0x497   : > { %v7664_v20 = vld [vmem:[%s12792_s7 + $0x680] sm:$0xf]  ;;  %v7409_v6 = vor.u32 %v8588_v10, %v7408_v61  ;;  %4811 = vmatpush.bf16.msra.mxu1 %v7153_v44  ;;  %v7762_v27 = vld [vmem:[%s12792_s7 + $0x760] sm:$0xf0]  ;;  %v6997_v61 = vor.u32 %v8480_v49, %v6994_v25  ;;  %v7253_v10 = vor.u32 %v8544_v54, %v7250_v45  ;;  %v7509_v44 = vor.u32 %v8608_v46, %v7506_v38 }
 0x498   : > { %v8652_v22 = vld [vmem:[%s12792_s7 + $0x69c] sm:$0xf0]  ;;  %v7698_v37 = vld [vmem:[%s12792_s7 + $0x6e0] sm:$0xf0] }
 0x499   : > { %v6864_v59 = vld [vmem:[%s12792_s7 + $0x40] sm:$0xf]  ;;  %v7665_v16 = vor.u32 %v8652_v22, %v7664_v20  ;;  %4824 = vmatpush.bf16.msra.mxu2 %v7409_v6  ;;  %v8472_v20 = vld [vmem:[%s12792_s7 + $0x104] sm:$0xf] }
 0x49a   : > { %v8452_v13 = vld [vmem:[%s12792_s7 + $0x5c] sm:$0xf0]  ;;  %v6962_v22 = vld [vmem:[%s12792_s7 + $0x120] sm:$0xf0] }
 0x49b   : > { %v7120_v36 = vld [vmem:[%s12792_s7 + $0x240] sm:$0xf]  ;;  %v6865_v63 = vor.u32 %v8452_v13, %v6864_v59  ;;  %4837 = vmatpush.bf16.msra.mxu3 %v7665_v16  ;;  %v8536_v6 = vld [vmem:[%s12792_s7 + $0x304] sm:$0xf]  ;;  %v7765_v16 = vor.u32 %v8672_v51, %v7762_v27 }
 0x49c   : > { %v8516_v55 = vld [vmem:[%s12792_s7 + $0x25c] sm:$0xf0]  ;;  %v6898_v33 = vld [vmem:[%s12792_s7 + $0xa0] sm:$0xf0] }
 0x49d   : > { %v7376_v29 = vld [vmem:[%s12792_s7 + $0x440] sm:$0xf]  ;;  %v7121_v57 = vor.u32 %v8516_v55, %v7120_v36  ;;  %4799 = vmatpush.bf16.msra.mxu0 %v6865_v63  ;;  %v7218_v55 = vld [vmem:[%s12792_s7 + $0x320] sm:$0xf0] }
 0x49e   : > { %v8580_v11 = vld [vmem:[%s12792_s7 + $0x45c] sm:$0xf0]  ;;  %v8520_v40 = vld [vmem:[%s12792_s7 + $0x284] sm:$0xf] }
 0x49f   : > { %v7632_v60 = vld [vmem:[%s12792_s7 + $0x640] sm:$0xf]  ;;  %v7377_v24 = vor.u32 %v8580_v11, %v7376_v29  ;;  %4812 = vmatpush.bf16.msra.mxu1 %v7121_v57  ;;  %v8600_v29 = vld [vmem:[%s12792_s7 + $0x504] sm:$0xf]  ;;  %v6965_v57 = vor.u32 %v8472_v20, %v6962_v22 }
 0x4a0   : > { %v8644_v21 = vld [vmem:[%s12792_s7 + $0x65c] sm:$0xf0]  ;;  %v7474_v11 = vld [vmem:[%s12792_s7 + $0x520] sm:$0xf0] }
 0x4a1   : > { %v6832_v5 = vld [vmem:[%s12792_s7] sm:$0xf]  ;;  %v7633_v47 = vor.u32 %v8644_v21, %v7632_v60  ;;  %4825 = vmatpush.bf16.msra.mxu2 %v7377_v24  ;;  %v8664_v60 = vld [vmem:[%s12792_s7 + $0x704] sm:$0xf] }
 0x4a2   : > { %v8444_v42 = vld [vmem:[%s12792_s7 + $0x1c] sm:$0xf0]  ;;  %v7730_v21 = vld [vmem:[%s12792_s7 + $0x720] sm:$0xf0] }
 0x4a3   : > { %v7088_v43 = vld [vmem:[%s12792_s7 + $0x200] sm:$0xf]  ;;  %v6833_v18 = vor.u32 %v8444_v42, %v6832_v5  ;;  %4838 = vmatpush.bf16.msra.mxu3 %v7633_v47  ;;  %v6930_v47 = vld [vmem:[%s12792_s7 + $0xe0] sm:$0xf0] }
 0x4a4   : > { %v8508_v7 = vld [vmem:[%s12792_s7 + $0x21c] sm:$0xf0]  ;;  %v8648_v3 = vld [vmem:[%s12792_s7 + $0x684] sm:$0xf] }
 0x4a5   : > { %v7344_v32 = vld [vmem:[%s12792_s7 + $0x400] sm:$0xf]  ;;  %v7089_v48 = vor.u32 %v8508_v7, %v7088_v43  ;;  %4800 = vmatpush.bf16.msra.mxu0 %v6833_v18  ;;  %v7221_v43 = vor.u32 %v8536_v6, %v7218_v55  ;;  %v7477_v7 = vor.u32 %v8600_v29, %v7474_v11  ;;  %v8656_v18 = vld [vmem:[%s12792_s7 + $0x6c4] sm:$0xf]  ;;  %v8501_v6 = vld [vmem:[%s12792_s7 + $0x1e4] sm:$0xf0] }
 0x4a6   : > { %v8572_v14 = vld [vmem:[%s12792_s7 + $0x41c] sm:$0xf0]  ;;  %v7666_v31 = vld [vmem:[%s12792_s7 + $0x6a0] sm:$0xf0]  ;;  %v8629_v55 = vld [vmem:[%s12792_s7 + $0x5e4] sm:$0xf0] }
 0x4a7   : > { %v7600_v35 = vld [vmem:[%s12792_s7 + $0x600] sm:$0xf]  ;;  %v7345_v50 = vor.u32 %v8572_v14, %v7344_v32  ;;  %4813 = vmatpush.bf16.msra.mxu1 %v7089_v48  ;;  %v8464_v32 = vld [vmem:[%s12792_s7 + $0xc4] sm:$0xf]  ;;  %v7445_v48 = vor.u32 %v8592_v30, %v7442_v19  ;;  %v7669_v2 = vor.u32 %v8648_v3, %v7666_v31  ;;  %v7544_v30 = vld [vmem:[%s12792_s7 + $0x588] sm:$0xf] }
 0x4a8   : > { %v8636_v4 = vld [vmem:[%s12792_s7 + $0x61c] sm:$0xf0]  ;;  %v8528_v14 = vld [vmem:[%s12792_s7 + $0x2c4] sm:$0xf]  ;;  %v6933_v56 = vor.u32 %v8464_v32, %v6930_v47  ;;  %v7032_v32 = vld [vmem:[%s12792_s7 + $0x188] sm:$0xf] }
 0x4a9   : > { %v7601_v52 = vor.u32 %v8636_v4, %v7600_v35  ;;  %4826 = vmatpush.bf16.msra.mxu2 %v7345_v50  ;;  %4845 = vmatpush.bf16.msrb.mxu0 %v7061_v39  ;;  %v3225_v53 = vld [vmem:[#allocation2] sm:$0xf]  ;;  %v7733_v35 = vor.u32 %v8664_v60, %v7730_v21  ;;  %v7186_v4 = vld [vmem:[%s12792_s7 + $0x2e0] sm:$0xf0]  ;;  %v7832_v60 = vld [vmem:[%s12792_s7 + $0x7c8] sm:$0xf] }
 0x4aa   : > { %v3229_v59 = vperm.slane %v3225_v53, 2  ;;  %v3227_v13 = vperm.slane %v3225_v53, 0  ;;  %v3230_v36 = vperm.slane %v3225_v53, 3  ;;  %v3228_v24 = vperm.slane %v3225_v53, 1  ;;  %v8456_v50 = vld [vmem:[%s12792_s7 + $0x84] sm:$0xf] }
 0x4ab   : > { %4839 = vmatpush.bf16.msra.mxu3 %v7601_v52  ;;  %4858 = vmatpush.bf16.msrb.mxu1 %v7317_v58  ;;  %v7189_v34 = vor.u32 %v8528_v14, %v7186_v4  ;;  %v7701_v52 = vor.u32 %v8656_v18, %v7698_v37  ;;  %v7154_v39 = vld [vmem:[%s12792_s7 + $0x2a0] sm:$0xf0]  ;;  %v6901_v23 = vor.u32 %v8456_v50, %v6898_v33  ;;  %v8693_v21 = vld [vmem:[%s12792_s7 + $0x7e4] sm:$0xf0] }
 0x4ac   : > { %v10863_v63 = vpack.c.bf16 %v3229_v59, %v3229_v59  ;;  %v10865_v5 = vpack.c.bf16 %v3227_v13, %v3227_v13  ;;  %v10867_v42 = vpack.c.bf16 %v3230_v36, %v3230_v36  ;;  %v10888_v9 = vpack.c.bf16 %v3228_v24, %v3228_v24  ;;  %v8584_v58 = vld [vmem:[%s12792_s7 + $0x484] sm:$0xf]  ;;  %v7320_v59 = vld [vmem:[%s12792_s7 + $0x3c8] sm:$0xf] }
 0x4ad   : > { %4871 = vmatpush.bf16.msrb.mxu2 %v7573_v28  ;;  %4846 = vmatpush.bf16.msrb.mxu0 %v7029_v0  ;;  %v7410_v28 = vld [vmem:[%s12792_s7 + $0x4a0] sm:$0xf0]  ;;  %v8565_v36 = vld [vmem:[%s12792_s7 + $0x3e4] sm:$0xf0] }
 0x4ae   : > { %4827 = vmatmul.bf16.vlgmr.msra.gmra.mxu2 %v10863_v63  ;;  %4801 = vmatmul.bf16.vlgmr.msra.gmra.mxu0 %v10865_v5  ;;  %v7413_v41 = vor.u32 %v8584_v58, %v7410_v28  ;;  %v8448_v15 = vld [vmem:[%s12792_s7 + $0x44] sm:$0xf]  ;;  %v8493_v47 = vld [vmem:[%s12792_s7 + $0x1a4] sm:$0xf0] }
 0x4af   : > { %4884 = vmatpush.bf16.msrb.mxu3 %v7829_v12  ;;  %4859 = vmatpush.bf16.msrb.mxu1 %v7285_v8  ;;  %v7157_v12 = vor.u32 %v8520_v40, %v7154_v39  ;;  %v6866_v62 = vld [vmem:[%s12792_s7 + $0x60] sm:$0xf0]  ;;  %v7288_v14 = vld [vmem:[%s12792_s7 + $0x388] sm:$0xf] }
 0x4b0   : > { %4840 = vmatmul.bf16.vlgmr.msra.gmra.mxu3 %v10867_v42  ;;  %4814 = vmatmul.bf16.vlgmr.msra.gmra.mxu1 %v10888_v9  ;;  %v8512_v1 = vld [vmem:[%s12792_s7 + $0x244] sm:$0xf]  ;;  %v6869_v54 = vor.u32 %v8448_v15, %v6866_v62  ;;  %v8557_v4 = vld [vmem:[%s12792_s7 + $0x3a4] sm:$0xf0] }
 0x4b1   : > { %4872 = vmatpush.bf16.msrb.mxu2 %v7541_v26  ;;  %4847 = vmatpush.bf16.msrb.mxu0 %v6997_v61  ;;  %v7122_v0 = vld [vmem:[%s12792_s7 + $0x260] sm:$0xf0]  ;;  %v8621_v19 = vld [vmem:[%s12792_s7 + $0x5a4] sm:$0xf0] }
 0x4b2   : > { %v8576_v49 = vld [vmem:[%s12792_s7 + $0x444] sm:$0xf]  ;;  %v7125_v46 = vor.u32 %v8512_v1, %v7122_v0  ;;  %v7800_v18 = vld [vmem:[%s12792_s7 + $0x788] sm:$0xf] }
 0x4b3   : > { %4885 = vmatpush.bf16.msrb.mxu3 %v7797_v17  ;;  %4860 = vmatpush.bf16.msrb.mxu1 %v7253_v10  ;;  %v7378_v8 = vld [vmem:[%s12792_s7 + $0x460] sm:$0xf0]  ;;  %v8685_v37 = vld [vmem:[%s12792_s7 + $0x7a4] sm:$0xf0] }
 0x4b4   : > { %v8640_v26 = vld [vmem:[%s12792_s7 + $0x644] sm:$0xf]  ;;  %v7381_v38 = vor.u32 %v8576_v49, %v7378_v8  ;;  %v7000_v50 = vld [vmem:[%s12792_s7 + $0x148] sm:$0xf] }
 0x4b5   : > { %4873 = vmatpush.bf16.msrb.mxu2 %v7509_v44  ;;  %4848 = vmatpush.bf16.msrb.mxu0 %v6965_v57  ;;  %v7634_v25 = vld [vmem:[%s12792_s7 + $0x660] sm:$0xf0]  ;;  %v7064_v44 = vld [vmem:[%s12792_s7 + $0x1c8] sm:$0xf] }
 0x4b6   : > { %v8440_v45 = vld [vmem:[%s12792_s7 + $0x4] sm:$0xf]  ;;  %v7637_v10 = vor.u32 %v8640_v26, %v7634_v25  ;;  %v7065_v24 = vor.u32 %v8501_v6, %v7064_v44  ;;  %v8485_v33 = vld [vmem:[%s12792_s7 + $0x164] sm:$0xf0] }
 0x4b7   : > { %4886 = vmatpush.bf16.msrb.mxu3 %v7765_v16  ;;  %4861 = vmatpush.bf16.msrb.mxu1 %v7221_v43  ;;  %v6834_v17 = vld [vmem:[%s12792_s7 + $0x20] sm:$0xf0]  ;;  %v7576_v16 = vld [vmem:[%s12792_s7 + $0x5c8] sm:$0xf]  ;;  %v7321_v43 = vor.u32 %v8565_v36, %v7320_v59 }
 0x4b8   : > { %v8504_v51 = vld [vmem:[%s12792_s7 + $0x204] sm:$0xf]  ;;  %v6837_v13 = vor.u32 %v8440_v45, %v6834_v17  ;;  %v7256_v40 = vld [vmem:[%s12792_s7 + $0x348] sm:$0xf] }
 0x4b9   : > { %4874 = vmatpush.bf16.msrb.mxu2 %v7477_v7  ;;  %4849 = vmatpush.bf16.msrb.mxu0 %v6933_v56  ;;  %v7090_v27 = vld [vmem:[%s12792_s7 + $0x220] sm:$0xf0]  ;;  %v7577_v7 = vor.u32 %v8629_v55, %v7576_v16  ;;  %v7033_v56 = vor.u32 %v8493_v47, %v7032_v32  ;;  %v8549_v39 = vld [vmem:[%s12792_s7 + $0x364] sm:$0xf0] }
 0x4ba   : > { %v8568_v61 = vld [vmem:[%s12792_s7 + $0x404] sm:$0xf]  ;;  %v7093_v29 = vor.u32 %v8504_v51, %v7090_v27  ;;  %v7512_v58 = vld [vmem:[%s12792_s7 + $0x548] sm:$0xf] }
 0x4bb   : > { %4887 = vmatpush.bf16.msrb.mxu3 %v7733_v35  ;;  %4862 = vmatpush.bf16.msrb.mxu1 %v7189_v34  ;;  %v7346_v20 = vld [vmem:[%s12792_s7 + $0x420] sm:$0xf0]  ;;  %v7833_v35 = vor.u32 %v8693_v21, %v7832_v60  ;;  %v7289_v34 = vor.u32 %v8557_v4, %v7288_v14  ;;  %v8613_v28 = vld [vmem:[%s12792_s7 + $0x564] sm:$0xf0] }
 0x4bc   : > { %v8632_v22 = vld [vmem:[%s12792_s7 + $0x604] sm:$0xf]  ;;  %v7349_v11 = vor.u32 %v8568_v61, %v7346_v20  ;;  %v7768_v3 = vld [vmem:[%s12792_s7 + $0x748] sm:$0xf] }
 0x4bd   : > { %4875 = vmatpush.bf16.msrb.mxu2 %v7445_v48  ;;  %4850 = vmatpush.bf16.msrb.mxu0 %v6901_v23  ;;  %v7602_v53 = vld [vmem:[%s12792_s7 + $0x620] sm:$0xf0]  ;;  %v7545_v48 = vor.u32 %v8621_v19, %v7544_v30  ;;  %v8677_v31 = vld [vmem:[%s12792_s7 + $0x764] sm:$0xf0]  ;;  %v7001_v23 = vor.u32 %v8485_v33, %v7000_v50 }
 0x4be   : > { %v7605_v57 = vor.u32 %v8632_v22, %v7602_v53  ;;  %v6968_v15 = vld [vmem:[%s12792_s7 + $0x108] sm:$0xf] }
 0x4bf   : > { %4888 = vmatpush.bf16.msrb.mxu3 %v7701_v52  ;;  %4863 = vmatpush.bf16.msrb.mxu1 %v7157_v12  ;;  %v7801_v52 = vor.u32 %v8685_v37, %v7800_v18  ;;  %v7257_v12 = vor.u32 %v8549_v39, %v7256_v40  ;;  %v8477_v62 = vld [vmem:[%s12792_s7 + $0x124] sm:$0xf0] }
 0x4c0   : > { %v7224_v1 = vld [vmem:[%s12792_s7 + $0x308] sm:$0xf] }
 0x4c1   : > { %4876 = vmatpush.bf16.msrb.mxu2 %v7413_v41  ;;  %4851 = vmatpush.bf16.msrb.mxu0 %v6869_v54  ;;  %v7513_v41 = vor.u32 %v8613_v28, %v7512_v58  ;;  %v8541_v0 = vld [vmem:[%s12792_s7 + $0x324] sm:$0xf0]  ;;  %v6969_v54 = vor.u32 %v8477_v62, %v6968_v15  ;;  %v7322_v62 = vld [vmem:[%s12792_s7 + $0x3e8] sm:$0xf0] }
 0x4c2   : > { %v7480_v49 = vld [vmem:[%s12792_s7 + $0x508] sm:$0xf]  ;;  %v7225_v45 = vor.u32 %v8541_v0, %v7224_v1  ;;  %v8625_v1 = vld [vmem:[%s12792_s7 + $0x5cc] sm:$0xf] }
 0x4c3   : > { %4889 = vmatpush.bf16.msrb.mxu3 %v7669_v2  ;;  %4864 = vmatpush.bf16.msrb.mxu1 %v7125_v46  ;;  %v7769_v2 = vor.u32 %v8677_v31, %v7768_v3  ;;  %v8605_v8 = vld [vmem:[%s12792_s7 + $0x524] sm:$0xf0] }
 0x4c4   : > { %v7736_v26 = vld [vmem:[%s12792_s7 + $0x708] sm:$0xf]  ;;  %v7481_v17 = vor.u32 %v8605_v8, %v7480_v49  ;;  %v8689_v8 = vld [vmem:[%s12792_s7 + $0x7cc] sm:$0xf] }
 0x4c5   : > { %4877 = vmatpush.bf16.msrb.mxu2 %v7381_v38  ;;  %4852 = vmatpush.bf16.msrb.mxu0 %v6837_v13  ;;  %v8669_v25 = vld [vmem:[%s12792_s7 + $0x724] sm:$0xf0] }
 0x4c6   : > { %v6936_v46 = vld [vmem:[%s12792_s7 + $0xc8] sm:$0xf]  ;;  %v7737_v27 = vor.u32 %v8669_v25, %v7736_v26  ;;  %v7834_v26 = vld [vmem:[%s12792_s7 + $0x7e8] sm:$0xf0] }
 0x4c7   : > { %4890 = vmatpush.bf16.msrb.mxu3 %v7637_v10  ;;  %4865 = vmatpush.bf16.msrb.mxu1 %v7093_v29  ;;  %v8469_v38 = vld [vmem:[%s12792_s7 + $0xe4] sm:$0xf0] }
 0x4c8   : > { %4853 = vmatmul.bf16.vlgmr.msrb.gmra.mxu0 %v10865_v5  ;;  %v7192_v51 = vld [vmem:[%s12792_s7 + $0x2c8] sm:$0xf]  ;;  %v6937_v44 = vor.u32 %v8469_v38, %v6936_v46  ;;  %v8489_v46 = vld [vmem:[%s12792_s7 + $0x18c] sm:$0xf] }
 0x4c9   : > { %4878 = vmatpush.bf16.msrb.mxu2 %v7349_v11  ;;  %4897 = vmatpush.bf16.msra.mxu0 %v7065_v24  ;;  %v8533_v61 = vld [vmem:[%s12792_s7 + $0x2e4] sm:$0xf0]  ;;  %v7034_v38 = vld [vmem:[%s12792_s7 + $0x1a8] sm:$0xf0] }
 0x4ca   : > { %4866 = vmatmul.bf16.vlgmr.msrb.gmra.mxu1 %v10888_v9  ;;  %v7448_v10 = vld [vmem:[%s12792_s7 + $0x4c8] sm:$0xf]  ;;  %v7193_v6 = vor.u32 %v8533_v61, %v7192_v51  ;;  %v8553_v51 = vld [vmem:[%s12792_s7 + $0x38c] sm:$0xf] }
 0x4cb   : > { %4891 = vmatpush.bf16.msrb.mxu3 %v7605_v57  ;;  %4910 = vmatpush.bf16.msra.mxu1 %v7321_v43  ;;  %v8597_v20 = vld [vmem:[%s12792_s7 + $0x4e4] sm:$0xf0]  ;;  %v7290_v61 = vld [vmem:[%s12792_s7 + $0x3a8] sm:$0xf0] }
 0x4cc   : > { %4879 = vmatmul.bf16.vlgmr.msrb.gmra.mxu2 %v10863_v63  ;;  %v7704_v22 = vld [vmem:[%s12792_s7 + $0x6c8] sm:$0xf]  ;;  %v7449_v59 = vor.u32 %v8597_v20, %v7448_v10  ;;  %v8617_v10 = vld [vmem:[%s12792_s7 + $0x58c] sm:$0xf] }
 0x4cd   : > { %4923 = vmatpush.bf16.msra.mxu2 %v7577_v7  ;;  %4898 = vmatpush.bf16.msra.mxu0 %v7033_v56  ;;  %v8661_v53 = vld [vmem:[%s12792_s7 + $0x6e4] sm:$0xf0]  ;;  %v7546_v20 = vld [vmem:[%s12792_s7 + $0x5a8] sm:$0xf0] }
 0x4ce   : > { %4892 = vmatmul.bf16.vlgmr.msrb.gmra.mxu3 %v10867_v42  ;;  %v6904_v13 = vld [vmem:[%s12792_s7 + $0x88] sm:$0xf]  ;;  %v7705_v55 = vor.u32 %v8661_v53, %v7704_v22  ;;  %v8681_v22 = vld [vmem:[%s12792_s7 + $0x78c] sm:$0xf] }
 0x4cf   : > { %4936 = vmatpush.bf16.msra.mxu3 %v7833_v35  ;;  %4911 = vmatpush.bf16.msra.mxu1 %v7289_v34  ;;  %v8461_v36 = vld [vmem:[%s12792_s7 + $0xa4] sm:$0xf0]  ;;  %v7802_v53 = vld [vmem:[%s12792_s7 + $0x7a8] sm:$0xf0] }
 0x4d0   : > { %v7160_v16 = vld [vmem:[%s12792_s7 + $0x288] sm:$0xf]  ;;  %v6905_v24 = vor.u32 %v8461_v36, %v6904_v13  ;;  %v8481_v13 = vld [vmem:[%s12792_s7 + $0x14c] sm:$0xf] }
 0x4d1   : > { %4924 = vmatpush.bf16.msra.mxu2 %v7545_v48  ;;  %4899 = vmatpush.bf16.msra.mxu0 %v7001_v23  ;;  %v8525_v29 = vld [vmem:[%s12792_s7 + $0x2a4] sm:$0xf0]  ;;  %v8497_v23 = vld [vmem:[%s12792_s7 + $0x1cc] sm:$0xf] }
 0x4d2   : > { %v7416_v11 = vld [vmem:[%s12792_s7 + $0x488] sm:$0xf]  ;;  %v7161_v43 = vor.u32 %v8525_v29, %v7160_v16  ;;  %v7002_v36 = vld [vmem:[%s12792_s7 + $0x168] sm:$0xf0] }
 0x4d3   : > { %4937 = vmatpush.bf16.msra.mxu3 %v7801_v52  ;;  %4912 = vmatpush.bf16.msra.mxu1 %v7257_v12  ;;  %v8589_v60 = vld [vmem:[%s12792_s7 + $0x4a4] sm:$0xf0]  ;;  %v7066_v12 = vld [vmem:[%s12792_s7 + $0x1e8] sm:$0xf0] }
 0x4d4   : > { %v7672_v21 = vld [vmem:[%s12792_s7 + $0x688] sm:$0xf]  ;;  %v7417_v7 = vor.u32 %v8589_v60, %v7416_v11  ;;  %v8545_v16 = vld [vmem:[%s12792_s7 + $0x34c] sm:$0xf] }
 0x4d5   : > { %4925 = vmatpush.bf16.msra.mxu2 %v7513_v41  ;;  %4900 = vmatpush.bf16.msra.mxu0 %v6969_v54  ;;  %v8653_v57 = vld [vmem:[%s12792_s7 + $0x6a4] sm:$0xf0]  ;;  %v8561_v41 = vld [vmem:[%s12792_s7 + $0x3cc] sm:$0xf]  ;;  %v7069_v54 = vor.u32 %v8497_v23, %v7066_v12 }
 0x4d6   : > { %v6872_v32 = vld [vmem:[%s12792_s7 + $0x48] sm:$0xf]  ;;  %v7673_v35 = vor.u32 %v8653_v57, %v7672_v21  ;;  %v7258_v29 = vld [vmem:[%s12792_s7 + $0x368] sm:$0xf0] }
 0x4d7   : > { %4938 = vmatpush.bf16.msra.mxu3 %v7769_v2  ;;  %4913 = vmatpush.bf16.msra.mxu1 %v7225_v45  ;;  %v8453_v47 = vld [vmem:[%s12792_s7 + $0x64] sm:$0xf0]  ;;  %v7578_v2 = vld [vmem:[%s12792_s7 + $0x5e8] sm:$0xf0]  ;;  %v7325_v45 = vor.u32 %v8561_v41, %v7322_v62 }
 0x4d8   : > { %v7128_v14 = vld [vmem:[%s12792_s7 + $0x248] sm:$0xf]  ;;  %v6873_v56 = vor.u32 %v8453_v47, %v6872_v32  ;;  %v8609_v11 = vld [vmem:[%s12792_s7 + $0x54c] sm:$0xf] }
 0x4d9   : > { %4926 = vmatpush.bf16.msra.mxu2 %v7481_v17  ;;  %4901 = vmatpush.bf16.msra.mxu0 %v6937_v44  ;;  %v8517_v4 = vld [vmem:[%s12792_s7 + $0x264] sm:$0xf0]  ;;  %v7581_v17 = vor.u32 %v8625_v1, %v7578_v2  ;;  %v7037_v44 = vor.u32 %v8489_v46, %v7034_v38  ;;  %v7514_v60 = vld [vmem:[%s12792_s7 + $0x568] sm:$0xf0] }
 0x4da   : > { %v7384_v30 = vld [vmem:[%s12792_s7 + $0x448] sm:$0xf]  ;;  %v7129_v50 = vor.u32 %v8517_v4, %v7128_v14  ;;  %v8673_v21 = vld [vmem:[%s12792_s7 + $0x74c] sm:$0xf] }
 0x4db   : > { %4939 = vmatpush.bf16.msra.mxu3 %v7737_v27  ;;  %4914 = vmatpush.bf16.msra.mxu1 %v7193_v6  ;;  %v8581_v19 = vld [vmem:[%s12792_s7 + $0x464] sm:$0xf0]  ;;  %v7837_v27 = vor.u32 %v8689_v8, %v7834_v26  ;;  %v7293_v6 = vor.u32 %v8553_v51, %v7290_v61  ;;  %v7770_v57 = vld [vmem:[%s12792_s7 + $0x768] sm:$0xf0] }
 0x4dc   : > { %v7640_v18 = vld [vmem:[%s12792_s7 + $0x648] sm:$0xf]  ;;  %v7385_v33 = vor.u32 %v8581_v19, %v7384_v30  ;;  %v8473_v32 = vld [vmem:[%s12792_s7 + $0x10c] sm:$0xf] }
 0x4dd   : > { %4927 = vmatpush.bf16.msra.mxu2 %v7449_v59  ;;  %v8645_v37 = vld [vmem:[%s12792_s7 + $0x664] sm:$0xf0]  ;;  %4902 = vmatpush.bf16.msra.mxu0 %v6905_v24  ;;  %v7549_v59 = vor.u32 %v8617_v10, %v7546_v20  ;;  %v7005_v24 = vor.u32 %v8481_v13, %v7002_v36  ;;  %v6970_v47 = vld [vmem:[%s12792_s7 + $0x128] sm:$0xf0] }
 0x4de   : > { %v6840_v34 = vld [vmem:[%s12792_s7 + $0x8] sm:$0xf]  ;;  %v7641_v58 = vor.u32 %v8645_v37, %v7640_v18  ;;  %v8537_v14 = vld [vmem:[%s12792_s7 + $0x30c] sm:$0xf] }
 0x4df   : > { %4940 = vmatpush.bf16.msra.mxu3 %v7705_v55  ;;  %v8445_v48 = vld [vmem:[%s12792_s7 + $0x24] sm:$0xf0]  ;;  %4915 = vmatpush.bf16.msra.mxu1 %v7161_v43  ;;  %v7805_v55 = vor.u32 %v8681_v22, %v7802_v53  ;;  %v7261_v43 = vor.u32 %v8545_v16, %v7258_v29  ;;  %v7226_v4 = vld [vmem:[%s12792_s7 + $0x328] sm:$0xf0] }
 0x4e0   : > { %v7096_v40 = vld [vmem:[%s12792_s7 + $0x208] sm:$0xf]  ;;  %v6841_v15 = vor.u32 %v8445_v48, %v6840_v34  ;;  %v8601_v30 = vld [vmem:[%s12792_s7 + $0x50c] sm:$0xf]  ;;  %v7229_v34 = vor.u32 %v8537_v14, %v7226_v4  ;;  %v7584_v14 = vld [vmem:[%s12792_s7 + $0x5d0] sm:$0xf] }
 0x4e1   : > { %4928 = vmatpush.bf16.msra.mxu2 %v7417_v7  ;;  %v8509_v52 = vld [vmem:[%s12792_s7 + $0x224] sm:$0xf0]  ;;  %4903 = vmatpush.bf16.msra.mxu0 %v6873_v56  ;;  %v7517_v7 = vor.u32 %v8609_v11, %v7514_v60  ;;  %v7482_v19 = vld [vmem:[%s12792_s7 + $0x528] sm:$0xf0]  ;;  %v6973_v56 = vor.u32 %v8473_v32, %v6970_v47  ;;  %v8566_v47 = vld [vmem:[%s12792_s7 + $0x3ec] sm:$0xf0] }
 0x4e2   : > { %v7352_v39 = vld [vmem:[%s12792_s7 + $0x408] sm:$0xf]  ;;  %v7097_v0 = vor.u32 %v8509_v52, %v7096_v40  ;;  %v8665_v18 = vld [vmem:[%s12792_s7 + $0x70c] sm:$0xf]  ;;  %v7485_v48 = vor.u32 %v8601_v30, %v7482_v19  ;;  %v7840_v19 = vld [vmem:[%s12792_s7 + $0x7d0] sm:$0xf] }
 0x4e3   : > { %4941 = vmatpush.bf16.msra.mxu3 %v7673_v35  ;;  %v8573_v28 = vld [vmem:[%s12792_s7 + $0x424] sm:$0xf0]  ;;  %4916 = vmatpush.bf16.msra.mxu1 %v7129_v50  ;;  %v7773_v35 = vor.u32 %v8673_v21, %v7770_v57  ;;  %v7738_v37 = vld [vmem:[%s12792_s7 + $0x728] sm:$0xf0] }
 0x4e4   : > { %v7608_v3 = vld [vmem:[%s12792_s7 + $0x608] sm:$0xf]  ;;  %v7353_v49 = vor.u32 %v8573_v28, %v7352_v39  ;;  %v8465_v50 = vld [vmem:[%s12792_s7 + $0xcc] sm:$0xf]  ;;  %v7741_v52 = vor.u32 %v8665_v18, %v7738_v37  ;;  %v8694_v18 = vld [vmem:[%s12792_s7 + $0x7ec] sm:$0xf0] }
 0x4e5   : > { %v8637_v31 = vld [vmem:[%s12792_s7 + $0x624] sm:$0xf0]  ;;  %4929 = vmatpush.bf16.msra.mxu2 %v7385_v33  ;;  %4904 = vmatpush.bf16.msra.mxu0 %v6841_v15  ;;  %v6938_v33 = vld [vmem:[%s12792_s7 + $0xe8] sm:$0xf0] }
 0x4e6   : > { %v7609_v25 = vor.u32 %v8637_v31, %v7608_v3  ;;  %v8529_v40 = vld [vmem:[%s12792_s7 + $0x2cc] sm:$0xf]  ;;  %v6941_v23 = vor.u32 %v8465_v50, %v6938_v33  ;;  %v7040_v50 = vld [vmem:[%s12792_s7 + $0x190] sm:$0xf] }
 0x4e7   : > { %4942 = vmatpush.bf16.msra.mxu3 %v7641_v58  ;;  %4917 = vmatpush.bf16.msra.mxu1 %v7097_v0  ;;  %v7194_v39 = vld [vmem:[%s12792_s7 + $0x2e8] sm:$0xf0]  ;;  %v8494_v33 = vld [vmem:[%s12792_s7 + $0x1ac] sm:$0xf0] }
 0x4e8   : > { %4905 = vmatmul.bf16.vlgmr.msra.gmra.mxu0 %v10865_v5  ;;  %v8593_v58 = vld [vmem:[%s12792_s7 + $0x4cc] sm:$0xf]  ;;  %v7197_v12 = vor.u32 %v8529_v40, %v7194_v39  ;;  %v7296_v40 = vld [vmem:[%s12792_s7 + $0x390] sm:$0xf] }
 0x4e9   : > { %4930 = vmatpush.bf16.msra.mxu2 %v7353_v49  ;;  %4949 = vmatpush.bf16.msrb.mxu0 %v7069_v54  ;;  %v7450_v28 = vld [vmem:[%s12792_s7 + $0x4e8] sm:$0xf0]  ;;  %v8558_v39 = vld [vmem:[%s12792_s7 + $0x3ac] sm:$0xf0] }
 0x4ea   : > { %4918 = vmatmul.bf16.vlgmr.msra.gmra.mxu1 %v10888_v9  ;;  %v8657_v3 = vld [vmem:[%s12792_s7 + $0x6cc] sm:$0xf]  ;;  %v7453_v41 = vor.u32 %v8593_v58, %v7450_v28  ;;  %v7552_v58 = vld [vmem:[%s12792_s7 + $0x590] sm:$0xf] }
 0x4eb   : > { %4943 = vmatpush.bf16.msra.mxu3 %v7609_v25  ;;  %4962 = vmatpush.bf16.msrb.mxu1 %v7325_v45  ;;  %v7706_v31 = vld [vmem:[%s12792_s7 + $0x6e8] sm:$0xf0]  ;;  %v8622_v28 = vld [vmem:[%s12792_s7 + $0x5ac] sm:$0xf0] }
 0x4ec   : > { %4931 = vmatmul.bf16.vlgmr.msra.gmra.mxu2 %v10863_v63  ;;  %v8457_v15 = vld [vmem:[%s12792_s7 + $0x8c] sm:$0xf]  ;;  %v7709_v2 = vor.u32 %v8657_v3, %v7706_v31  ;;  %v7808_v3 = vld [vmem:[%s12792_s7 + $0x790] sm:$0xf] }
 0x4ed   : > { %4975 = vmatpush.bf16.msrb.mxu2 %v7581_v17  ;;  %4950 = vmatpush.bf16.msrb.mxu0 %v7037_v44  ;;  %v6906_v62 = vld [vmem:[%s12792_s7 + $0xa8] sm:$0xf0]  ;;  %v8686_v31 = vld [vmem:[%s12792_s7 + $0x7ac] sm:$0xf0] }
 0x4ee   : > { %4944 = vmatmul.bf16.vlgmr.msra.gmra.mxu3 %v10867_v42  ;;  %v8521_v1 = vld [vmem:[%s12792_s7 + $0x28c] sm:$0xf]  ;;  %v6909_v54 = vor.u32 %v8457_v15, %v6906_v62  ;;  %v7008_v15 = vld [vmem:[%s12792_s7 + $0x150] sm:$0xf] }
 0x4ef   : > { %4988 = vmatpush.bf16.msrb.mxu3 %v7837_v27  ;;  %4963 = vmatpush.bf16.msrb.mxu1 %v7293_v6  ;;  %v7162_v0 = vld [vmem:[%s12792_s7 + $0x2a8] sm:$0xf0]  ;;  %v8486_v62 = vld [vmem:[%s12792_s7 + $0x16c] sm:$0xf0] }
 0x4f0   : > { %v8585_v49 = vld [vmem:[%s12792_s7 + $0x48c] sm:$0xf]  ;;  %v7165_v45 = vor.u32 %v8521_v1, %v7162_v0  ;;  %v7264_v1 = vld [vmem:[%s12792_s7 + $0x350] sm:$0xf] }
 0x4f1   : > { %4976 = vmatpush.bf16.msrb.mxu2 %v7549_v59  ;;  %4951 = vmatpush.bf16.msrb.mxu0 %v7005_v24  ;;  %v7418_v8 = vld [vmem:[%s12792_s7 + $0x4a8] sm:$0xf0]  ;;  %v7072_v24 = vld [vmem:[%s12792_s7 + $0x1d0] sm:$0xf] }
 0x4f2   : > { %v8649_v26 = vld [vmem:[%s12792_s7 + $0x68c] sm:$0xf]  ;;  %v7421_v17 = vor.u32 %v8585_v49, %v7418_v8  ;;  %v8550_v0 = vld [vmem:[%s12792_s7 + $0x36c] sm:$0xf0] }
 0x4f3   : > { %4989 = vmatpush.bf16.msrb.mxu3 %v7805_v55  ;;  %4964 = vmatpush.bf16.msrb.mxu1 %v7261_v43  ;;  %v7674_v25 = vld [vmem:[%s12792_s7 + $0x6a8] sm:$0xf0]  ;;  %v8502_v43 = vld [vmem:[%s12792_s7 + $0x1ec] sm:$0xf0] }
 0x4f4   : > { %v8449_v46 = vld [vmem:[%s12792_s7 + $0x4c] sm:$0xf]  ;;  %v7677_v27 = vor.u32 %v8649_v26, %v7674_v25  ;;  %v7520_v49 = vld [vmem:[%s12792_s7 + $0x550] sm:$0xf] }
 0x4f5   : > { %4977 = vmatpush.bf16.msrb.mxu2 %v7517_v7  ;;  %4952 = vmatpush.bf16.msrb.mxu0 %v6973_v56  ;;  %v6874_v38 = vld [vmem:[%s12792_s7 + $0x68] sm:$0xf0]  ;;  %v7328_v7 = vld [vmem:[%s12792_s7 + $0x3d0] sm:$0xf]  ;;  %v7073_v56 = vor.u32 %v8502_v43, %v7072_v24 }
 0x4f6   : > { %v8513_v51 = vld [vmem:[%s12792_s7 + $0x24c] sm:$0xf]  ;;  %v6877_v44 = vor.u32 %v8449_v46, %v6874_v38  ;;  %v8614_v8 = vld [vmem:[%s12792_s7 + $0x56c] sm:$0xf0] }
 0x4f7   : > { %4990 = vmatpush.bf16.msrb.mxu3 %v7773_v35  ;;  %4965 = vmatpush.bf16.msrb.mxu1 %v7229_v34  ;;  %v7130_v61 = vld [vmem:[%s12792_s7 + $0x268] sm:$0xf0]  ;;  %v8630_v35 = vld [vmem:[%s12792_s7 + $0x5ec] sm:$0xf0]  ;;  %v7329_v34 = vor.u32 %v8566_v47, %v7328_v7 }
 0x4f8   : > { %v8577_v10 = vld [vmem:[%s12792_s7 + $0x44c] sm:$0xf]  ;;  %v7133_v13 = vor.u32 %v8513_v51, %v7130_v61  ;;  %v7776_v26 = vld [vmem:[%s12792_s7 + $0x750] sm:$0xf] }
 0x4f9   : > { %4978 = vmatpush.bf16.msrb.mxu2 %v7485_v48  ;;  %4953 = vmatpush.bf16.msrb.mxu0 %v6941_v23  ;;  %v7386_v20 = vld [vmem:[%s12792_s7 + $0x468] sm:$0xf0]  ;;  %v7585_v48 = vor.u32 %v8630_v35, %v7584_v14  ;;  %v7041_v23 = vor.u32 %v8494_v33, %v7040_v50  ;;  %v8678_v25 = vld [vmem:[%s12792_s7 + $0x76c] sm:$0xf0] }
 0x4fa   : > { %v8641_v22 = vld [vmem:[%s12792_s7 + $0x64c] sm:$0xf]  ;;  %v7389_v36 = vor.u32 %v8577_v10, %v7386_v20  ;;  %v6976_v46 = vld [vmem:[%s12792_s7 + $0x110] sm:$0xf] }
 0x4fb   : > { %4991 = vmatpush.bf16.msrb.mxu3 %v7741_v52  ;;  %4966 = vmatpush.bf16.msrb.mxu1 %v7197_v12  ;;  %v7642_v53 = vld [vmem:[%s12792_s7 + $0x668] sm:$0xf0]  ;;  %v7841_v52 = vor.u32 %v8694_v18, %v7840_v19  ;;  %v7297_v12 = vor.u32 %v8558_v39, %v7296_v40  ;;  %v8478_v38 = vld [vmem:[%s12792_s7 + $0x12c] sm:$0xf0] }
 0x4fc   : > { %v8441_v6 = vld [vmem:[%s12792_s7 + $0xc] sm:$0xf]  ;;  %v7645_v11 = vor.u32 %v8641_v22, %v7642_v53  ;;  %v7232_v51 = vld [vmem:[%s12792_s7 + $0x310] sm:$0xf] }
 0x4fd   : > { %4979 = vmatpush.bf16.msrb.mxu2 %v7453_v41  ;;  %4954 = vmatpush.bf16.msrb.mxu0 %v6909_v54  ;;  %v6842_v59 = vld [vmem:[%s12792_s7 + $0x28] sm:$0xf0]  ;;  %v7553_v41 = vor.u32 %v8622_v28, %v7552_v58  ;;  %v7009_v54 = vor.u32 %v8486_v62, %v7008_v15  ;;  %v8542_v61 = vld [vmem:[%s12792_s7 + $0x32c] sm:$0xf0] }
 0x4fe   : > { %v8505_v16 = vld [vmem:[%s12792_s7 + $0x20c] sm:$0xf]  ;;  %v6845_v32 = vor.u32 %v8441_v6, %v6842_v59  ;;  %v7488_v10 = vld [vmem:[%s12792_s7 + $0x510] sm:$0xf]  ;;  %v7233_v6 = vor.u32 %v8542_v61, %v7232_v51  ;;  %v8626_v51 = vld [vmem:[%s12792_s7 + $0x5d4] sm:$0xf] }
 0x4ff   : > { %4992 = vmatpush.bf16.msrb.mxu3 %v7709_v2  ;;  %4967 = vmatpush.bf16.msrb.mxu1 %v7165_v45  ;;  %v7098_v55 = vld [vmem:[%s12792_s7 + $0x228] sm:$0xf0]  ;;  %v7809_v2 = vor.u32 %v8686_v31, %v7808_v3  ;;  %v7265_v45 = vor.u32 %v8550_v0, %v7264_v1  ;;  %v8606_v20 = vld [vmem:[%s12792_s7 + $0x52c] sm:$0xf0] }
 0x500   : > { %v8569_v29 = vld [vmem:[%s12792_s7 + $0x40c] sm:$0xf]  ;;  %v7101_v4 = vor.u32 %v8505_v16, %v7098_v55  ;;  %v7744_v22 = vld [vmem:[%s12792_s7 + $0x710] sm:$0xf]  ;;  %v7489_v59 = vor.u32 %v8606_v20, %v7488_v10  ;;  %v8690_v20 = vld [vmem:[%s12792_s7 + $0x7d4] sm:$0xf] }
 0x501   : > { %4980 = vmatpush.bf16.msrb.mxu2 %v7421_v17  ;;  %v7354_v60 = vld [vmem:[%s12792_s7 + $0x428] sm:$0xf0]  ;;  %4955 = vmatpush.bf16.msrb.mxu0 %v6877_v44  ;;  %v7521_v17 = vor.u32 %v8614_v8, %v7520_v49  ;;  %v8670_v53 = vld [vmem:[%s12792_s7 + $0x72c] sm:$0xf0]  ;;  %v6977_v44 = vor.u32 %v8478_v38, %v6976_v46  ;;  %v7330_v38 = vld [vmem:[%s12792_s7 + $0x3f0] sm:$0xf0] }
 0x502   : > { %v8633_v21 = vld [vmem:[%s12792_s7 + $0x60c] sm:$0xf]  ;;  %v7357_v30 = vor.u32 %v8569_v29, %v7354_v60  ;;  %v7200_v16 = vld [vmem:[%s12792_s7 + $0x2d0] sm:$0xf]  ;;  %v7745_v55 = vor.u32 %v8670_v53, %v7744_v22  ;;  %v7842_v22 = vld [vmem:[%s12792_s7 + $0x7f0] sm:$0xf0] }
 0x503   : > { %4993 = vmatpush.bf16.msrb.mxu3 %v7677_v27  ;;  %v7610_v57 = vld [vmem:[%s12792_s7 + $0x628] sm:$0xf0]  ;;  %4968 = vmatpush.bf16.msrb.mxu1 %v7133_v13  ;;  %v7777_v27 = vor.u32 %v8678_v25, %v7776_v26  ;;  %v6944_v13 = vld [vmem:[%s12792_s7 + $0xd0] sm:$0xf] }
 0x504   : > { %v7613_v37 = vor.u32 %v8633_v21, %v7610_v57  ;;  %v8534_v29 = vld [vmem:[%s12792_s7 + $0x2ec] sm:$0xf0] }
 0x505   : > { %4981 = vmatpush.bf16.msrb.mxu2 %v7389_v36  ;;  %4956 = vmatpush.bf16.msrb.mxu0 %v6845_v32  ;;  %v8470_v36 = vld [vmem:[%s12792_s7 + $0xec] sm:$0xf0]  ;;  %v7201_v43 = vor.u32 %v8534_v29, %v7200_v16  ;;  %v8554_v16 = vld [vmem:[%s12792_s7 + $0x394] sm:$0xf] }
 0x506   : > { %v8598_v60 = vld [vmem:[%s12792_s7 + $0x4ec] sm:$0xf0]  ;;  %v6945_v24 = vor.u32 %v8470_v36, %v6944_v13  ;;  %v8490_v13 = vld [vmem:[%s12792_s7 + $0x194] sm:$0xf] }
 0x507   : > { %4994 = vmatpush.bf16.msrb.mxu3 %v7645_v11  ;;  %4969 = vmatpush.bf16.msrb.mxu1 %v7101_v4  ;;  %v7456_v11 = vld [vmem:[%s12792_s7 + $0x4d0] sm:$0xf]  ;;  %v7042_v36 = vld [vmem:[%s12792_s7 + $0x1b0] sm:$0xf0] }
 0x508   : > { %4957 = vmatmul.bf16.vlgmr.msrb.gmra.mxu0 %v10865_v5  ;;  %v7712_v21 = vld [vmem:[%s12792_s7 + $0x6d0] sm:$0xf]  ;;  %v7457_v7 = vor.u32 %v8598_v60, %v7456_v11  ;;  %v7298_v29 = vld [vmem:[%s12792_s7 + $0x3b0] sm:$0xf0] }
 0x509   : > { %4982 = vmatpush.bf16.msrb.mxu2 %v7357_v30  ;;  %5001 = vmatpush.bf16.msra.mxu0 %v7073_v56  ;;  %v8662_v57 = vld [vmem:[%s12792_s7 + $0x6ec] sm:$0xf0]  ;;  %v8618_v11 = vld [vmem:[%s12792_s7 + $0x594] sm:$0xf] }
 0x50a   : > { %4970 = vmatmul.bf16.vlgmr.msrb.gmra.mxu1 %v10888_v9  ;;  %v6912_v32 = vld [vmem:[%s12792_s7 + $0x90] sm:$0xf]  ;;  %v7713_v35 = vor.u32 %v8662_v57, %v7712_v21  ;;  %v7554_v60 = vld [vmem:[%s12792_s7 + $0x5b0] sm:$0xf0] }
 0x50b   : > { %4995 = vmatpush.bf16.msrb.mxu3 %v7613_v37  ;;  %5014 = vmatpush.bf16.msra.mxu1 %v7329_v34  ;;  %v8462_v47 = vld [vmem:[%s12792_s7 + $0xac] sm:$0xf0]  ;;  %v8682_v21 = vld [vmem:[%s12792_s7 + $0x794] sm:$0xf] }
 0x50c   : > { %4983 = vmatmul.bf16.vlgmr.msrb.gmra.mxu2 %v10863_v63  ;;  %v7168_v14 = vld [vmem:[%s12792_s7 + $0x290] sm:$0xf]  ;;  %v6913_v56 = vor.u32 %v8462_v47, %v6912_v32  ;;  %v7810_v57 = vld [vmem:[%s12792_s7 + $0x7b0] sm:$0xf0] }
 0x50d   : > { %5027 = vmatpush.bf16.msra.mxu2 %v7585_v48  ;;  %5002 = vmatpush.bf16.msra.mxu0 %v7041_v23  ;;  %v8526_v4 = vld [vmem:[%s12792_s7 + $0x2ac] sm:$0xf0]  ;;  %v8482_v32 = vld [vmem:[%s12792_s7 + $0x154] sm:$0xf] }
 0x50e   : > { %4996 = vmatmul.bf16.vlgmr.msrb.gmra.mxu3 %v10867_v42  ;;  %v7424_v30 = vld [vmem:[%s12792_s7 + $0x490] sm:$0xf]  ;;  %v7169_v34 = vor.u32 %v8526_v4, %v7168_v14  ;;  %v7010_v47 = vld [vmem:[%s12792_s7 + $0x170] sm:$0xf0] }
 0x50f   : > { %5040 = vmatpush.bf16.msra.mxu3 %v7841_v52  ;;  %5015 = vmatpush.bf16.msra.mxu1 %v7297_v12  ;;  %v8590_v19 = vld [vmem:[%s12792_s7 + $0x4ac] sm:$0xf0]  ;;  %v8546_v14 = vld [vmem:[%s12792_s7 + $0x354] sm:$0xf] }
 0x510   : > { %v7680_v18 = vld [vmem:[%s12792_s7 + $0x690] sm:$0xf]  ;;  %v7425_v48 = vor.u32 %v8590_v19, %v7424_v30  ;;  %v7266_v4 = vld [vmem:[%s12792_s7 + $0x370] sm:$0xf0] }
 0x511   : > { %5028 = vmatpush.bf16.msra.mxu2 %v7553_v41  ;;  %5003 = vmatpush.bf16.msra.mxu0 %v7009_v54  ;;  %v8654_v37 = vld [vmem:[%s12792_s7 + $0x6ac] sm:$0xf0]  ;;  %v8498_v54 = vld [vmem:[%s12792_s7 + $0x1d4] sm:$0xf] }
 0x512   : > { %v6880_v50 = vld [vmem:[%s12792_s7 + $0x50] sm:$0xf]  ;;  %v7681_v52 = vor.u32 %v8654_v37, %v7680_v18  ;;  %v8610_v30 = vld [vmem:[%s12792_s7 + $0x554] sm:$0xf] }
 0x513   : > { %5041 = vmatpush.bf16.msra.mxu3 %v7809_v2  ;;  %5016 = vmatpush.bf16.msra.mxu1 %v7265_v45  ;;  %v8454_v33 = vld [vmem:[%s12792_s7 + $0x6c] sm:$0xf0]  ;;  %v7074_v45 = vld [vmem:[%s12792_s7 + $0x1f0] sm:$0xf0] }
 0x514   : > { %v7136_v40 = vld [vmem:[%s12792_s7 + $0x250] sm:$0xf]  ;;  %v6881_v23 = vor.u32 %v8454_v33, %v6880_v50  ;;  %v7522_v19 = vld [vmem:[%s12792_s7 + $0x570] sm:$0xf0] }
 0x515   : > { %5029 = vmatpush.bf16.msra.mxu2 %v7521_v17  ;;  %5004 = vmatpush.bf16.msra.mxu0 %v6977_v44  ;;  %v8518_v39 = vld [vmem:[%s12792_s7 + $0x26c] sm:$0xf0]  ;;  %v8562_v17 = vld [vmem:[%s12792_s7 + $0x3d4] sm:$0xf]  ;;  %v7077_v44 = vor.u32 %v8498_v54, %v7074_v45 }
 0x516   : > { %v7392_v58 = vld [vmem:[%s12792_s7 + $0x450] sm:$0xf]  ;;  %v7137_v15 = vor.u32 %v8518_v39, %v7136_v40  ;;  %v8674_v18 = vld [vmem:[%s12792_s7 + $0x754] sm:$0xf] }
 0x517   : > { %5042 = vmatpush.bf16.msra.mxu3 %v7777_v27  ;;  %5017 = vmatpush.bf16.msra.mxu1 %v7233_v6  ;;  %v8582_v28 = vld [vmem:[%s12792_s7 + $0x46c] sm:$0xf0]  ;;  %v7586_v27 = vld [vmem:[%s12792_s7 + $0x5f0] sm:$0xf0]  ;;  %v7333_v6 = vor.u32 %v8562_v17, %v7330_v38 }
 0x518   : > { %v7648_v3 = vld [vmem:[%s12792_s7 + $0x650] sm:$0xf]  ;;  %v7393_v62 = vor.u32 %v8582_v28, %v7392_v58  ;;  %v7778_v37 = vld [vmem:[%s12792_s7 + $0x770] sm:$0xf0] }
 0x519   : > { %5030 = vmatpush.bf16.msra.mxu2 %v7489_v59  ;;  %5005 = vmatpush.bf16.msra.mxu0 %v6945_v24  ;;  %v8646_v31 = vld [vmem:[%s12792_s7 + $0x66c] sm:$0xf0]  ;;  %v7589_v59 = vor.u32 %v8626_v51, %v7586_v27  ;;  %v7045_v24 = vor.u32 %v8490_v13, %v7042_v36  ;;  %v8474_v50 = vld [vmem:[%s12792_s7 + $0x114] sm:$0xf] }
 0x51a   : > { %v6848_v12 = vld [vmem:[%s12792_s7 + $0x10] sm:$0xf]  ;;  %v7649_v49 = vor.u32 %v8646_v31, %v7648_v3  ;;  %v6978_v33 = vld [vmem:[%s12792_s7 + $0x130] sm:$0xf0] }
 0x51b   : > { %5043 = vmatpush.bf16.msra.mxu3 %v7745_v55  ;;  %5018 = vmatpush.bf16.msra.mxu1 %v7201_v43  ;;  %v8446_v41 = vld [vmem:[%s12792_s7 + $0x2c] sm:$0xf0]  ;;  %v7845_v55 = vor.u32 %v8690_v20, %v7842_v22  ;;  %v7301_v43 = vor.u32 %v8554_v16, %v7298_v29  ;;  %v8538_v40 = vld [vmem:[%s12792_s7 + $0x314] sm:$0xf] }
 0x51c   : > { %v7104_v1 = vld [vmem:[%s12792_s7 + $0x210] sm:$0xf]  ;;  %v6849_v46 = vor.u32 %v8446_v41, %v6848_v12  ;;  %v7234_v39 = vld [vmem:[%s12792_s7 + $0x330] sm:$0xf0] }
 0x51d   : > { %5031 = vmatpush.bf16.msra.mxu2 %v7457_v7  ;;  %5006 = vmatpush.bf16.msra.mxu0 %v6913_v56  ;;  %v8510_v2 = vld [vmem:[%s12792_s7 + $0x22c] sm:$0xf0]  ;;  %v7557_v7 = vor.u32 %v8618_v11, %v7554_v60  ;;  %v7013_v56 = vor.u32 %v8482_v32, %v7010_v47  ;;  %v8602_v58 = vld [vmem:[%s12792_s7 + $0x514] sm:$0xf]  ;;  %v7237_v41 = vor.u32 %v8538_v40, %v7234_v39 }
 0x51e   : > { %v7360_v0 = vld [vmem:[%s12792_s7 + $0x410] sm:$0xf]  ;;  %v7105_v61 = vor.u32 %v8510_v2, %v7104_v1  ;;  %v7490_v28 = vld [vmem:[%s12792_s7 + $0x530] sm:$0xf0] }
 0x51f   : > { %5044 = vmatpush.bf16.msra.mxu3 %v7713_v35  ;;  %5019 = vmatpush.bf16.msra.mxu1 %v7169_v34  ;;  %v8574_v8 = vld [vmem:[%s12792_s7 + $0x42c] sm:$0xf0]  ;;  %v7813_v35 = vor.u32 %v8682_v21, %v7810_v57  ;;  %v7269_v34 = vor.u32 %v8546_v14, %v7266_v4  ;;  %v8666_v3 = vld [vmem:[%s12792_s7 + $0x714] sm:$0xf] }
 0x520   : > { %v7616_v26 = vld [vmem:[%s12792_s7 + $0x610] sm:$0xf]  ;;  %v7361_v10 = vor.u32 %v8574_v8, %v7360_v0  ;;  %v7746_v31 = vld [vmem:[%s12792_s7 + $0x730] sm:$0xf0] }
 0x521   : > { %5032 = vmatpush.bf16.msra.mxu2 %v7425_v48  ;;  %v8638_v25 = vld [vmem:[%s12792_s7 + $0x62c] sm:$0xf0]  ;;  %5007 = vmatpush.bf16.msra.mxu0 %v6881_v23  ;;  %v7525_v48 = vor.u32 %v8610_v30, %v7522_v19  ;;  %v6981_v23 = vor.u32 %v8474_v50, %v6978_v33  ;;  %v8466_v12 = vld [vmem:[%s12792_s7 + $0xd4] sm:$0xf]  ;;  %v7749_v0 = vor.u32 %v8666_v3, %v7746_v31  ;;  %v8503_v3 = vld [vmem:[%s12792_s7 + $0x1f4] sm:$0xf0] }
 0x522   : > { %v7617_v53 = vor.u32 %v8638_v25, %v7616_v26  ;;  %v8530_v1 = vld [vmem:[%s12792_s7 + $0x2d4] sm:$0xf]  ;;  %v11680_v26 = vld [vmem:[%s12793_s8] sm:$0xff]  ;;  %v7336_v31 = vld [vmem:[%s12792_s7 + $0x3d8] sm:$0xf] }
 0x523   : > { %5045 = vmatpush.bf16.msra.mxu3 %v7681_v52  ;;  %5020 = vmatpush.bf16.msra.mxu1 %v7137_v15  ;;  %v7781_v52 = vor.u32 %v8674_v18, %v7778_v37  ;;  %v7493_v15 = vor.u32 %v8602_v58, %v7490_v28  ;;  %v7202_v2 = vld [vmem:[%s12792_s7 + $0x2f0] sm:$0xf0]  ;;  %v7080_v28 = vld [vmem:[%s12792_s7 + $0x1d8] sm:$0xf] }
 0x524   : > { %v7458_v8 = vld [vmem:[%s12792_s7 + $0x4f0] sm:$0xf0] }
 0x525   : > { %5033 = vmatpush.bf16.msra.mxu2 %v7393_v62  ;;  %5008 = vmatpush.bf16.msra.mxu0 %v6849_v46  ;;  %v6946_v62 = vld [vmem:[%s12792_s7 + $0xf0] sm:$0xf0]  ;;  %v7205_v46 = vor.u32 %v8530_v1, %v7202_v2 }
 0x526   : > { %v8658_v25 = vld [vmem:[%s12792_s7 + $0x6d4] sm:$0xf]  ;;  %v6949_v45 = vor.u32 %v8466_v12, %v6946_v62  ;;  %v8567_v12 = vld [vmem:[%s12792_s7 + $0x3f4] sm:$0xf0] }
 0x527   : > { %5046 = vmatpush.bf16.msra.mxu3 %v7649_v49  ;;  %5021 = vmatpush.bf16.msra.mxu1 %v7105_v61  ;;  %v8594_v49 = vld [vmem:[%s12792_s7 + $0x4d4] sm:$0xf]  ;;  %v4777_v61 = vperm.slane %v11680_v26, 0 }
 0x528   : > { %5009 = vmatmul.bf16.vlgmr.msra.gmra.mxu0 %v10865_v5  ;;  %v7714_v54 = vld [vmem:[%s12792_s7 + $0x6f0] sm:$0xf0]  ;;  %v7461_v38 = vor.u32 %v8594_v49, %v7458_v8  ;;  %v7848_v49 = vld [vmem:[%s12792_s7 + $0x7d8] sm:$0xf] }
 0x529   : > { %5034 = vmatpush.bf16.msra.mxu2 %v7361_v10  ;;  %5053 = vmatpush.bf16.msrb.mxu0 %v7077_v44  ;;  %v8458_v17 = vld [vmem:[%s12792_s7 + $0x94] sm:$0xf]  ;;  %v7717_v10 = vor.u32 %v8658_v25, %v7714_v54  ;;  %v8695_v8 = vld [vmem:[%s12792_s7 + $0x7f4] sm:$0xf0] }
 0x52a   : > { %5022 = vmatmul.bf16.vlgmr.msra.gmra.mxu1 %v10888_v9  ;;  %v6914_v51 = vld [vmem:[%s12792_s7 + $0xb0] sm:$0xf0] }
 0x52b   : > { %5047 = vmatpush.bf16.msra.mxu3 %v7617_v53  ;;  %5066 = vmatpush.bf16.msrb.mxu1 %v7333_v6  ;;  %v8522_v27 = vld [vmem:[%s12792_s7 + $0x294] sm:$0xf]  ;;  %v4802_v13 = vpop.f32.mrf.mxu0 }
 0x52c   : > { %5035 = vmatmul.bf16.vlgmr.msra.gmra.mxu2 %v10863_v63  ;;  %v7170_v20 = vld [vmem:[%s12792_s7 + $0x2b0] sm:$0xf0]  ;;  %v4803_v60 = vadd.f32 %v4802_v13, %v4777_v61  ;;  %v7849_v61 = vor.u32 %v8695_v8, %v7848_v49 }
 0x52d   : > { %5079 = vmatpush.bf16.msrb.mxu2 %v7589_v59  ;;  %5054 = vmatpush.bf16.msrb.mxu0 %v7045_v24  ;;  %v8586_v22 = vld [vmem:[%s12792_s7 + $0x494] sm:$0xf]  ;;  %v6917_v59 = vor.u32 %v8458_v17, %v6914_v51  ;;  %v7173_v36 = vor.u32 %v8522_v27, %v7170_v20  ;;  %v4815_v21 = vpop.f32.mrf.mxu1  ;;  %v7337_v17 = vor.u32 %v8567_v12, %v7336_v31  ;;  %v8495_v51 = vld [vmem:[%s12792_s7 + $0x1b4] sm:$0xf0] }
 0x52e   : > { %5048 = vmatmul.bf16.vlgmr.msra.gmra.mxu3 %v10867_v42  ;;  %v7426_v53 = vld [vmem:[%s12792_s7 + $0x4b0] sm:$0xf0]  ;;  %v4816_v14 = vadd.f32 %v4815_v21, %v4803_v60  ;;  %v7304_v27 = vld [vmem:[%s12792_s7 + $0x398] sm:$0xf] }
 0x52f   : > { %5092 = vmatpush.bf16.msrb.mxu3 %v7845_v55  ;;  %5067 = vmatpush.bf16.msrb.mxu1 %v7301_v43  ;;  %v8650_v44 = vld [vmem:[%s12792_s7 + $0x694] sm:$0xf]  ;;  %v7429_v16 = vor.u32 %v8586_v22, %v7426_v53  ;;  %v7560_v20 = vld [vmem:[%s12792_s7 + $0x598] sm:$0xf] }
 0x530   : > { %v7682_v6 = vld [vmem:[%s12792_s7 + $0x6b0] sm:$0xf0]  ;;  %v8623_v22 = vld [vmem:[%s12792_s7 + $0x5b4] sm:$0xf0] }
 0x531   : > { %5080 = vmatpush.bf16.msrb.mxu2 %v7557_v7  ;;  %5055 = vmatpush.bf16.msrb.mxu0 %v7013_v56  ;;  %v8450_v55 = vld [vmem:[%s12792_s7 + $0x54] sm:$0xf]  ;;  %v7685_v57 = vor.u32 %v8650_v44, %v7682_v6  ;;  %v7816_v53 = vld [vmem:[%s12792_s7 + $0x798] sm:$0xf] }
 0x532   : > { %v6882_v29 = vld [vmem:[%s12792_s7 + $0x70] sm:$0xf0]  ;;  %v8687_v44 = vld [vmem:[%s12792_s7 + $0x7b4] sm:$0xf0] }
 0x533   : > { %5093 = vmatpush.bf16.msrb.mxu3 %v7813_v35  ;;  %5068 = vmatpush.bf16.msrb.mxu1 %v7269_v34  ;;  %v8514_v11 = vld [vmem:[%s12792_s7 + $0x254] sm:$0xf]  ;;  %v6885_v35 = vor.u32 %v8450_v55, %v6882_v29  ;;  %v4841_v58 = vpop.f32.mrf.mxu3  ;;  %v4804_v1 = vpop.f32.mrf.mxu0  ;;  %v7016_v55 = vld [vmem:[%s12792_s7 + $0x158] sm:$0xf]  ;;  %v7817_v60 = vor.u32 %v8687_v44, %v7816_v53 }
 0x534   : > { %v7138_v24 = vld [vmem:[%s12792_s7 + $0x270] sm:$0xf0]  ;;  %v8487_v29 = vld [vmem:[%s12792_s7 + $0x174] sm:$0xf0] }
 0x535   : > { %5081 = vmatpush.bf16.msrb.mxu2 %v7525_v48  ;;  %5056 = vmatpush.bf16.msrb.mxu0 %v6981_v23  ;;  %v8578_v43 = vld [vmem:[%s12792_s7 + $0x454] sm:$0xf]  ;;  %v7141_v19 = vor.u32 %v8514_v11, %v7138_v24  ;;  %v4828_v48 = vpop.f32.mrf.mxu2  ;;  %v4817_v25 = vpop.f32.mrf.mxu1  ;;  %v7272_v11 = vld [vmem:[%s12792_s7 + $0x358] sm:$0xf] }
 0x536   : > { %v7394_v7 = vld [vmem:[%s12792_s7 + $0x470] sm:$0xf0]  ;;  %v4829_v39 = vadd.f32 %v4828_v48, %v4816_v14  ;;  %v8551_v21 = vld [vmem:[%s12792_s7 + $0x374] sm:$0xf0] }
 0x537   : > { %5094 = vmatpush.bf16.msrb.mxu3 %v7781_v52  ;;  %5069 = vmatpush.bf16.msrb.mxu1 %v7237_v41  ;;  %v8642_v32 = vld [vmem:[%s12792_s7 + $0x654] sm:$0xf]  ;;  %v7397_v18 = vor.u32 %v8578_v43, %v7394_v7  ;;  %v7592_v41 = vld [vmem:[%s12792_s7 + $0x5d8] sm:$0xf]  ;;  %v7273_v14 = vor.u32 %v8551_v21, %v7272_v11 }
 0x538   : > { %v7650_v47 = vld [vmem:[%s12792_s7 + $0x670] sm:$0xf0]  ;;  %v11779_v62 = vadd.f32 %v4841_v58, %v4829_v39  ;;  %v8615_v24 = vld [vmem:[%s12792_s7 + $0x574] sm:$0xf0] }
 0x539   : > { %5082 = vmatpush.bf16.msrb.mxu2 %v7493_v15  ;;  %5057 = vmatpush.bf16.msrb.mxu0 %v6949_v45  ;;  %v8442_v4 = vld [vmem:[%s12792_s7 + $0x14] sm:$0xf]  ;;  %v7653_v50 = vor.u32 %v8642_v32, %v7650_v47  ;;  %v8631_v15 = vld [vmem:[%s12792_s7 + $0x5f4] sm:$0xf0]  ;;  %v7081_v45 = vor.u32 %v8503_v3, %v7080_v28  ;;  %v7017_v32 = vor.u32 %v8487_v29, %v7016_v55 }
 0x53a   : > { %v6850_v30 = vld [vmem:[%s12792_s7 + $0x30] sm:$0xf0]  ;;  %v7784_v43 = vld [vmem:[%s12792_s7 + $0x758] sm:$0xf] }
 0x53b   : > { %5095 = vmatpush.bf16.msrb.mxu3 %v7749_v0  ;;  %5070 = vmatpush.bf16.msrb.mxu1 %v7205_v46  ;;  %v8506_v37 = vld [vmem:[%s12792_s7 + $0x214] sm:$0xf]  ;;  %v6853_v23 = vor.u32 %v8442_v4, %v6850_v30  ;;  %v7593_v46 = vor.u32 %v8631_v15, %v7592_v41  ;;  %v4843_v13 = vpop.f32.mrf.mxu3  ;;  %v8679_v7 = vld [vmem:[%s12792_s7 + $0x774] sm:$0xf0] }
 0x53c   : > { %v7106_v56 = vld [vmem:[%s12792_s7 + $0x230] sm:$0xf0]  ;;  %v6984_v47 = vld [vmem:[%s12792_s7 + $0x118] sm:$0xf] }
 0x53d   : > { %5083 = vmatpush.bf16.msrb.mxu2 %v7461_v38  ;;  %5058 = vmatpush.bf16.msrb.mxu0 %v6917_v59  ;;  %v8570_v34 = vld [vmem:[%s12792_s7 + $0x414] sm:$0xf]  ;;  %v7109_v2 = vor.u32 %v8506_v37, %v7106_v56  ;;  %v7048_v38 = vld [vmem:[%s12792_s7 + $0x198] sm:$0xf]  ;;  %v4830_v6 = vpop.f32.mrf.mxu2 }
 0x53e   : > { %v7362_v33 = vld [vmem:[%s12792_s7 + $0x430] sm:$0xf0]  ;;  %v7049_v59 = vor.u32 %v8495_v51, %v7048_v38  ;;  %v8479_v4 = vld [vmem:[%s12792_s7 + $0x134] sm:$0xf0] }
 0x53f   : > { %5096 = vmatpush.bf16.msrb.mxu3 %v7717_v10  ;;  %5071 = vmatpush.bf16.msrb.mxu1 %v7173_v36  ;;  %v8634_v40 = vld [vmem:[%s12792_s7 + $0x614] sm:$0xf]  ;;  %v7365_v0 = vor.u32 %v8570_v34, %v7362_v33  ;;  %v8559_v10 = vld [vmem:[%s12792_s7 + $0x3b4] sm:$0xf0]  ;;  %v6985_v33 = vor.u32 %v8479_v4, %v6984_v47 }
 0x540   : > { %v7618_v52 = vld [vmem:[%s12792_s7 + $0x630] sm:$0xf0]  ;;  %v7305_v36 = vor.u32 %v8559_v10, %v7304_v27  ;;  %v7240_v30 = vld [vmem:[%s12792_s7 + $0x318] sm:$0xf] }
 0x541   : > { %5084 = vmatpush.bf16.msrb.mxu2 %v7429_v16  ;;  %5059 = vmatpush.bf16.msrb.mxu0 %v6885_v35  ;;  %v7621_v54 = vor.u32 %v8634_v40, %v7618_v52  ;;  %v7561_v16 = vor.u32 %v8623_v22, %v7560_v20  ;;  %v8543_v37 = vld [vmem:[%s12792_s7 + $0x334] sm:$0xf0] }
 0x542   : > { %v7496_v56 = vld [vmem:[%s12792_s7 + $0x518] sm:$0xf]  ;;  %v7241_v52 = vor.u32 %v8543_v37, %v7240_v30 }
 0x543   : > { %5097 = vmatpush.bf16.msrb.mxu3 %v7685_v57  ;;  %5072 = vmatpush.bf16.msrb.mxu1 %v7141_v19  ;;  %v7528_v57 = vld [vmem:[%s12792_s7 + $0x558] sm:$0xf]  ;;  %v4778_v19 = vperm.slane %v11680_v26, 1 }
 0x544   : > { %v7529_v35 = vor.u32 %v8615_v24, %v7528_v57  ;;  %v8607_v34 = vld [vmem:[%s12792_s7 + $0x534] sm:$0xf0] }
 0x545   : > { %5085 = vmatpush.bf16.msrb.mxu2 %v7397_v18  ;;  %5060 = vmatpush.bf16.msrb.mxu0 %v6853_v23  ;;  %v7785_v18 = vor.u32 %v8679_v7, %v7784_v43  ;;  %v7752_v48 = vld [vmem:[%s12792_s7 + $0x718] sm:$0xf]  ;;  %v4854_v40 = vpop.f32.mrf.mxu0  ;;  %v7497_v39 = vor.u32 %v8607_v34, %v7496_v56 }
 0x546   : > { %v6952_v58 = vld [vmem:[%s12792_s7 + $0xd8] sm:$0xf]  ;;  %v4855_v31 = vadd.f32 %v4854_v40, %v4778_v19 }
 0x547   : > { %5098 = vmatpush.bf16.msrb.mxu3 %v7653_v50  ;;  %5073 = vmatpush.bf16.msrb.mxu1 %v7109_v2  ;;  %v8671_v50 = vld [vmem:[%s12792_s7 + $0x734] sm:$0xf0]  ;;  %v4867_v23 = vpop.f32.mrf.mxu1 }
 0x548   : > { %5061 = vmatmul.bf16.vlgmr.msrb.gmra.mxu0 %v10865_v5  ;;  %v8471_v28 = vld [vmem:[%s12792_s7 + $0xf4] sm:$0xf0]  ;;  %v7753_v12 = vor.u32 %v8671_v50, %v7752_v48  ;;  %v4868_v49 = vadd.f32 %v4867_v23, %v4855_v31  ;;  %v8627_v31 = vld [vmem:[%s12792_s7 + $0x5dc] sm:$0xf] }
 0x549   : > { %5086 = vmatpush.bf16.msrb.mxu2 %v7365_v0  ;;  %5105 = vmatpush.bf16.msra.mxu0 %v7081_v45  ;;  %v7208_v3 = vld [vmem:[%s12792_s7 + $0x2d8] sm:$0xf]  ;;  %v6953_v8 = vor.u32 %v8471_v28, %v6952_v58  ;;  %v8563_v58 = vld [vmem:[%s12792_s7 + $0x3dc] sm:$0xf] }
 0x54a   : > { %5074 = vmatmul.bf16.vlgmr.msrb.gmra.mxu1 %v10888_v9  ;;  %v8535_v41 = vld [vmem:[%s12792_s7 + $0x2f4] sm:$0xf0]  ;;  %v7594_v23 = vld [vmem:[%s12792_s7 + $0x5f8] sm:$0xf0] }
 0x54b   : > { %5099 = vmatpush.bf16.msrb.mxu3 %v7621_v54  ;;  %5118 = vmatpush.bf16.msra.mxu1 %v7337_v17  ;;  %v7464_v15 = vld [vmem:[%s12792_s7 + $0x4d8] sm:$0xf]  ;;  %v7209_v25 = vor.u32 %v8535_v41, %v7208_v3  ;;  %v7338_v3 = vld [vmem:[%s12792_s7 + $0x3f8] sm:$0xf0] }
 0x54c   : > { %5087 = vmatmul.bf16.vlgmr.msrb.gmra.mxu2 %v10863_v63  ;;  %v8599_v1 = vld [vmem:[%s12792_s7 + $0x4f4] sm:$0xf0] }
 0x54d   : > { %5131 = vmatpush.bf16.msra.mxu2 %v7593_v46  ;;  %5106 = vmatpush.bf16.msra.mxu0 %v7049_v59  ;;  %v7720_v2 = vld [vmem:[%s12792_s7 + $0x6d8] sm:$0xf]  ;;  %v7465_v54 = vor.u32 %v8599_v1, %v7464_v15  ;;  %v4856_v13 = vpop.f32.mrf.mxu0  ;;  %v8691_v15 = vld [vmem:[%s12792_s7 + $0x7dc] sm:$0xf] }
 0x54e   : > { %5100 = vmatmul.bf16.vlgmr.msrb.gmra.mxu3 %v10867_v42  ;;  %v8663_v0 = vld [vmem:[%s12792_s7 + $0x6f4] sm:$0xf0]  ;;  %v7850_v1 = vld [vmem:[%s12792_s7 + $0x7f8] sm:$0xf0] }
 0x54f   : > { %5144 = vmatpush.bf16.msra.mxu3 %v7849_v61  ;;  %5119 = vmatpush.bf16.msra.mxu1 %v7305_v36  ;;  %v6920_v45 = vld [vmem:[%s12792_s7 + $0x98] sm:$0xf]  ;;  %v4880_v38 = vpop.f32.mrf.mxu2  ;;  %v7721_v51 = vor.u32 %v8663_v0, %v7720_v2 }
 0x550   : > { %v8463_v17 = vld [vmem:[%s12792_s7 + $0xb4] sm:$0xf0]  ;;  %v4881_v20 = vadd.f32 %v4880_v38, %v4868_v49  ;;  %v7341_v49 = vor.u32 %v8563_v58, %v7338_v3  ;;  %v8619_v38 = vld [vmem:[%s12792_s7 + $0x59c] sm:$0xf] }
 0x551   : > { %5132 = vmatpush.bf16.msra.mxu2 %v7561_v16  ;;  %5107 = vmatpush.bf16.msra.mxu0 %v7017_v32  ;;  %v7176_v46 = vld [vmem:[%s12792_s7 + $0x298] sm:$0xf]  ;;  %v4893_v22 = vpop.f32.mrf.mxu3  ;;  %v6921_v6 = vor.u32 %v8463_v17, %v6920_v45  ;;  %v8555_v45 = vld [vmem:[%s12792_s7 + $0x39c] sm:$0xf]  ;;  %v7853_v17 = vor.u32 %v8691_v15, %v7850_v1 }
 0x552   : > { %v8527_v27 = vld [vmem:[%s12792_s7 + $0x2b4] sm:$0xf0]  ;;  %v11912_v59 = vadd.f32 %v4893_v22, %v4881_v20  ;;  %v7466_v58 = vld [vmem:[%s12792_s7 + $0x4f8] sm:$0xf0] }
 0x553   : > { %5145 = vmatpush.bf16.msra.mxu3 %v7817_v60  ;;  %5120 = vmatpush.bf16.msra.mxu1 %v7273_v14  ;;  %v7432_v61 = vld [vmem:[%s12792_s7 + $0x498] sm:$0xf]  ;;  %v7177_v36 = vor.u32 %v8527_v27, %v7176_v46  ;;  %v4869_v60 = vpop.f32.mrf.mxu1  ;;  %v7306_v46 = vld [vmem:[%s12792_s7 + $0x3b8] sm:$0xf0] }
 0x554   : > { %v8591_v10 = vld [vmem:[%s12792_s7 + $0x4b4] sm:$0xf0]  ;;  %v8683_v27 = vld [vmem:[%s12792_s7 + $0x79c] sm:$0xf]  ;;  %v7309_v20 = vor.u32 %v8555_v45, %v7306_v46 }
 0x555   : > { %5133 = vmatpush.bf16.msra.mxu2 %v7529_v35  ;;  %5108 = vmatpush.bf16.msra.mxu0 %v6985_v33  ;;  %v7688_v53 = vld [vmem:[%s12792_s7 + $0x698] sm:$0xf]  ;;  %v7433_v16 = vor.u32 %v8591_v10, %v7432_v61  ;;  %v7818_v61 = vld [vmem:[%s12792_s7 + $0x7b8] sm:$0xf0] }
 0x556   : > { %v8655_v44 = vld [vmem:[%s12792_s7 + $0x6b4] sm:$0xf0]  ;;  %v7821_v13 = vor.u32 %v8683_v27, %v7818_v61  ;;  %v7722_v3 = vld [vmem:[%s12792_s7 + $0x6f8] sm:$0xf0] }
 0x557   : > { %5146 = vmatpush.bf16.msra.mxu3 %v7785_v18  ;;  %5121 = vmatpush.bf16.msra.mxu1 %v7241_v52  ;;  %v6888_v55 = vld [vmem:[%s12792_s7 + $0x58] sm:$0xf]  ;;  %v7689_v21 = vor.u32 %v8655_v44, %v7688_v53  ;;  %v4882_v56 = vpop.f32.mrf.mxu2  ;;  %v8499_v52 = vld [vmem:[%s12792_s7 + $0x1dc] sm:$0xf] }
 0x558   : > { %v8455_v29 = vld [vmem:[%s12792_s7 + $0x74] sm:$0xf0]  ;;  %v8483_v53 = vld [vmem:[%s12792_s7 + $0x15c] sm:$0xf] }
 0x559   : > { %5134 = vmatpush.bf16.msra.mxu2 %v7497_v39  ;;  %5109 = vmatpush.bf16.msra.mxu0 %v6953_v8  ;;  %v7144_v11 = vld [vmem:[%s12792_s7 + $0x258] sm:$0xf]  ;;  %v6889_v47 = vor.u32 %v8455_v29, %v6888_v55  ;;  %v4895_v40 = vpop.f32.mrf.mxu3  ;;  %v7082_v39 = vld [vmem:[%s12792_s7 + $0x1f8] sm:$0xf0]  ;;  %v7597_v8 = vor.u32 %v8627_v31, %v7594_v23 }
 0x55a   : > { %v8519_v57 = vld [vmem:[%s12792_s7 + $0x274] sm:$0xf0]  ;;  %v7085_v0 = vor.u32 %v8499_v52, %v7082_v39  ;;  %v7018_v44 = vld [vmem:[%s12792_s7 + $0x178] sm:$0xf0] }
 0x55b   : > { %5147 = vmatpush.bf16.msra.mxu3 %v7753_v12  ;;  %5122 = vmatpush.bf16.msra.mxu1 %v7209_v25  ;;  %v7400_v24 = vld [vmem:[%s12792_s7 + $0x458] sm:$0xf]  ;;  %v7145_v4 = vor.u32 %v8519_v57, %v7144_v11  ;;  %v8491_v25 = vld [vmem:[%s12792_s7 + $0x19c] sm:$0xf]  ;;  %v7021_v60 = vor.u32 %v8483_v53, %v7018_v44 }
 0x55c   : > { %v8583_v43 = vld [vmem:[%s12792_s7 + $0x474] sm:$0xf0]  ;;  %v7530_v55 = vld [vmem:[%s12792_s7 + $0x578] sm:$0xf0] }
 0x55d   : > { %5135 = vmatpush.bf16.msra.mxu2 %v7465_v54  ;;  %v7656_v7 = vld [vmem:[%s12792_s7 + $0x658] sm:$0xf]  ;;  %5110 = vmatpush.bf16.msra.mxu0 %v6921_v6  ;;  %v7401_v30 = vor.u32 %v8583_v43, %v7400_v24  ;;  %v7050_v54 = vld [vmem:[%s12792_s7 + $0x1b8] sm:$0xf0] }
 0x55e   : > { %v8647_v32 = vld [vmem:[%s12792_s7 + $0x674] sm:$0xf0]  ;;  %v7053_v10 = vor.u32 %v8491_v25, %v7050_v54  ;;  %v8547_v6 = vld [vmem:[%s12792_s7 + $0x35c] sm:$0xf] }
 0x55f   : > { %5148 = vmatpush.bf16.msra.mxu3 %v7721_v51  ;;  %v6856_v14 = vld [vmem:[%s12792_s7 + $0x18] sm:$0xf]  ;;  %5123 = vmatpush.bf16.msra.mxu1 %v7177_v36  ;;  %v7657_v34 = vor.u32 %v8647_v32, %v7656_v7  ;;  %v7562_v51 = vld [vmem:[%s12792_s7 + $0x5b8] sm:$0xf0] }
 0x560   : > { %v8447_v35 = vld [vmem:[%s12792_s7 + $0x34] sm:$0xf0]  ;;  %v7565_v22 = vor.u32 %v8619_v38, %v7562_v51  ;;  %v7274_v36 = vld [vmem:[%s12792_s7 + $0x378] sm:$0xf0] }
 0x561   : > { %5136 = vmatpush.bf16.msra.mxu2 %v7433_v16  ;;  %v7112_v19 = vld [vmem:[%s12792_s7 + $0x218] sm:$0xf]  ;;  %5111 = vmatpush.bf16.msra.mxu0 %v6889_v47  ;;  %v6857_v28 = vor.u32 %v8447_v35, %v6856_v14  ;;  %v8611_v16 = vld [vmem:[%s12792_s7 + $0x55c] sm:$0xf] }
 0x562   : > { %v8511_v18 = vld [vmem:[%s12792_s7 + $0x234] sm:$0xf0]  ;;  %v8675_v29 = vld [vmem:[%s12792_s7 + $0x75c] sm:$0xf]  ;;  %v7533_v57 = vor.u32 %v8611_v16, %v7530_v55 }
 0x563   : > { %v7368_v37 = vld [vmem:[%s12792_s7 + $0x418] sm:$0xf]  ;;  %5149 = vmatpush.bf16.msra.mxu3 %v7689_v21  ;;  %5124 = vmatpush.bf16.msra.mxu1 %v7145_v4  ;;  %v7113_v12 = vor.u32 %v8511_v18, %v7112_v19  ;;  %v7786_v11 = vld [vmem:[%s12792_s7 + $0x778] sm:$0xf0]  ;;  %v7277_v21 = vor.u32 %v8547_v6, %v7274_v36 }
 0x564   : > { %v8575_v48 = vld [vmem:[%s12792_s7 + $0x434] sm:$0xf0]  ;;  %v8475_v24 = vld [vmem:[%s12792_s7 + $0x11c] sm:$0xf]  ;;  %v7789_v32 = vor.u32 %v8675_v29, %v7786_v11 }
 0x565   : > { %v7624_v50 = vld [vmem:[%s12792_s7 + $0x618] sm:$0xf]  ;;  %5137 = vmatpush.bf16.msra.mxu2 %v7401_v30  ;;  %v7369_v41 = vor.u32 %v8575_v48, %v7368_v37  ;;  %5112 = vmatpush.bf16.msra.mxu0 %v6857_v28  ;;  %v6986_v43 = vld [vmem:[%s12792_s7 + $0x138] sm:$0xf0]  ;;  %v12062_v18 = vpop.f32.mrf.mxu0 }
 0x566   : > { %v8639_v33 = vld [vmem:[%s12792_s7 + $0x634] sm:$0xf0]  ;;  %v8539_v7 = vld [vmem:[%s12792_s7 + $0x31c] sm:$0xf]  ;;  %v6989_v19 = vor.u32 %v8475_v24, %v6986_v43 }
 0x567   : > { %5150 = vmatpush.bf16.msra.mxu3 %v7657_v34  ;;  %v7625_v2 = vor.u32 %v8639_v33, %v7624_v50  ;;  %5125 = vmatpush.bf16.msra.mxu1 %v7113_v12  ;;  %v7242_v47 = vld [vmem:[%s12792_s7 + $0x338] sm:$0xf0]  ;;  %v12073_v33 = vpop.f32.mrf.mxu1 }
 0x568   : > { %5113 = vmatmul.bf16.vlgmr.msra.gmra.mxu0 %v10865_v5  ;;  %v8603_v14 = vld [vmem:[%s12792_s7 + $0x51c] sm:$0xf]  ;;  %v7245_v37 = vor.u32 %v8539_v7, %v7242_v47 }
 0x569   : > { %5138 = vmatpush.bf16.msra.mxu2 %v7369_v41  ;;  %5157 = vmatpush.bf16.msrb.mxu0 %v7085_v0  ;;  %v7498_v35 = vld [vmem:[%s12792_s7 + $0x538] sm:$0xf0] }
 0x56a   : > { %5126 = vmatmul.bf16.vlgmr.msra.gmra.mxu1 %v10888_v9  ;;  %v8667_v4 = vld [vmem:[%s12792_s7 + $0x71c] sm:$0xf]  ;;  %v7501_v56 = vor.u32 %v8603_v14, %v7498_v35 }
 0x56b   : > { %5151 = vmatpush.bf16.msra.mxu3 %v7625_v2  ;;  %5170 = vmatpush.bf16.msrb.mxu1 %v7341_v49  ;;  %v7754_v30 = vld [vmem:[%s12792_s7 + $0x738] sm:$0xf0] }
 0x56c   : > { %5139 = vmatmul.bf16.vlgmr.msra.gmra.mxu2 %v10863_v63  ;;  %v8467_v34 = vld [vmem:[%s12792_s7 + $0xdc] sm:$0xf]  ;;  %v7757_v40 = vor.u32 %v8667_v4, %v7754_v30  ;;  %v7912_v30 = vld [vmem:[%s12794_s9 + $0x70] sm:$0xf] }
 0x56d   : > { %5183 = vmatpush.bf16.msrb.mxu2 %v7597_v8  ;;  %5158 = vmatpush.bf16.msrb.mxu0 %v7053_v10  ;;  %v6954_v48 = vld [vmem:[%s12792_s7 + $0xf8] sm:$0xf0]  ;;  %v4908_v38 = vpop.f32.mrf.mxu0 }
 0x56e   : > { %5152 = vmatmul.bf16.vlgmr.msra.gmra.mxu3 %v10867_v42  ;;  %v8531_v50 = vld [vmem:[%s12792_s7 + $0x2dc] sm:$0xf]  ;;  %v6957_v31 = vor.u32 %v8467_v34, %v6954_v48  ;;  %v8727_v34 = vld [vmem:[%s12794_s9 + $0xf4] sm:$0xf0]  ;;  %v8040_v48 = vld [vmem:[%s12794_s9 + $0x170] sm:$0xf] }
 0x56f   : > { %5196 = vmatpush.bf16.msrb.mxu3 %v7853_v17  ;;  %5171 = vmatpush.bf16.msrb.mxu1 %v7309_v20  ;;  %v7210_v52 = vld [vmem:[%s12792_s7 + $0x2f8] sm:$0xf0]  ;;  %v12099_v2 = vpop.f32.mrf.mxu2 }
 0x570   : > { %v8595_v39 = vld [vmem:[%s12792_s7 + $0x4dc] sm:$0xf]  ;;  %v7213_v23 = vor.u32 %v8531_v50, %v7210_v52  ;;  %v8743_v50 = vld [vmem:[%s12794_s9 + $0x174] sm:$0xf0] }
 0x571   : > { %5184 = vmatpush.bf16.msrb.mxu2 %v7565_v22  ;;  %5159 = vmatpush.bf16.msrb.mxu0 %v7021_v60  ;;  %v8659_v28 = vld [vmem:[%s12792_s7 + $0x6dc] sm:$0xf]  ;;  %v7469_v12 = vor.u32 %v8595_v39, %v7466_v58  ;;  %v12110_v54 = vpop.f32.mrf.mxu3  ;;  %v4921_v22 = vpop.f32.mrf.mxu1  ;;  %v8104_v39 = vld [vmem:[%s12794_s9 + $0x1f0] sm:$0xf]  ;;  %v8759_v58 = vld [vmem:[%s12794_s9 + $0x1f4] sm:$0xf0] }
 0x572   : > { %v8459_v41 = vld [vmem:[%s12792_s7 + $0x9c] sm:$0xf]  ;;  %v7725_v0 = vor.u32 %v8659_v28, %v7722_v3  ;;  %v8024_v22 = vld [vmem:[%s12794_s9 + $0x150] sm:$0xf] }
 0x573   : > { %5197 = vmatpush.bf16.msrb.mxu3 %v7821_v13  ;;  %5172 = vmatpush.bf16.msrb.mxu1 %v7277_v21  ;;  %v6922_v15 = vld [vmem:[%s12792_s7 + $0xb8] sm:$0xf0] }
 0x574   : > { %v8523_v1 = vld [vmem:[%s12792_s7 + $0x29c] sm:$0xf]  ;;  %v6925_v46 = vor.u32 %v8459_v41, %v6922_v15  ;;  %v8709_v41 = vld [vmem:[%s12794_s9 + $0x64] sm:$0xf0]  ;;  %v7968_v15 = vld [vmem:[%s12794_s9 + $0xe0] sm:$0xf] }
 0x575   : > { %5185 = vmatpush.bf16.msrb.mxu2 %v7533_v57  ;;  %5160 = vmatpush.bf16.msrb.mxu0 %v6989_v19  ;;  %v7178_v49 = vld [vmem:[%s12792_s7 + $0x2b8] sm:$0xf0]  ;;  %v8711_v19 = vld [vmem:[%s12794_s9 + $0x74] sm:$0xf0] }
 0x576   : > { %v8587_v8 = vld [vmem:[%s12792_s7 + $0x49c] sm:$0xf]  ;;  %v7181_v51 = vor.u32 %v8523_v1, %v7178_v49  ;;  %v7913_v3 = vor.u32 %v8711_v19, %v7912_v30  ;;  %v8105_v1 = vor.u32 %v8759_v58, %v8104_v39  ;;  %v8032_v49 = vld [vmem:[%s12794_s9 + $0x160] sm:$0xf] }
 0x577   : > { %5198 = vmatpush.bf16.msrb.mxu3 %v7789_v32  ;;  %5173 = vmatpush.bf16.msrb.mxu1 %v7245_v37  ;;  %v7434_v25 = vld [vmem:[%s12792_s7 + $0x4b8] sm:$0xf0]  ;;  %v4934_v7 = vpop.f32.mrf.mxu2  ;;  %v7976_v37 = vld [vmem:[%s12794_s9 + $0xf0] sm:$0xf]  ;;  %v7872_v58 = vld [vmem:[%s12794_s9 + $0x20] sm:$0xf] }
 0x578   : > { %v8651_v45 = vld [vmem:[%s12792_s7 + $0x69c] sm:$0xf]  ;;  %v7437_v27 = vor.u32 %v8587_v8, %v7434_v25  ;;  %v8741_v8 = vld [vmem:[%s12794_s9 + $0x164] sm:$0xf0]  ;;  %v8096_v25 = vld [vmem:[%s12794_s9 + $0x1e0] sm:$0xf] }
 0x579   : > { %5186 = vmatpush.bf16.msrb.mxu2 %v7501_v56  ;;  %v7690_v17 = vld [vmem:[%s12792_s7 + $0x6b8] sm:$0xf0]  ;;  %5161 = vmatpush.bf16.msrb.mxu0 %v6957_v31  ;;  %v4947_v4 = vpop.f32.mrf.mxu3  ;;  %v7977_v31 = vor.u32 %v8727_v34, %v7976_v37  ;;  %v8033_v38 = vor.u32 %v8741_v8, %v8032_v49  ;;  %v8719_v37 = vld [vmem:[%s12794_s9 + $0xb4] sm:$0xf0]  ;;  %v8749_v8 = vld [vmem:[%s12794_s9 + $0x1a4] sm:$0xf0] }
 0x57a   : > { %v8451_v61 = vld [vmem:[%s12792_s7 + $0x5c] sm:$0xf]  ;;  %v7693_v53 = vor.u32 %v8651_v45, %v7690_v17  ;;  %v8757_v45 = vld [vmem:[%s12794_s9 + $0x1e4] sm:$0xf0]  ;;  %v8735_v34 = vld [vmem:[%s12794_s9 + $0x134] sm:$0xf0] }
 0x57b   : > { %5199 = vmatpush.bf16.msrb.mxu3 %v7757_v40  ;;  %5174 = vmatpush.bf16.msrb.mxu1 %v7213_v23  ;;  %v6890_v10 = vld [vmem:[%s12792_s7 + $0x78] sm:$0xf0]  ;;  %v8041_v23 = vor.u32 %v8743_v50, %v8040_v48  ;;  %v8072_v50 = vld [vmem:[%s12794_s9 + $0x1b0] sm:$0xf] }
 0x57c   : > { %v8515_v20 = vld [vmem:[%s12792_s7 + $0x25c] sm:$0xf]  ;;  %v6893_v55 = vor.u32 %v8451_v61, %v6890_v10  ;;  %v7960_v61 = vld [vmem:[%s12794_s9 + $0xd0] sm:$0xf]  ;;  %v8097_v10 = vor.u32 %v8757_v45, %v8096_v25 }
 0x57d   : > { %5187 = vmatpush.bf16.msrb.mxu2 %v7469_v12  ;;  %v7146_v44 = vld [vmem:[%s12792_s7 + $0x278] sm:$0xf0]  ;;  %5162 = vmatpush.bf16.msrb.mxu0 %v6925_v46  ;;  %v7904_v12 = vld [vmem:[%s12794_s9 + $0x60] sm:$0xf] }
 0x57e   : > { %v8579_v6 = vld [vmem:[%s12792_s7 + $0x45c] sm:$0xf]  ;;  %v7149_v60 = vor.u32 %v8515_v20, %v7146_v44  ;;  %v7905_v17 = vor.u32 %v8709_v41, %v7904_v12  ;;  %v8723_v20 = vld [vmem:[%s12794_s9 + $0xd4] sm:$0xf0]  ;;  %v8088_v44 = vld [vmem:[%s12794_s9 + $0x1d0] sm:$0xf] }
 0x57f   : > { %5200 = vmatpush.bf16.msrb.mxu3 %v7725_v0  ;;  %v7402_v13 = vld [vmem:[%s12792_s7 + $0x478] sm:$0xf0]  ;;  %5175 = vmatpush.bf16.msrb.mxu1 %v7181_v51  ;;  %v8725_v0 = vld [vmem:[%s12794_s9 + $0xe4] sm:$0xf0]  ;;  %v7896_v51 = vld [vmem:[%s12794_s9 + $0x50] sm:$0xf] }
 0x580   : > { %v8643_v36 = vld [vmem:[%s12792_s7 + $0x65c] sm:$0xf]  ;;  %v7405_v21 = vor.u32 %v8579_v6, %v7402_v13  ;;  %v7969_v46 = vor.u32 %v8725_v0, %v7968_v15  ;;  %v8755_v6 = vld [vmem:[%s12794_s9 + $0x1d4] sm:$0xf0]  ;;  %v8717_v41 = vld [vmem:[%s12794_s9 + $0xa4] sm:$0xf0] }
 0x581   : > { %v7658_v16 = vld [vmem:[%s12792_s7 + $0x678] sm:$0xf0]  ;;  %5188 = vmatpush.bf16.msrb.mxu2 %v7437_v27  ;;  %5163 = vmatpush.bf16.msrb.mxu0 %v6893_v55  ;;  %v8707_v27 = vld [vmem:[%s12794_s9 + $0x54] sm:$0xf0]  ;;  %v8705_v55 = vld [vmem:[%s12794_s9 + $0x44] sm:$0xf0] }
 0x582   : > { %v8443_v29 = vld [vmem:[%s12792_s7 + $0x1c] sm:$0xf]  ;;  %v7661_v32 = vor.u32 %v8643_v36, %v7658_v16  ;;  %v7897_v13 = vor.u32 %v8707_v27, %v7896_v51  ;;  %v7888_v36 = vld [vmem:[%s12794_s9 + $0x40] sm:$0xf]  ;;  %v8699_v51 = vld [vmem:[%s12794_s9 + $0x14] sm:$0xf0] }
 0x583   : > { %v6858_v11 = vld [vmem:[%s12792_s7 + $0x38] sm:$0xf0]  ;;  %5201 = vmatpush.bf16.msrb.mxu3 %v7693_v53  ;;  %5176 = vmatpush.bf16.msrb.mxu1 %v7149_v60  ;;  %v8739_v53 = vld [vmem:[%s12794_s9 + $0x154] sm:$0xf0]  ;;  %v8737_v60 = vld [vmem:[%s12794_s9 + $0x144] sm:$0xf0] }
 0x584   : > { %v8507_v57 = vld [vmem:[%s12792_s7 + $0x21c] sm:$0xf]  ;;  %v6861_v56 = vor.u32 %v8443_v29, %v6858_v11  ;;  %v8025_v16 = vor.u32 %v8739_v53, %v8024_v22  ;;  %v4779_v29 = vperm.slane %v11680_v26, 2  ;;  %v8016_v11 = vld [vmem:[%s12794_s9 + $0x140] sm:$0xf] }
 0x585   : > { %v7114_v24 = vld [vmem:[%s12792_s7 + $0x238] sm:$0xf0]  ;;  %5189 = vmatpush.bf16.msrb.mxu2 %v7405_v21  ;;  %v4780_v21 = vperm.slane %v11680_v26, 3  ;;  %v4958_v7 = vpop.f32.mrf.mxu0  ;;  %v8703_v26 = vld [vmem:[%s12794_s9 + $0x34] sm:$0xf0] }
 0x586   : > { %v8571_v43 = vld [vmem:[%s12792_s7 + $0x41c] sm:$0xf]  ;;  %v7117_v40 = vor.u32 %v8507_v57, %v7114_v24  ;;  %5164 = vmatpush.bf16.msrb.mxu0 %v6861_v56  ;;  %v8080_v57 = vld [vmem:[%s12794_s9 + $0x1c0] sm:$0xf]  ;;  %v8753_v24 = vld [vmem:[%s12794_s9 + $0x1c4] sm:$0xf0]  ;;  %v4907_v30 = vadd.f32 %v12062_v18, %v4779_v29 }
 0x587   : > { %v7370_v47 = vld [vmem:[%s12792_s7 + $0x438] sm:$0xf0]  ;;  %5202 = vmatpush.bf16.msrb.mxu3 %v7661_v32  ;;  %v4971_v4 = vpop.f32.mrf.mxu1  ;;  %v8081_v19 = vor.u32 %v8753_v24, %v8080_v57  ;;  %v8008_v56 = vld [vmem:[%s12794_s9 + $0x130] sm:$0xf]  ;;  %v4959_v48 = vadd.f32 %v4958_v7, %v4780_v21  ;;  %v8751_v18 = vld [vmem:[%s12794_s9 + $0x1b4] sm:$0xf0] }
 0x588   : > { %v8635_v14 = vld [vmem:[%s12792_s7 + $0x61c] sm:$0xf]  ;;  %v7373_v52 = vor.u32 %v8571_v43, %v7370_v47  ;;  %5177 = vmatpush.bf16.msrb.mxu1 %v7117_v40  ;;  %v7889_v43 = vor.u32 %v8705_v55, %v7888_v36  ;;  %v8017_v47 = vor.u32 %v8737_v60, %v8016_v11  ;;  %v8009_v39 = vor.u32 %v8735_v34, %v8008_v56  ;;  %v8000_v15 = vld [vmem:[%s12794_s9 + $0x120] sm:$0xf]  ;;  %v7928_v27 = vld [vmem:[%s12794_s9 + $0x90] sm:$0xf] }
 0x589   : > { %v7626_v35 = vld [vmem:[%s12792_s7 + $0x638] sm:$0xf0]  ;;  %5165 = vmatmul.bf16.vlgmr.msrb.gmra.mxu0 %v10865_v5  ;;  %v7961_v5 = vor.u32 %v8723_v20, %v7960_v61  ;;  %v8073_v12 = vor.u32 %v8751_v18, %v8072_v50  ;;  %v4972_v0 = vadd.f32 %v4971_v4, %v4959_v48  ;;  %v8715_v53 = vld [vmem:[%s12794_s9 + $0x94] sm:$0xf0]  ;;  %v8713_v29 = vld [vmem:[%s12794_s9 + $0x84] sm:$0xf0] }
 0x58a   : > { %v7629_v28 = vor.u32 %v8635_v14, %v7626_v35  ;;  %5190 = vmatpush.bf16.msrb.mxu2 %v7373_v52  ;;  %5615 = vmatpush.bf16.msra.mxu0 %v7913_v3  ;;  %v7880_v14 = vld [vmem:[%s12794_s9 + $0x30] sm:$0xf]  ;;  %v7936_v3 = vld [vmem:[%s12794_s9 + $0xa0] sm:$0xf]  ;;  %v7929_v55 = vor.u32 %v8715_v53, %v7928_v27  ;;  %v8729_v24 = vld [vmem:[%s12794_s9 + $0x104] sm:$0xf0] }
 0x58b   : > { %5178 = vmatmul.bf16.vlgmr.msrb.gmra.mxu1 %v10888_v9  ;;  %v8721_v9 = vld [vmem:[%s12794_s9 + $0xc4] sm:$0xf0]  ;;  %v7944_v35 = vld [vmem:[%s12794_s9 + $0xb0] sm:$0xf]  ;;  %v7881_v40 = vor.u32 %v8703_v26, %v7880_v14  ;;  %v8726_v14 = vld [vmem:[%s12794_s9 + $0xf4] sm:$0xf] }
 0x58c   : > { %5203 = vmatpush.bf16.msrb.mxu3 %v7629_v28  ;;  %5628 = vmatpush.bf16.msra.mxu1 %v7977_v31  ;;  %v7945_v52 = vor.u32 %v8719_v37, %v7944_v35  ;;  %v8701_v28 = vld [vmem:[%s12794_s9 + $0x24] sm:$0xf0]  ;;  %v7978_v35 = vld [vmem:[%s12794_s9 + $0xf8] sm:$0xf0]  ;;  %v8742_v4 = vld [vmem:[%s12794_s9 + $0x174] sm:$0xf] }
 0x58d   : > { %5191 = vmatmul.bf16.vlgmr.msrb.gmra.mxu2 %v10863_v63  ;;  %v7952_v63 = vld [vmem:[%s12794_s9 + $0xc0] sm:$0xf]  ;;  %v7873_v25 = vor.u32 %v8701_v28, %v7872_v58  ;;  %v4960_v45 = vpop.f32.mrf.mxu0  ;;  %v8745_v7 = vld [vmem:[%s12794_s9 + $0x184] sm:$0xf0]  ;;  %v5210_v37 = vmax.f32 %v11912_v59, 0.0 }
 0x58e   : > { %5641 = vmatpush.bf16.msra.mxu2 %v8041_v23  ;;  %5616 = vmatpush.bf16.msra.mxu0 %v7905_v17  ;;  %v7953_v32 = vor.u32 %v8721_v9, %v7952_v63  ;;  %v4920_v23 = vadd.f32 %v12073_v33, %v4907_v30  ;;  %v8064_v33 = vld [vmem:[%s12794_s9 + $0x1a0] sm:$0xf]  ;;  %v7937_v17 = vor.u32 %v8717_v41, %v7936_v3  ;;  %v8042_v30 = vld [vmem:[%s12794_s9 + $0x178] sm:$0xf0]  ;;  %v8758_v48 = vld [vmem:[%s12794_s9 + $0x1f4] sm:$0xf] }
 0x58f   : > { %5204 = vmatmul.bf16.vlgmr.msrb.gmra.mxu3 %v10867_v42  ;;  %v8089_v42 = vor.u32 %v8755_v6, %v8088_v44  ;;  %v4984_v31 = vpop.f32.mrf.mxu2  ;;  %v4973_v61 = vpop.f32.mrf.mxu1  ;;  %v8065_v20 = vor.u32 %v8749_v8, %v8064_v33  ;;  %v7992_v44 = vld [vmem:[%s12794_s9 + $0x110] sm:$0xf]  ;;  %v8731_v6 = vld [vmem:[%s12794_s9 + $0x114] sm:$0xf0]  ;;  %v7920_v9 = vld [vmem:[%s12794_s9 + $0x80] sm:$0xf]  ;;  %v8045_v58 = vor.u32 %v8742_v4, %v8042_v30 }
 0x590   : > { %5654 = vmatpush.bf16.msra.mxu3 %v8105_v1  ;;  %5629 = vmatpush.bf16.msra.mxu1 %v7969_v46  ;;  %v8733_v1 = vld [vmem:[%s12794_s9 + $0x124] sm:$0xf0]  ;;  %v4985_v22 = vadd.f32 %v4984_v31, %v4972_v0  ;;  %v7993_v63 = vor.u32 %v8731_v6, %v7992_v44  ;;  %v7921_v56 = vor.u32 %v8713_v29, %v7920_v9  ;;  %v8106_v50 = vld [vmem:[%s12794_s9 + $0x1f8] sm:$0xf0]  ;;  %v8708_v59 = vld [vmem:[%s12794_s9 + $0x64] sm:$0xf] }
 0x591   : > { %v4997_v49 = vpop.f32.mrf.mxu3  ;;  %v8001_v46 = vor.u32 %v8733_v1, %v8000_v15  ;;  %v7906_v28 = vld [vmem:[%s12794_s9 + $0x68] sm:$0xf0]  ;;  %v8724_v3 = vld [vmem:[%s12794_s9 + $0xe4] sm:$0xf]  ;;  %v8109_v31 = vor.u32 %v8758_v48, %v8106_v50  ;;  %v7962_v61 = vld [vmem:[%s12794_s9 + $0xd8] sm:$0xf0] }
 0x592   : > { %5642 = vmatpush.bf16.msra.mxu2 %v8033_v38  ;;  %5617 = vmatpush.bf16.msra.mxu0 %v7897_v13  ;;  %v7864_v38 = vld [vmem:[%s12794_s9 + $0x10] sm:$0xf]  ;;  %v4998_v57 = vadd.f32 %v4997_v49, %v4985_v22  ;;  %v8034_v41 = vld [vmem:[%s12794_s9 + $0x168] sm:$0xf0]  ;;  %v8756_v1 = vld [vmem:[%s12794_s9 + $0x1e4] sm:$0xf]  ;;  %v12420_v49 = vpack.c.bf16 %v5210_v37, %v5210_v37  ;;  %v7909_v8 = vor.u32 %v8708_v59, %v7906_v28 }
 0x593   : > { %v8056_v13 = vld [vmem:[%s12794_s9 + $0x190] sm:$0xf]  ;;  %v7865_v36 = vor.u32 %v8699_v51, %v7864_v38  ;;  %v8098_v0 = vld [vmem:[%s12794_s9 + $0x1e8] sm:$0xf0]  ;;  %v7898_v38 = vld [vmem:[%s12794_s9 + $0x58] sm:$0xf0] }
 0x594   : > { %5655 = vmatpush.bf16.msra.mxu3 %v8097_v10  ;;  %5630 = vmatpush.bf16.msra.mxu1 %v7961_v5  ;;  %v4933_v10 = vadd.f32 %v12099_v2, %v4920_v23  ;;  %v8747_v2 = vld [vmem:[%s12794_s9 + $0x194] sm:$0xf0]  ;;  %v7856_v5 = vld [vmem:[%s12794_s9] sm:$0xf]  ;;  %v7970_v23 = vld [vmem:[%s12794_s9 + $0xe8] sm:$0xf0]  ;;  %v8101_v27 = vor.u32 %v8756_v1, %v8098_v0 }
 0x595   : > { %v8057_v21 = vor.u32 %v8747_v2, %v8056_v13  ;;  %v7973_v45 = vor.u32 %v8724_v3, %v7970_v23  ;;  %v8722_v51 = vld [vmem:[%s12794_s9 + $0xd4] sm:$0xf]  ;;  %v8090_v53 = vld [vmem:[%s12794_s9 + $0x1d8] sm:$0xf0]  ;;  %v8704_v2 = vld [vmem:[%s12794_s9 + $0x44] sm:$0xf] }
 0x596   : > { %5643 = vmatpush.bf16.msra.mxu2 %v8025_v16  ;;  %5618 = vmatpush.bf16.msra.mxu0 %v7889_v43  ;;  %v8697_v16 = vld [vmem:[%s12794_s9 + $0x4] sm:$0xf0]  ;;  %v4946_v60 = vadd.f32 %v12110_v54, %v4933_v10  ;;  %v8048_v43 = vld [vmem:[%s12794_s9 + $0x180] sm:$0xf]  ;;  %v8710_v54 = vld [vmem:[%s12794_s9 + $0x74] sm:$0xf]  ;;  %v7965_v6 = vor.u32 %v8722_v51, %v7962_v61 }
 0x597   : > { %v4986_v11 = vpop.f32.mrf.mxu2  ;;  %v7857_v26 = vor.u32 %v8697_v16, %v7856_v5  ;;  %v8738_v10 = vld [vmem:[%s12794_s9 + $0x154] sm:$0xf]  ;;  %v8720_v5 = vld [vmem:[%s12794_s9 + $0xc4] sm:$0xf]  ;;  %v8018_v9 = vld [vmem:[%s12794_s9 + $0x148] sm:$0xf0] }
 0x598   : > { %5656 = vmatpush.bf16.msra.mxu3 %v8089_v42  ;;  %5631 = vmatpush.bf16.msra.mxu1 %v7953_v32  ;;  %v7984_v42 = vld [vmem:[%s12794_s9 + $0x100] sm:$0xf]  ;;  %v5211_v18 = vmax.f32 %v4946_v60, 0.0  ;;  %v8754_v22 = vld [vmem:[%s12794_s9 + $0x1d4] sm:$0xf] }
 0x599   : > { %v4999_v32 = vpop.f32.mrf.mxu3  ;;  %v7985_v34 = vor.u32 %v8729_v24, %v7984_v42  ;;  %v8093_v16 = vor.u32 %v8754_v22, %v8090_v53  ;;  %v8752_v29 = vld [vmem:[%s12794_s9 + $0x1c4] sm:$0xf]  ;;  %v8082_v42 = vld [vmem:[%s12794_s9 + $0x1c8] sm:$0xf0]  ;;  %v8702_v24 = vld [vmem:[%s12794_s9 + $0x34] sm:$0xf] }
 0x59a   : > { %5644 = vmatpush.bf16.msra.mxu2 %v8017_v47  ;;  %5619 = vmatpush.bf16.msra.mxu0 %v7881_v40  ;;  %v7914_v47 = vld [vmem:[%s12794_s9 + $0x78] sm:$0xf0]  ;;  %v5212_v40 = vmax.f32 %v4998_v57, 0.0  ;;  %v8716_v48 = vld [vmem:[%s12794_s9 + $0xa4] sm:$0xf] }
 0x59b   : > { %v8074_v4 = vld [vmem:[%s12794_s9 + $0x1b8] sm:$0xf0]  ;;  %v8066_v59 = vld [vmem:[%s12794_s9 + $0x1a8] sm:$0xf0]  ;;  %v8714_v1 = vld [vmem:[%s12794_s9 + $0x94] sm:$0xf] }
 0x59c   : > { %5657 = vmatpush.bf16.msra.mxu3 %v8081_v19  ;;  %5632 = vmatpush.bf16.msra.mxu1 %v7945_v52  ;;  %v5209_v19 = vmax.f32 %v11779_v62, 0.0  ;;  %v8049_v52 = vor.u32 %v8745_v7, %v8048_v43  ;;  %v7981_v62 = vor.u32 %v8726_v14, %v7978_v35  ;;  %v12422_v33 = vpack.c.bf16 %v5212_v40, %v5212_v40  ;;  %v7882_v43 = vld [vmem:[%s12794_s9 + $0x38] sm:$0xf0]  ;;  %v8718_v7 = vld [vmem:[%s12794_s9 + $0xb4] sm:$0xf] }
 0x59d   : > { %v8734_v14 = vld [vmem:[%s12794_s9 + $0x134] sm:$0xf]  ;;  %v7885_v30 = vor.u32 %v8702_v24, %v7882_v43  ;;  %v7938_v40 = vld [vmem:[%s12794_s9 + $0xa8] sm:$0xf0]  ;;  %v8058_v51 = vld [vmem:[%s12794_s9 + $0x198] sm:$0xf0] }
 0x59e   : > { %5645 = vmatpush.bf16.msra.mxu2 %v8009_v39  ;;  %5620 = vmatpush.bf16.msra.mxu0 %v7873_v25  ;;  %v7917_v39 = vor.u32 %v8710_v54, %v7914_v47  ;;  %v12412_v15 = vpack.c.bf16 %v5209_v19, %v5209_v19  ;;  %v12424_v25 = vpack.c.bf16 %v5211_v18, %v5211_v18  ;;  %v7946_v47 = vld [vmem:[%s12794_s9 + $0xb8] sm:$0xf0]  ;;  %v8750_v35 = vld [vmem:[%s12794_s9 + $0x1b4] sm:$0xf]  ;;  %v7858_v22 = vld [vmem:[%s12794_s9 + $0x8] sm:$0xf0] }
 0x59f   : > { %v8085_v54 = vor.u32 %v8752_v29, %v8082_v42  ;;  %v7949_v19 = vor.u32 %v8718_v7, %v7946_v47  ;;  %v8077_v18 = vor.u32 %v8750_v35, %v8074_v4  ;;  %v8712_v53 = vld [vmem:[%s12794_s9 + $0x84] sm:$0xf]  ;;  %v8790_v24 = vld [vmem:[%s12798_s13 + $0x70] sm:$0xff]  ;;  %v8781_v43 = vld [vmem:[%s12798_s13 + $0x28] sm:$0xff] }
 0x5a0   : > { %5658 = vmatpush.bf16.msra.mxu3 %v8073_v12  ;;  %5633 = vmatpush.bf16.msra.mxu1 %v7937_v17  ;;  %v8740_v12 = vld [vmem:[%s12794_s9 + $0x164] sm:$0xf]  ;;  %v8779_v4 = vld [vmem:[%s12798_s13 + $0x18] sm:$0xff] }
 0x5a1   : > { %v8037_v17 = vor.u32 %v8740_v12, %v8034_v41  ;;  %v8698_v12 = vld [vmem:[%s12794_s9 + $0x14] sm:$0xf]  ;;  %v7866_v41 = vld [vmem:[%s12794_s9 + $0x18] sm:$0xf0] }
 0x5a2   : > { %5646 = vmatpush.bf16.msra.mxu2 %v8001_v46  ;;  %5621 = vmatpush.bf16.msra.mxu0 %v7865_v36  ;;  %v8706_v46 = vld [vmem:[%s12794_s9 + $0x54] sm:$0xf]  ;;  %v7890_v36 = vld [vmem:[%s12794_s9 + $0x48] sm:$0xf0] }
 0x5a3   : > { %v7901_v44 = vor.u32 %v8706_v46, %v7898_v38  ;;  %v7893_v11 = vor.u32 %v8704_v2, %v7890_v36  ;;  %v7994_v46 = vld [vmem:[%s12794_s9 + $0x118] sm:$0xf0]  ;;  %v8746_v38 = vld [vmem:[%s12794_s9 + $0x194] sm:$0xf]  ;;  %v8728_v2 = vld [vmem:[%s12794_s9 + $0x104] sm:$0xf] }
 0x5a4   : > { %5659 = vmatpush.bf16.msra.mxu3 %v8065_v20  ;;  %5634 = vmatpush.bf16.msra.mxu1 %v7929_v55  ;;  %v8026_v20 = vld [vmem:[%s12794_s9 + $0x158] sm:$0xf0]  ;;  %v7954_v55 = vld [vmem:[%s12794_s9 + $0xc8] sm:$0xf0] }
 0x5a5   : > { %v8029_v13 = vor.u32 %v8738_v10, %v8026_v20  ;;  %v12478_v60 = vpop.f32.mrf.mxu0  ;;  %v8696_v20 = vld [vmem:[%s12794_s9 + $0x4] sm:$0xf]  ;;  %v7986_v36 = vld [vmem:[%s12794_s9 + $0x108] sm:$0xf0] }
 0x5a6   : > { %5647 = vmatpush.bf16.msra.mxu2 %v7993_v63  ;;  %5622 = vmatpush.bf16.msra.mxu0 %v7857_v26  ;;  %v8736_v63 = vld [vmem:[%s12794_s9 + $0x144] sm:$0xf]  ;;  %v8010_v26 = vld [vmem:[%s12794_s9 + $0x138] sm:$0xf0]  ;;  %v7989_v29 = vor.u32 %v8728_v2, %v7986_v36  ;;  %v8761_v36 = vld [vmem:[%s12796_s11 + $0x8] sm:$0xff] }
 0x5a7   : > { %v8021_v57 = vor.u32 %v8736_v63, %v8018_v9  ;;  %v12489_v32 = vpop.f32.mrf.mxu1  ;;  %v8013_v37 = vor.u32 %v8734_v14, %v8010_v26  ;;  %v7861_v63 = vor.u32 %v8696_v20, %v7858_v22  ;;  %v8788_v14 = vld [vmem:[%s12798_s13 + $0x60] sm:$0xff]  ;;  %v8762_v22 = vld [vmem:[%s12796_s11 + $0x10] sm:$0xff] }
 0x5a8   : > { %5660 = vmatpush.bf16.msra.mxu3 %v8057_v21  ;;  %5635 = vmatpush.bf16.msra.mxu1 %v7921_v56  ;;  %v7957_v21 = vor.u32 %v8720_v5, %v7954_v55  ;;  %v8700_v56 = vld [vmem:[%s12794_s9 + $0x24] sm:$0xf]  ;;  %v8050_v55 = vld [vmem:[%s12794_s9 + $0x188] sm:$0xf0] }
 0x5a9   : > { %5623 = vmatmul.bf16.vlgmr.msra.gmra.mxu0 %v12412_v15 }
 0x5aa   : > { %5648 = vmatpush.bf16.msra.mxu2 %v7985_v34  ;;  %5667 = vmatpush.bf16.msrb.mxu0 %v7917_v39  ;;  %v7874_v34 = vld [vmem:[%s12794_s9 + $0x28] sm:$0xf0] }
 0x5ab   : > { %5636 = vmatmul.bf16.vlgmr.msra.gmra.mxu1 %v12420_v49  ;;  %v8002_v39 = vld [vmem:[%s12794_s9 + $0x128] sm:$0xf0]  ;;  %v7877_v28 = vor.u32 %v8700_v56, %v7874_v34  ;;  %v8778_v34 = vld [vmem:[%s12798_s13 + $0x10] sm:$0xff] }
 0x5ac   : > { %5661 = vmatpush.bf16.msra.mxu3 %v8049_v52  ;;  %5680 = vmatpush.bf16.msrb.mxu1 %v7981_v62  ;;  %v8732_v52 = vld [vmem:[%s12794_s9 + $0x124] sm:$0xf] }
 0x5ad   : > { %5649 = vmatmul.bf16.vlgmr.msra.gmra.mxu2 %v12424_v25  ;;  %v5012_v3 = vpop.f32.mrf.mxu0  ;;  %v8005_v23 = vor.u32 %v8732_v52, %v8002_v39  ;;  %v8767_v39 = vld [vmem:[%s12796_s11 + $0x38] sm:$0xff] }
 0x5ae   : > { %5693 = vmatpush.bf16.msrb.mxu2 %v8045_v58  ;;  %5668 = vmatpush.bf16.msrb.mxu0 %v7909_v8  ;;  %v8748_v58 = vld [vmem:[%s12794_s9 + $0x1a4] sm:$0xf]  ;;  %v8785_v3 = vld [vmem:[%s12798_s13 + $0x48] sm:$0xff] }
 0x5af   : > { %5662 = vmatmul.bf16.vlgmr.msra.gmra.mxu3 %v12422_v33  ;;  %v12515_v50 = vpop.f32.mrf.mxu2  ;;  %v5025_v0 = vpop.f32.mrf.mxu1  ;;  %v8069_v8 = vor.u32 %v8748_v58, %v8066_v59  ;;  %v8777_v58 = vld [vmem:[%s12798_s13 + $0x8] sm:$0xff] }
 0x5b0   : > { %5706 = vmatpush.bf16.msrb.mxu3 %v8109_v31  ;;  %5681 = vmatpush.bf16.msrb.mxu1 %v7973_v45  ;;  %v7941_v31 = vor.u32 %v8716_v48, %v7938_v40  ;;  %v7930_v45 = vld [vmem:[%s12794_s9 + $0x98] sm:$0xf0] }
 0x5b1   : > { %v12526_v62 = vpop.f32.mrf.mxu3  ;;  %v7933_v61 = vor.u32 %v8714_v1, %v7930_v45  ;;  %v8765_v1 = vld [vmem:[%s12796_s11 + $0x28] sm:$0xff]  ;;  %v8764_v45 = vld [vmem:[%s12796_s11 + $0x20] sm:$0xff] }
 0x5b2   : > { %5694 = vmatpush.bf16.msrb.mxu2 %v8037_v17  ;;  %5669 = vmatpush.bf16.msrb.mxu0 %v7901_v44  ;;  %v8730_v17 = vld [vmem:[%s12794_s9 + $0x114] sm:$0xf] }
 0x5b3   : > { %v7997_v10 = vor.u32 %v8730_v17, %v7994_v46 }
 0x5b4   : > { %5707 = vmatpush.bf16.msrb.mxu3 %v8101_v27  ;;  %5682 = vmatpush.bf16.msrb.mxu1 %v7965_v6  ;;  %v7869_v27 = vor.u32 %v8698_v12, %v7866_v41  ;;  %v8061_v6 = vor.u32 %v8746_v38, %v8058_v51  ;;  %v8776_v41 = vld [vmem:[%s12798_s13] sm:$0xff]  ;;  %v8763_v51 = vld [vmem:[%s12796_s11 + $0x18] sm:$0xff] }
 0x5b6   : > { %5695 = vmatpush.bf16.msrb.mxu2 %v8029_v13  ;;  %5670 = vmatpush.bf16.msrb.mxu0 %v7893_v11  ;;  %v7922_v13 = vld [vmem:[%s12794_s9 + $0x88] sm:$0xf0]  ;;  %v8783_v11 = vld [vmem:[%s12798_s13 + $0x38] sm:$0xff] }
 0x5b7   : > { %v5038_v44 = vpop.f32.mrf.mxu2  ;;  %v7925_v9 = vor.u32 %v8712_v53, %v7922_v13 }
 0x5b8   : > { %5708 = vmatpush.bf16.msrb.mxu3 %v8093_v16  ;;  %5683 = vmatpush.bf16.msrb.mxu1 %v7957_v21  ;;  %v8744_v16 = vld [vmem:[%s12794_s9 + $0x184] sm:$0xf]  ;;  %v8791_v21 = vld [vmem:[%s12798_s13 + $0x78] sm:$0xff] }
 0x5b9   : > { %v5051_v5 = vpop.f32.mrf.mxu3  ;;  %v8053_v42 = vor.u32 %v8744_v16, %v8050_v55  ;;  %v8760_v16 = vld [vmem:[%s12796_s11] sm:$0xff] }
 0x5ba   : > { %5696 = vmatpush.bf16.msrb.mxu2 %v8021_v57  ;;  %5671 = vmatpush.bf16.msrb.mxu0 %v7885_v30  ;;  %v8782_v57 = vld [vmem:[%s12798_s13 + $0x30] sm:$0xff] }
 0x5bc   : > { %5709 = vmatpush.bf16.msrb.mxu3 %v8085_v54  ;;  %5684 = vmatpush.bf16.msrb.mxu1 %v7949_v19 }
 0x5be   : > { %5697 = vmatpush.bf16.msrb.mxu2 %v8013_v37  ;;  %5672 = vmatpush.bf16.msrb.mxu0 %v7877_v28 }
 0x5c0   : > { %5710 = vmatpush.bf16.msrb.mxu3 %v8077_v18  ;;  %5685 = vmatpush.bf16.msrb.mxu1 %v7941_v31 }
 0x5c2   : > { %5698 = vmatpush.bf16.msrb.mxu2 %v8005_v23  ;;  %5673 = vmatpush.bf16.msrb.mxu0 %v7869_v27 }
 0x5c4   : > { %5711 = vmatpush.bf16.msrb.mxu3 %v8069_v8  ;;  %5686 = vmatpush.bf16.msrb.mxu1 %v7933_v61 }
 0x5c5   : > { %v5062_v54 = vpop.f32.mrf.mxu0 }
 0x5c6   : > { %5699 = vmatpush.bf16.msrb.mxu2 %v7997_v10  ;;  %5674 = vmatpush.bf16.msrb.mxu0 %v7861_v63 }
 0x5c7   : > { %v5075_v35 = vpop.f32.mrf.mxu1 }
 0x5c8   : > { %5712 = vmatpush.bf16.msrb.mxu3 %v8061_v6  ;;  %5687 = vmatpush.bf16.msrb.mxu1 %v7925_v9  ;;  %v8775_v9 = vld [vmem:[%s12796_s11 + $0x78] sm:$0xff] }
 0x5c9   : > { %5675 = vmatmul.bf16.vlgmr.msrb.gmra.mxu0 %v12412_v15  ;;  %v12604_v15 = vld [vmem:[%s12793_s8] sm:$0xff] }
 0x5ca   : > { %5700 = vmatpush.bf16.msrb.mxu2 %v7989_v29  ;;  %v4781_v7 = vperm.slane %v12604_v15, 4  ;;  %5852 = vmatpush.bf16.msra.mxu0 %v8767_v39  ;;  %v4783_v46 = vperm.slane %v12604_v15, 6  ;;  %v4784_v63 = vperm.slane %v12604_v15, 7  ;;  %v8799_v29 = vld [vmem:[%s12800_s15 + $0x38] sm:$0xff] }
 0x5cb   : > { %5688 = vmatmul.bf16.vlgmr.msrb.gmra.mxu1 %v12420_v49  ;;  %v8789_v49 = vld [vmem:[%s12798_s13 + $0x68] sm:$0xff] }
 0x5cc   : > { %5713 = vmatpush.bf16.msrb.mxu3 %v8053_v42  ;;  %v5011_v47 = vadd.f32 %v12478_v60, %v4781_v7  ;;  %v8787_v60 = vld [vmem:[%s12798_s13 + $0x58] sm:$0xff]  ;;  %5865 = vmatpush.bf16.msra.mxu1 %v8775_v9  ;;  %v8797_v7 = vld [vmem:[%s12800_s15 + $0x28] sm:$0xff] }
 0x5cd   : > { %5701 = vmatmul.bf16.vlgmr.msrb.gmra.mxu2 %v12424_v25  ;;  %v4782_v25 = vperm.slane %v12604_v15, 5  ;;  %v5064_v18 = vpop.f32.mrf.mxu0  ;;  %v8773_v15 = vld [vmem:[%s12796_s11 + $0x68] sm:$0xff] }
 0x5ce   : > { %6009 = vmatpush.bf16.msra.mxu2 %v8783_v11  ;;  %v5024_v19 = vadd.f32 %v12489_v32, %v5011_v47  ;;  %v8786_v32 = vld [vmem:[%s12798_s13 + $0x50] sm:$0xff]  ;;  %v8768_v18 = vld [vmem:[%s12796_s11 + $0x40] sm:$0xff] }
 0x5cf   : > { %5714 = vmatmul.bf16.vlgmr.msrb.gmra.mxu3 %v12422_v33  ;;  %v8780_v33 = vld [vmem:[%s12798_s13 + $0x20] sm:$0xff]  ;;  %v5063_v26 = vadd.f32 %v5062_v54, %v4782_v25  ;;  %v5088_v37 = vpop.f32.mrf.mxu2  ;;  %v5077_v52 = vpop.f32.mrf.mxu1 }
 0x5d0   : > { %6022 = vmatpush.bf16.msra.mxu3 %v8791_v21  ;;  %v5037_v40 = vadd.f32 %v12515_v50, %v5024_v19  ;;  %v8766_v50 = vld [vmem:[%s12796_s11 + $0x30] sm:$0xff]  ;;  %v8807_v52 = vld [vmem:[%s12800_s15 + $0x78] sm:$0xff] }
 0x5d1   : > { %v5076_v30 = vadd.f32 %v5075_v35, %v5063_v26  ;;  %v5101_v56 = vpop.f32.mrf.mxu3  ;;  %5853 = vmatpush.bf16.msra.mxu0 %v8766_v50  ;;  %v8772_v26 = vld [vmem:[%s12796_s11 + $0x60] sm:$0xff] }
 0x5d2   : > { %6010 = vmatpush.bf16.msra.mxu2 %v8782_v57  ;;  %v5050_v28 = vadd.f32 %v12526_v62, %v5037_v40  ;;  %v8784_v62 = vld [vmem:[%s12798_s13 + $0x40] sm:$0xff]  ;;  %v8774_v57 = vld [vmem:[%s12796_s11 + $0x70] sm:$0xff] }
 0x5d3   : > { %v5089_v48 = vadd.f32 %v5088_v37, %v5076_v30  ;;  %5866 = vmatpush.bf16.msra.mxu1 %v8774_v57  ;;  %v8796_v35 = vld [vmem:[%s12800_s15 + $0x20] sm:$0xff]  ;;  %v8795_v30 = vld [vmem:[%s12800_s15 + $0x18] sm:$0xff]  ;;  %v8770_v37 = vld [vmem:[%s12796_s11 + $0x50] sm:$0xff] }
 0x5d4   : > { %6023 = vmatpush.bf16.msra.mxu3 %v8790_v24  ;;  %v5213_v0 = vmax.f32 %v5050_v28, 0.0  ;;  %v8798_v24 = vld [vmem:[%s12800_s15 + $0x30] sm:$0xff]  ;;  %v8792_v40 = vld [vmem:[%s12800_s15] sm:$0xff] }
 0x5d5   : > { %v5102_v59 = vadd.f32 %v5101_v56, %v5089_v48  ;;  %5854 = vmatpush.bf16.msra.mxu0 %v8765_v1  ;;  %v8794_v56 = vld [vmem:[%s12800_s15 + $0x10] sm:$0xff]  ;;  %v8793_v48 = vld [vmem:[%s12800_s15 + $0x8] sm:$0xff] }
 0x5d6   : > { %6011 = vmatpush.bf16.msra.mxu2 %v8781_v43  ;;  %v5221_v17 = vpack.c.bf16 %v5213_v0, %v5213_v0 }
 0x5d7   : > { %v5090_v31 = vpop.f32.mrf.mxu2  ;;  %v5214_v12 = vmax.f32 %v5102_v59, 0.0  ;;  %5867 = vmatpush.bf16.msra.mxu1 %v8773_v15  ;;  %v8806_v59 = vld [vmem:[%s12800_s15 + $0x70] sm:$0xff] }
 0x5d8   : > { %6024 = vmatpush.bf16.msra.mxu3 %v8789_v49 }
 0x5d9   : > { %v5103_v23 = vpop.f32.mrf.mxu3  ;;  %v5222_v8 = vpack.c.bf16 %v5214_v12, %v5214_v12  ;;  %5855 = vmatpush.bf16.msra.mxu0 %v8764_v45 }
 0x5da   : > { %6012 = vmatpush.bf16.msra.mxu2 %v8780_v33 }
 0x5db   : > { %5868 = vmatpush.bf16.msra.mxu1 %v8772_v26 }
 0x5dc   : > { %6025 = vmatpush.bf16.msra.mxu3 %v8788_v14 }
 0x5dd   : > { %5856 = vmatpush.bf16.msra.mxu0 %v8763_v51  ;;  %v8802_v51 = vld [vmem:[%s12800_s15 + $0x50] sm:$0xff] }
 0x5de   : > { %6013 = vmatpush.bf16.msra.mxu2 %v8779_v4  ;;  %v8771_v4 = vld [vmem:[%s12796_s11 + $0x58] sm:$0xff] }
 0x5df   : > { %5869 = vmatpush.bf16.msra.mxu1 %v8771_v4 }
 0x5e0   : > { %6026 = vmatpush.bf16.msra.mxu3 %v8787_v60 }
 0x5e1   : > { %5857 = vmatpush.bf16.msra.mxu0 %v8762_v22 }
 0x5e2   : > { %6014 = vmatpush.bf16.msra.mxu2 %v8778_v34  ;;  %v8769_v34 = vld [vmem:[%s12796_s11 + $0x48] sm:$0xff] }
 0x5e3   : > { %5870 = vmatpush.bf16.msra.mxu1 %v8770_v37 }
 0x5e4   : > { %6027 = vmatpush.bf16.msra.mxu3 %v8786_v32  ;;  %v5289_v32 = vld [vmem:[%s12795_s10] sm:$0x3] }
 0x5e5   : > { %v5114_v38 = vpop.f32.mrf.mxu0  ;;  %5858 = vmatpush.bf16.msra.mxu0 %v8761_v36  ;;  %v5611_v39 = vperm.slane %v5289_v32, 0  ;;  %v5612_v22 = vperm.slane %v5289_v32, 1 }
 0x5e6   : > { %6015 = vmatpush.bf16.msra.mxu2 %v8777_v58  ;;  %v5115_v27 = vadd.f32 %v5114_v38, %v4783_v46 }
 0x5e7   : > { %v5127_v61 = vpop.f32.mrf.mxu1  ;;  %5871 = vmatpush.bf16.msra.mxu1 %v8769_v34 }
 0x5e8   : > { %6028 = vmatpush.bf16.msra.mxu3 %v8785_v3  ;;  %v5128_v10 = vadd.f32 %v5127_v61, %v5115_v27  ;;  %v8805_v3 = vld [vmem:[%s12800_s15 + $0x68] sm:$0xff] }
 0x5e9   : > { %5859 = vmatpush.bf16.msra.mxu0 %v8760_v16  ;;  %v8801_v61 = vld [vmem:[%s12800_s15 + $0x48] sm:$0xff] }
 0x5ea   : > { %6016 = vmatpush.bf16.msra.mxu2 %v8776_v41 }
 0x5eb   : > { %5872 = vmatpush.bf16.msra.mxu1 %v8768_v18 }
 0x5ec   : > { %6029 = vmatpush.bf16.msra.mxu3 %v8784_v62  ;;  %v8804_v62 = vld [vmem:[%s12800_s15 + $0x60] sm:$0xff] }
 0x5ed   : > { %6017 = vmatmul.bf16.vlgmr.msra.gmra.mxu2 %v5221_v17  ;;  %v5116_v13 = vpop.f32.mrf.mxu0  ;;  %6166 = vmatpush.bf16.msrb.mxu0 %v8799_v29  ;;  %v8803_v17 = vld [vmem:[%s12800_s15 + $0x58] sm:$0xff] }
 0x5ef   : > { %6030 = vmatmul.bf16.vlgmr.msra.gmra.mxu3 %v5222_v8  ;;  %v5140_v20 = vpop.f32.mrf.mxu2  ;;  %v5129_v2 = vpop.f32.mrf.mxu1  ;;  %6179 = vmatpush.bf16.msrb.mxu1 %v8807_v52 }
 0x5f0   : > { %v5141_v53 = vadd.f32 %v5140_v20, %v5128_v10  ;;  %v8800_v10 = vld [vmem:[%s12800_s15 + $0x40] sm:$0xff] }
 0x5f1   : > { %v5153_v44 = vpop.f32.mrf.mxu3  ;;  %6167 = vmatpush.bf16.msrb.mxu0 %v8798_v24 }
 0x5f2   : > { %v12664_v6 = vadd.f32 %v5153_v44, %v5141_v53 }
 0x5f3   : > { %6180 = vmatpush.bf16.msrb.mxu1 %v8806_v59 }
 0x5f4   : > { %v5215_v20 = vmax.f32 %v12664_v6, 0.0 }
 0x5f5   : > { %6168 = vmatpush.bf16.msrb.mxu0 %v8797_v7 }
 0x5f6   : > { %v5223_v44 = vpack.c.bf16 %v5215_v20, %v5215_v20 }
 0x5f7   : > { %v5142_v5 = vpop.f32.mrf.mxu2  ;;  %6181 = vmatpush.bf16.msrb.mxu1 %v8805_v3 }
 0x5f9   : > { %v5155_v55 = vpop.f32.mrf.mxu3  ;;  %6169 = vmatpush.bf16.msrb.mxu0 %v8796_v35 }
 0x5fb   : > { %6182 = vmatpush.bf16.msrb.mxu1 %v8804_v62 }
 0x5fd   : > { %6170 = vmatpush.bf16.msrb.mxu0 %v8795_v30 }
 0x5ff   : > { %6183 = vmatpush.bf16.msrb.mxu1 %v8803_v17 }
 0x601   : > { %6171 = vmatpush.bf16.msrb.mxu0 %v8794_v56  ;;  %v6069_v56 = vld [vmem:[#allocation3] sm:$0x1] }
 0x603   : > { %6184 = vmatpush.bf16.msrb.mxu1 %v8802_v51 }
 0x605   : > { %6172 = vmatpush.bf16.msrb.mxu0 %v8793_v48 }
 0x606   : > { %v5166_v42 = vpop.f32.mrf.mxu0 }
 0x607   : > { %v5167_v11 = vadd.f32 %v5166_v42, %v4784_v63  ;;  %6185 = vmatpush.bf16.msrb.mxu1 %v8801_v61 }
 0x608   : > { %v5179_v21 = vpop.f32.mrf.mxu1 }
 0x609   : > { %v5180_v43 = vadd.f32 %v5179_v21, %v5167_v11  ;;  %6173 = vmatpush.bf16.msrb.mxu0 %v8792_v40 }
 0x60b   : > { %6186 = vmatpush.bf16.msrb.mxu1 %v8800_v10 }
 0x60e   : > { %v5168_v33 = vpop.f32.mrf.mxu0 }
 0x610   : > { %v5192_v49 = vpop.f32.mrf.mxu2  ;;  %v5181_v47 = vpop.f32.mrf.mxu1 }
 0x611   : > { %v5193_v25 = vadd.f32 %v5192_v49, %v5180_v43  ;;  %v5912_v43 = vld [vmem:[%s12799_s14] sm:$0x1] }
 0x612   : > { %v5205_v54 = vpop.f32.mrf.mxu3 }
 0x613   : > { %v12691_v14 = vadd.f32 %v5205_v54, %v5193_v25 }
 0x615   : > { %v5216_v6 = vmax.f32 %v12691_v14, 0.0  ;;  %v5755_v14 = vld [vmem:[%s12797_s12] sm:$0x1] }
 0x617   : > { %v5224_v24 = vpack.c.bf16 %v5216_v6, %v5216_v6 }
 0x618   : > { %v5194_v19 = vpop.f32.mrf.mxu2 }
 0x61a   : > { %v5207_v60 = vpop.f32.mrf.mxu3 }
 0x626   : > { %v5624_v58 = vpop.f32.mrf.mxu0 }
 0x627   : > { %v5625_v28 = vadd.f32 %v5624_v58, %v5611_v39 }
 0x628   : > { %v5637_v50 = vpop.f32.mrf.mxu1 }
 0x629   : > { %v5638_v31 = vadd.f32 %v5637_v50, %v5625_v28 }
 0x62e   : > { %v5626_v41 = vpop.f32.mrf.mxu0 }
 0x630   : > { %v5650_v23 = vpop.f32.mrf.mxu2  ;;  %v5639_v0 = vpop.f32.mrf.mxu1 }
 0x631   : > { %v5651_v12 = vadd.f32 %v5650_v23, %v5638_v31 }
 0x632   : > { %v5663_v1 = vpop.f32.mrf.mxu3 }
 0x633   : > { %v5664_v8 = vadd.f32 %v5663_v1, %v5651_v12 }
 0x635   : > { %v5719_v45 = vmax.f32 %v5664_v8, 0.0 }
 0x637   : > { %v5721_v46 = vpack.c.bf16 %v5719_v45, %v5719_v45 }
 0x638   : > { %v5652_v38 = vpop.f32.mrf.mxu2 }
 0x639   : > { %5860 = vmatmul.bf16.vlgmr.msra.gmra.mxu0 %v5721_v46 }
 0x63a   : > { %v5665_v27 = vpop.f32.mrf.mxu3 }
 0x646   : > { %v5676_v53 = vpop.f32.mrf.mxu0 }
 0x647   : > { %v5677_v2 = vadd.f32 %v5676_v53, %v5612_v22 }
 0x648   : > { %v5689_v13 = vpop.f32.mrf.mxu1 }
 0x649   : > { %6174 = vmatmul.bf16.vlgmr.msrb.gmra.mxu0 %v5223_v44  ;;  %v5690_v36 = vadd.f32 %v5689_v13, %v5677_v2 }
 0x64e   : > { %v5678_v63 = vpop.f32.mrf.mxu0 }
 0x650   : > { %v5702_v5 = vpop.f32.mrf.mxu2  ;;  %v5691_v9 = vpop.f32.mrf.mxu1 }
 0x651   : > { %v5703_v16 = vadd.f32 %v5702_v5, %v5690_v36 }
 0x652   : > { %v5715_v55 = vpop.f32.mrf.mxu3 }
 0x653   : > { %v5716_v29 = vadd.f32 %v5715_v55, %v5703_v16 }
 0x655   : > { %v5720_v42 = vmax.f32 %v5716_v29, 0.0 }
 0x657   : > { %v5722_v11 = vpack.c.bf16 %v5720_v42, %v5720_v42 }
 0x658   : > { %v5704_v21 = vpop.f32.mrf.mxu2 }
 0x659   : > { %5873 = vmatmul.bf16.vlgmr.msra.gmra.mxu1 %v5722_v11 }
 0x65a   : > { %v5717_v57 = vpop.f32.mrf.mxu3 }
 0x669   : > { %6187 = vmatmul.bf16.vlgmr.msrb.gmra.mxu1 %v5224_v24 }
 0x670   : > { %v6018_v15 = vpop.f32.mrf.mxu2 }
 0x671   : > { %v6019_v7 = vadd.f32 %v6018_v15, %v5912_v43 }
 0x672   : > { %v6031_v49 = vpop.f32.mrf.mxu3 }
 0x673   : > { %v6032_v25 = vadd.f32 %v6031_v49, %v6019_v7 }
 0x675   : > { %6036 = vst.msk [vmem:[#allocation8] sm:$0x1] %vm6035_vm9, %v6032_v25 }
 0x678   : > { %v6020_v33 = vpop.f32.mrf.mxu2 }
 0x67a   : > { %v6033_v54 = vpop.f32.mrf.mxu3 }
 0x6b6   : > { %v5861_v47 = vpop.f32.mrf.mxu0 }
 0x6b7   : > { %v5862_v30 = vadd.f32 %v5861_v47, %v5755_v14 }
 0x6be   : > { %v5863_v26 = vpop.f32.mrf.mxu0 }
 0x6c6   : > { %v6175_v35 = vpop.f32.mrf.mxu0 }
 0x6c7   : > { %v6176_v34 = vadd.f32 %v6175_v35, %v6069_v56 }
 0x6ce   : > { %v6177_v4 = vpop.f32.mrf.mxu0 }
 0x6d6   : > { %v5874_v19 = vpop.f32.mrf.mxu1 }
 0x6d7   : > { %v5875_v60 = vadd.f32 %v5874_v19, %v5862_v30 }
 0x6d9   : > { %5879 = vst.msk [vmem:[#allocation6] sm:$0x1] %vm5878_vm10, %v5875_v60 }
 0x6de   : > { %v5876_v37 = vpop.f32.mrf.mxu1 }
 0x6e6   : > { %v6188_v48 = vpop.f32.mrf.mxu1 }
 0x6e7   : > { %v6189_v18 = vadd.f32 %v6188_v48, %v6176_v34 }
 0x6e9   : > { %v8302_v40 = vmul.f32 -1.442695, %v6189_v18 }
 0x6eb   : > { %8840 = vpow2.f32 %v8302_v40 }
 0x6ee   : > { %v6190_v32 = vpop.f32.mrf.mxu1 }
 0x6f1   : > { %v8841_v52 = vpop.eup %8840 }
 0x6f2   : > { %v6195_v39 = vadd.f32 1.0, %v8841_v52 }
 0x6f4   : > { %8842 = vrcp.f32 %v6195_v39  ;;  %v6207_v28 = vand.u32 2147483648, %v6195_v39  ;;  %v6205_v31 = vand.u32 2147483647, %v6195_v39  ;;  %vm6201_vm12 = vweird.f32 %v6195_v39 }
 0x6f6   : > { %v6208_v12 = vor.u32 1.1754944e-38, %v6207_v28  ;;  %vm6206_vm15 = vcmp.eq.f32.partialorder %v6205_v31, 8.507059e+37 }
 0x6fa   : > { %v8843_v58 = vpop.eup %8842 }
 0x6fb   : > { %v6197_v59 = vmul.f32 %v8843_v58, %v6195_v39  ;;  %vm6202_vm11 = vweird.f32 %v8843_v58 }
 0x6fc   : > { %vm6203_vm13 = vmor %vm6201_vm12, %vm6202_vm11 }
 0x6fd   : > { %v6198_v50 = vsub.f32 1.0, %v6197_v59 }
 0x6ff   : > { %v6199_v3 = vmul.f32 %v8843_v58, %v6198_v50 }
 0x701   : > { %v6200_v23 = vadd.f32 %v8843_v58, %v6199_v3 }
 0x703   : > { %v6204_v41 = vsel %vm6203_vm13, %v8843_v58, %v6200_v23 }
 0x704   : > { %v6209_v1 = vsel %vm6206_vm15, %v6208_v12, %v6204_v41 }
 0x705   : > { %6212 = vst.msk [vmem:[#allocation4] sm:$0x1] %vm6211_vm14, %v6209_v1 }
 0x706 PF: > { %p8820_p6 = scmp.eq.s32.totalorder %s9058_s21, 2  ;;  %s8946_s1 = smov [#allocation6]  }
 0x707   : > { %s6231_s22 = sshll.u32 %s8946_s1, 4  ;;  %s6233_s3 = sshll.u32 %s12803_s18, 4  ;;  %s6232_s22 = int_to_ptr.vmem [resolvable:$true] %s6231_s22  ;;  %s6234_s3 = int_to_ptr.hbm [resolvable:$true] %s6233_s3 }
 0x708   : > { %8811 = dma.vmem_to_hbm [thread:$0]  (%p8820_p6), %s6232_s22, 16, %s6234_s3, [#allocation7]  }
 0x709   : > { %s6221_s28 = sshll.u32 %s12802_s17, 4  ;;  %s8947_s29 = smov [#allocation4]   ;;  %s6222_s28 = int_to_ptr.hbm [resolvable:$true] %s6221_s28 }
 0x70a   : > { %s6219_s0 = sshll.u32 %s8947_s29, 4  ;;  %s8948_s30 = smov [#allocation8]   ;;  %s6220_s0 = int_to_ptr.vmem [resolvable:$true] %s6219_s0 }
 0x70b   : > { %8809 = dma.vmem_to_hbm [thread:$0]  (%p8820_p6), %s6220_s0, 16, %s6222_s28, [#allocation5]  }
 0x70c   : > { %s6243_s16 = sshll.u32 %s8948_s30, 4  ;;  %s6245_s25 = sshll.u32 %s12804_s19, 4  ;;  %s6244_s16 = int_to_ptr.vmem [resolvable:$true] %s6243_s16  ;;  %s6246_s25 = int_to_ptr.hbm [resolvable:$true] %s6245_s25 }
 0x70d   : > { %8813 = dma.vmem_to_hbm [thread:$0]  (%p8820_p6), %s6244_s16, 16, %s6246_s25, [#allocation7]  }
 0x70e   : > { %8934 = dma.done.wait (%p8820_p6), [#allocation5], 16  }
 0x70f   : > { %8936 = vsyncadd (%p8820_p6), [#allocation5], 4294967280 }
 0x710   : > { %8938 = dma.done.wait (%p8820_p6), [#allocation7], 32  }
 0x711   : > { %8940 = vsyncadd (%p8820_p6), [#allocation7], 4294967264 }
 0x712 PF: > { %s34_s20 = sadd.s32 1, %s8943_s20  }
 0x713   : > { %p31_p7 = scmp.ge.s32.totalorder %s34_s20, 5  }
 0x715   :  { %33 = sbr.rel (!%p31_p7) target bundleno = 7 (0x7), region = 139 }
 0x71a   :  { %6269 = vsyncpa [#allocation5], 1 }
 0x71b   :  { %6271 = vsyncpa [#allocation5 + $0x1], 1 }
 0x71c   :  { %6272 = vsyncpa [#allocation7], 1 }

</bundles_post_ra>
